<compile_context>
chip_gen: v7x
topology: tpu7x:2x2x1
jax: 0.10.0
libtpu: 0.0.40
codegen_flags: <defaults>
</compile_context>

<pallas_src>
import functools

import jax
import jax.numpy as jnp
import numpy as np
from jax import lax
from jax.experimental import pallas as pl
from jax.experimental.pallas import tpu as pltpu

sentence = ("if you want to build a ship, don't drum up people together to "
            "collect wood and don't assign them tasks and work, but rather "
            "teach them to long for the endless immensity of the sea.")
char_set = list(set(sentence))
hidden_size = len(char_set)
input_size = len(char_set)
num_classes = len(char_set)
num_layers = 2
sequence_length = 10

_LANE = 128
_SUBLANE = 8


def _round_up(x, m):
    return ((x + m - 1) // m) * m


def _pad_gates(w, rows_to, Hp):
    """(rows, 4H) -> (rows_to, 4*Hp): pad each [i|f|g|o] gate block to Hp lanes."""
    rows, four_h = w.shape
    H = four_h // 4
    w = w.reshape(rows, 4, H)
    w = jnp.pad(w, ((0, rows_to - rows), (0, 0), (0, Hp - H)))
    return w.reshape(rows_to, 4 * Hp)


def lstm_fc_kernel(x_ref, wih0_ref, b0_ref, whh0_ref, w1_ref, b1_ref,
                   wfc_ref, bfc_ref, out_ref, gih0_s, h1all_s, *, T, Bp):
    Hp = whh0_ref.shape[0]

    # ---- Prologue: hoisted layer-0 input projection + bias (one MXU matmul).
    gih0_s[...] = (jnp.dot(x_ref[...], wih0_ref[...],
                           preferred_element_type=jnp.float32) + b0_ref[...])

    whh0 = whh0_ref[...]                                   # (Hp, 4Hp)
    w1 = w1_ref[...]                                       # (2Hp, 4Hp) fused [Wih1; Whh1]
    b1b = jnp.broadcast_to(b1_ref[...], (Bp, 4 * Hp))      # hoisted broadcast

    zeros = jnp.zeros((Bp, Hp), jnp.float32)

    def step(t, carry):
        h0, c0, h1, c1 = carry
        row = pl.multiple_of(t * Bp, Bp)

        # Layer 0: only the recurrent matmul is on the serial path.
        g0 = gih0_s[pl.ds(row, Bp), :] + jnp.dot(
            h0, whh0, preferred_element_type=jnp.float32)
        i0 = jax.nn.sigmoid(g0[:, 0 * Hp:1 * Hp])
        f0 = jax.nn.sigmoid(g0[:, 1 * Hp:2 * Hp])
        gg0 = jnp.tanh(g0[:, 2 * Hp:3 * Hp])
        o0 = jax.nn.sigmoid(g0[:, 3 * Hp:4 * Hp])
        c0n = f0 * c0 + i0 * gg0
        h0n = o0 * jnp.tanh(c0n)

        # Layer 1: fused input+recurrent matmul on concat([h0, h1]).
        xh = jnp.concatenate([h0n, h1], axis=1)            # (Bp, 2Hp)
        g1 = jnp.dot(xh, w1, preferred_element_type=jnp.float32) + b1b
        i1 = jax.nn.sigmoid(g1[:, 0 * Hp:1 * Hp])
        f1 = jax.nn.sigmoid(g1[:, 1 * Hp:2 * Hp])
        gg1 = jnp.tanh(g1[:, 2 * Hp:3 * Hp])
        o1 = jax.nn.sigmoid(g1[:, 3 * Hp:4 * Hp])
        c1n = f1 * c1 + i1 * gg1
        h1n = o1 * jnp.tanh(c1n)

        h1all_s[pl.ds(row, Bp), :] = h1n
        return (h0n, c0n, h1n, c1n)

    lax.fori_loop(0, T, step, (zeros, zeros, zeros, zeros), unroll=True)

    # ---- Epilogue: batched FC head, lane-dense store.
    out_ref[...] = (jnp.dot(h1all_s[...], wfc_ref[...],
                            preferred_element_type=jnp.float32) + bfc_ref[...])


def lstm_forward(x, params):
    """x: (B, T, I) batch_first, like the PyTorch module.  Returns (B*T, C)."""
    B, T, I = x.shape
    H = params["whh0"].shape[0]
    C = params["wfc"].shape[1]
    Ip = _round_up(I, _LANE)
    Hp = _round_up(H, _LANE)
    Cp = _round_up(C, _LANE)
    Bp = _round_up(B, _SUBLANE)

    # Time-major, zero-padded, flattened input: (T*Bp, Ip).
    x_tm = jnp.transpose(x, (1, 0, 2)).astype(jnp.float32)           # (T, B, I)
    x_p = jnp.pad(x_tm, ((0, 0), (0, Bp - B), (0, Ip - I)))           # (T, Bp, Ip)
    x_flat = x_p.reshape(T * Bp, Ip)

    # Zero-padded, gate-block-aligned weights.
    wih0 = _pad_gates(params["wih0"].astype(jnp.float32), Ip, Hp)     # (Ip, 4Hp)
    whh0 = _pad_gates(params["whh0"].astype(jnp.float32), Hp, Hp)     # (Hp, 4Hp)
    b0 = _pad_gates(params["b0"].astype(jnp.float32), 1, Hp)          # (1, 4Hp)
    wih1 = _pad_gates(params["wih1"].astype(jnp.float32), Hp, Hp)     # (Hp, 4Hp)
    whh1 = _pad_gates(params["whh1"].astype(jnp.float32), Hp, Hp)     # (Hp, 4Hp)
    w1 = jnp.concatenate([wih1, whh1], axis=0)                        # (2Hp, 4Hp)
    b1 = _pad_gates(params["b1"].astype(jnp.float32), 1, Hp)          # (1, 4Hp)
    wfc = jnp.pad(params["wfc"].astype(jnp.float32),
                  ((0, Hp - H), (0, Cp - C)))                         # (Hp, Cp)
    bfc = jnp.pad(params["bfc"].astype(jnp.float32), ((0, 0), (0, Cp - C)))

    vmem = pl.BlockSpec(memory_space=pltpu.MemorySpace.VMEM)
    out_pad = pl.pallas_call(
        functools.partial(lstm_fc_kernel, T=T, Bp=Bp),
        out_shape=jax.ShapeDtypeStruct((T * Bp, Cp), jnp.float32),
        in_specs=[vmem] * 8,
        out_specs=vmem,
        scratch_shapes=[
            pltpu.VMEM((T * Bp, 4 * Hp), jnp.float32),   # hoisted x@Wih0 + b0
            pltpu.VMEM((T * Bp, Hp), jnp.float32),       # per-step h1 for FC head
        ],
    )(x_flat, wih0, b0, whh0, w1, b1, wfc, bfc)

    # (T*Bp, Cp) -> (T, B, C) -> (B, T, C) -> (B*T, C)
    out = out_pad.reshape(T, Bp, Cp)[:, :B, :C]
    return jnp.transpose(out, (1, 0, 2)).reshape(B * T, C)


def lstm_reference(x, params):
    """Pure-JAX reference for correctness checking."""
    B, T, _ = x.shape
    H = params["whh0"].shape[0]

    def cell(x_in, h, c, wih, whh, b):
        gates = x_in @ wih + h @ whh + b
        i = jax.nn.sigmoid(gates[:, :H])
        f = jax.nn.sigmoid(gates[:, H:2 * H])
        g = jnp.tanh(gates[:, 2 * H:3 * H])
        o = jax.nn.sigmoid(gates[:, 3 * H:])
        c = f * c + i * g
        h = o * jnp.tanh(c)
        return h, c

    h0 = jnp.zeros((B, H), jnp.float32)
    c0 = jnp.zeros((B, H), jnp.float32)
    h1 = jnp.zeros((B, H), jnp.float32)
    c1 = jnp.zeros((B, H), jnp.float32)
    outs = []
    for t in range(T):
        h0, c0 = cell(x[:, t], h0, c0,
                      params["wih0"], params["whh0"], params["b0"])
        h1, c1 = cell(h0, h1, c1,
                      params["wih1"], params["whh1"], params["b1"])
        outs.append(h1 @ params["wfc"] + params["bfc"])
    out = jnp.stack(outs, axis=1)  # (B, T, C)
    return out.reshape(B * T, -1)


if __name__ == "__main__":
    B, T = 2, sequence_length
    I, H, C = input_size, hidden_size, num_classes

    key = jax.random.PRNGKey(0)
    keys = jax.random.split(key, 11)
    bound = 1.0 / (H ** 0.5)  # PyTorch-style U(-1/sqrt(H), 1/sqrt(H)) init

    def u(kk, shape):
        return jax.random.uniform(kk, shape, jnp.float32, -bound, bound)

    params = {
        # layer 0: weight_ih_l0 (4H,I)^T, weight_hh_l0 (4H,H)^T, b_ih+b_hh
        "wih0": u(keys[0], (I, 4 * H)),
        "whh0": u(keys[1], (H, 4 * H)),
        "b0":   u(keys[2], (1, 4 * H)) + u(keys[3], (1, 4 * H)),
        # layer 1: input size == hidden size
        "wih1": u(keys[4], (H, 4 * H)),
        "whh1": u(keys[5], (H, 4 * H)),
        "b1":   u(keys[6], (1, 4 * H)) + u(keys[7], (1, 4 * H)),
        # fc: weight (C,H)^T, bias (C,)
        "wfc":  u(keys[8], (H, C)),
        "bfc":  u(keys[9], (1, C)),
    }

    x = jax.random.normal(keys[10], (B, T, I), jnp.float32)

    fwd = jax.jit(lstm_forward)
    out = jax.block_until_ready(fwd(x, params))
    assert out.shape == (B * T, C)

    ref = lstm_reference(x, params)
    np.testing.assert_allclose(np.asarray(out), np.asarray(ref),
                               rtol=1e-4, atol=1e-4)
    print("KERNEL_OK")
</pallas_src>

<mosaic_0001>
module attributes {stable_mosaic.version = 11 : i64} {
  func.func @lstm_fc_kernel(%arg0: memref<80x128xf32, #tpu.memory_space<vmem>>, %arg1: memref<128x512xf32, #tpu.memory_space<vmem>>, %arg2: memref<1x512xf32, #tpu.memory_space<vmem>>, %arg3: memref<128x512xf32, #tpu.memory_space<vmem>>, %arg4: memref<256x512xf32, #tpu.memory_space<vmem>>, %arg5: memref<1x512xf32, #tpu.memory_space<vmem>>, %arg6: memref<128x128xf32, #tpu.memory_space<vmem>>, %arg7: memref<1x128xf32, #tpu.memory_space<vmem>>, %arg8: memref<80x128xf32, #tpu.memory_space<vmem>>, %arg9: memref<80x512xf32, #tpu.memory_space<vmem>>, %arg10: memref<80x128xf32, #tpu.memory_space<vmem>>) attributes {dimension_semantics = [], scalar_prefetch = 0 : i64, scratch_operands = 2 : i64, tpu.core_type = #tpu.core_type<tc>} {
    %c0 = arith.constant 0 : index
    %c0_0 = arith.constant 0 : index
    %0 = vector.load %arg0[%c0, %c0_0] : memref<80x128xf32, #tpu.memory_space<vmem>>, vector<80x128xf32>
    %c0_1 = arith.constant 0 : index
    %c0_2 = arith.constant 0 : index
    %1 = vector.load %arg1[%c0_1, %c0_2] : memref<128x512xf32, #tpu.memory_space<vmem>>, vector<128x512xf32>
    %cst = arith.constant dense<0.000000e+00> : vector<80x512xf32>
    %2 = tpu.matmul %0, %1, %cst {dimension_numbers = #tpu.dot_dimension_numbers<[1], [0], [0], [1], [0, 0, 1, 1], [], []>} : vector<80x128xf32>, vector<128x512xf32>, vector<80x512xf32> -> vector<80x512xf32>
    %c0_3 = arith.constant 0 : index
    %c0_4 = arith.constant 0 : index
    %3 = vector.load %arg2[%c0_3, %c0_4] : memref<1x512xf32, #tpu.memory_space<vmem>>, vector<1x512xf32>
    %4 = vector.broadcast %3 : vector<1x512xf32> to vector<80x512xf32>
    %5 = arith.addf %2, %4 : vector<80x512xf32>
    %c0_5 = arith.constant 0 : index
    %c0_6 = arith.constant 0 : index
    %6 = vector.load %arg9[%c0_5, %c0_6] : memref<80x512xf32, #tpu.memory_space<vmem>>, vector<80x512xf32>
    tpu.vector_store %arg9[%c0_5, %c0_6], %5 {strides = array<i32>} : memref<80x512xf32, #tpu.memory_space<vmem>>, vector<80x512xf32>,
    %c0_7 = arith.constant 0 : index
    %c0_8 = arith.constant 0 : index
    %7 = vector.load %arg3[%c0_7, %c0_8] : memref<128x512xf32, #tpu.memory_space<vmem>>, vector<128x512xf32>
    %c0_9 = arith.constant 0 : index
    %c0_10 = arith.constant 0 : index
    %8 = vector.load %arg4[%c0_9, %c0_10] : memref<256x512xf32, #tpu.memory_space<vmem>>, vector<256x512xf32>
    %c0_11 = arith.constant 0 : index
    %c0_12 = arith.constant 0 : index
    %9 = vector.load %arg5[%c0_11, %c0_12] : memref<1x512xf32, #tpu.memory_space<vmem>>, vector<1x512xf32>
    %10 = vector.shape_cast %9 : vector<1x512xf32> to vector<1x512xf32>
    %11 = vector.broadcast %10 : vector<1x512xf32> to vector<8x512xf32>
    %cst_13 = arith.constant 0.000000e+00 : f32
    %12 = vector.broadcast %cst_13 : f32 to vector<8x128xf32>
    %c0_i32 = arith.constant 0 : i32
    %c8_i32 = arith.constant 8 : i32
    %13 = arith.muli %c0_i32, %c8_i32 : i32
    %14 = tpu.assume_multiple %13, 8 : i32
    %15 = arith.index_cast %14 : i32 to index
    %c0_14 = arith.constant 0 : index
    %16 = vector.load %arg9[%15, %c0_14] : memref<80x512xf32, #tpu.memory_space<vmem>>, vector<8x512xf32>
    %cst_15 = arith.constant dense<0.000000e+00> : vector<8x512xf32>
    %17 = tpu.matmul %12, %7, %cst_15 {dimension_numbers = #tpu.dot_dimension_numbers<[1], [0], [0], [1], [0, 0, 1, 1], [], []>} : vector<8x128xf32>, vector<128x512xf32>, vector<8x512xf32> -> vector<8x512xf32>
    %18 = arith.addf %16, %17 : vector<8x512xf32>
    %19 = vector.extract_strided_slice %18 {offsets = [0, 0], sizes = [8, 128], strides = [1, 1]} : vector<8x512xf32> to vector<8x128xf32>
    %20 = arith.negf %19 : vector<8x128xf32>
    %21 = math.exp %20 : vector<8x128xf32>
    %cst_16 = arith.constant 1.000000e+00 : f32
    %22 = vector.broadcast %cst_16 : f32 to vector<8x128xf32>
    %23 = arith.addf %22, %21 : vector<8x128xf32>
    %24 = arith.divf %22, %23 : vector<8x128xf32>
    %25 = vector.extract_strided_slice %18 {offsets = [0, 128], sizes = [8, 128], strides = [1, 1]} : vector<8x512xf32> to vector<8x128xf32>
    %26 = arith.negf %25 : vector<8x128xf32>
    %27 = math.exp %26 : vector<8x128xf32>
    %cst_17 = arith.constant 1.000000e+00 : f32
    %28 = vector.broadcast %cst_17 : f32 to vector<8x128xf32>
    %29 = arith.addf %28, %27 : vector<8x128xf32>
    %30 = arith.divf %28, %29 : vector<8x128xf32>
    %31 = vector.extract_strided_slice %18 {offsets = [0, 256], sizes = [8, 128], strides = [1, 1]} : vector<8x512xf32> to vector<8x128xf32>
    %32 = math.tanh %31 : vector<8x128xf32>
    %33 = vector.extract_strided_slice %18 {offsets = [0, 384], sizes = [8, 128], strides = [1, 1]} : vector<8x512xf32> to vector<8x128xf32>
    %34 = arith.negf %33 : vector<8x128xf32>
    %35 = math.exp %34 : vector<8x128xf32>
    %cst_18 = arith.constant 1.000000e+00 : f32
    %36 = vector.broadcast %cst_18 : f32 to vector<8x128xf32>
    %37 = arith.addf %36, %35 : vector<8x128xf32>
    %38 = arith.divf %36, %37 : vector<8x128xf32>
    %39 = arith.mulf %30, %12 : vector<8x128xf32>
    %40 = arith.mulf %24, %32 : vector<8x128xf32>
    %41 = arith.addf %39, %40 : vector<8x128xf32>
    %42 = math.tanh %41 : vector<8x128xf32>
    %43 = arith.mulf %38, %42 : vector<8x128xf32>
    %44 = tpu.concatenate %43, %12 in 1 : vector<8x128xf32>, vector<8x128xf32> -> vector<8x256xf32>
    %cst_19 = arith.constant dense<0.000000e+00> : vector<8x512xf32>
    %45 = tpu.matmul %44, %8, %cst_19 {dimension_numbers = #tpu.dot_dimension_numbers<[1], [0], [0], [1], [0, 0, 1, 1], [], []>} : vector<8x256xf32>, vector<256x512xf32>, vector<8x512xf32> -> vector<8x512xf32>
    %46 = arith.addf %45, %11 : vector<8x512xf32>
    %47 = vector.extract_strided_slice %46 {offsets = [0, 0], sizes = [8, 128], strides = [1, 1]} : vector<8x512xf32> to vector<8x128xf32>
    %48 = arith.negf %47 : vector<8x128xf32>
    %49 = math.exp %48 : vector<8x128xf32>
    %cst_20 = arith.constant 1.000000e+00 : f32
    %50 = vector.broadcast %cst_20 : f32 to vector<8x128xf32>
    %51 = arith.addf %50, %49 : vector<8x128xf32>
    %52 = arith.divf %50, %51 : vector<8x128xf32>
    %53 = vector.extract_strided_slice %46 {offsets = [0, 128], sizes = [8, 128], strides = [1, 1]} : vector<8x512xf32> to vector<8x128xf32>
    %54 = arith.negf %53 : vector<8x128xf32>
    %55 = math.exp %54 : vector<8x128xf32>
    %cst_21 = arith.constant 1.000000e+00 : f32
    %56 = vector.broadcast %cst_21 : f32 to vector<8x128xf32>
    %57 = arith.addf %56, %55 : vector<8x128xf32>
    %58 = arith.divf %56, %57 : vector<8x128xf32>
    %59 = vector.extract_strided_slice %46 {offsets = [0, 256], sizes = [8, 128], strides = [1, 1]} : vector<8x512xf32> to vector<8x128xf32>
    %60 = math.tanh %59 : vector<8x128xf32>
    %61 = vector.extract_strided_slice %46 {offsets = [0, 384], sizes = [8, 128], strides = [1, 1]} : vector<8x512xf32> to vector<8x128xf32>
    %62 = arith.negf %61 : vector<8x128xf32>
    %63 = math.exp %62 : vector<8x128xf32>
    %cst_22 = arith.constant 1.000000e+00 : f32
    %64 = vector.broadcast %cst_22 : f32 to vector<8x128xf32>
    %65 = arith.addf %64, %63 : vector<8x128xf32>
    %66 = arith.divf %64, %65 : vector<8x128xf32>
    %67 = arith.mulf %58, %12 : vector<8x128xf32>
    %68 = arith.mulf %52, %60 : vector<8x128xf32>
    %69 = arith.addf %67, %68 : vector<8x128xf32>
    %70 = math.tanh %69 : vector<8x128xf32>
    %71 = arith.mulf %66, %70 : vector<8x128xf32>
    %72 = arith.index_cast %14 : i32 to index
    %c0_23 = arith.constant 0 : index
    %73 = vector.load %arg10[%72, %c0_23] : memref<80x128xf32, #tpu.memory_space<vmem>>, vector<8x128xf32>
    tpu.vector_store %arg10[%72, %c0_23], %71 {strides = array<i32>} : memref<80x128xf32, #tpu.memory_space<vmem>>, vector<8x128xf32>,
    %c1_i32 = arith.constant 1 : i32
    %c8_i32_24 = arith.constant 8 : i32
    %74 = arith.muli %c1_i32, %c8_i32_24 : i32
    %75 = tpu.assume_multiple %74, 8 : i32
    %76 = arith.index_cast %75 : i32 to index
    %c0_25 = arith.constant 0 : index
    %77 = vector.load %arg9[%76, %c0_25] : memref<80x512xf32, #tpu.memory_space<vmem>>, vector<8x512xf32>
    %cst_26 = arith.constant dense<0.000000e+00> : vector<8x512xf32>
    %78 = tpu.matmul %43, %7, %cst_26 {dimension_numbers = #tpu.dot_dimension_numbers<[1], [0], [0], [1], [0, 0, 1, 1], [], []>} : vector<8x128xf32>, vector<128x512xf32>, vector<8x512xf32> -> vector<8x512xf32>
    %79 = arith.addf %77, %78 : vector<8x512xf32>
    %80 = vector.extract_strided_slice %79 {offsets = [0, 0], sizes = [8, 128], strides = [1, 1]} : vector<8x512xf32> to vector<8x128xf32>
    %81 = arith.negf %80 : vector<8x128xf32>
    %82 = math.exp %81 : vector<8x128xf32>
    %cst_27 = arith.constant 1.000000e+00 : f32
    %83 = vector.broadcast %cst_27 : f32 to vector<8x128xf32>
    %84 = arith.addf %83, %82 : vector<8x128xf32>
    %85 = arith.divf %83, %84 : vector<8x128xf32>
    %86 = vector.extract_strided_slice %79 {offsets = [0, 128], sizes = [8, 128], strides = [1, 1]} : vector<8x512xf32> to vector<8x128xf32>
    %87 = arith.negf %86 : vector<8x128xf32>
    %88 = math.exp %87 : vector<8x128xf32>
    %cst_28 = arith.constant 1.000000e+00 : f32
    %89 = vector.broadcast %cst_28 : f32 to vector<8x128xf32>
    %90 = arith.addf %89, %88 : vector<8x128xf32>
    %91 = arith.divf %89, %90 : vector<8x128xf32>
    %92 = vector.extract_strided_slice %79 {offsets = [0, 256], sizes = [8, 128], strides = [1, 1]} : vector<8x512xf32> to vector<8x128xf32>
    %93 = math.tanh %92 : vector<8x128xf32>
    %94 = vector.extract_strided_slice %79 {offsets = [0, 384], sizes = [8, 128], strides = [1, 1]} : vector<8x512xf32> to vector<8x128xf32>
    %95 = arith.negf %94 : vector<8x128xf32>
    %96 = math.exp %95 : vector<8x128xf32>
    %cst_29 = arith.constant 1.000000e+00 : f32
    %97 = vector.broadcast %cst_29 : f32 to vector<8x128xf32>
    %98 = arith.addf %97, %96 : vector<8x128xf32>
    %99 = arith.divf %97, %98 : vector<8x128xf32>
    %100 = arith.mulf %91, %41 : vector<8x128xf32>
    %101 = arith.mulf %85, %93 : vector<8x128xf32>
    %102 = arith.addf %100, %101 : vector<8x128xf32>
    %103 = math.tanh %102 : vector<8x128xf32>
    %104 = arith.mulf %99, %103 : vector<8x128xf32>
    %105 = tpu.concatenate %104, %71 in 1 : vector<8x128xf32>, vector<8x128xf32> -> vector<8x256xf32>
    %cst_30 = arith.constant dense<0.000000e+00> : vector<8x512xf32>
    %106 = tpu.matmul %105, %8, %cst_30 {dimension_numbers = #tpu.dot_dimension_numbers<[1], [0], [0], [1], [0, 0, 1, 1], [], []>} : vector<8x256xf32>, vector<256x512xf32>, vector<8x512xf32> -> vector<8x512xf32>
    %107 = arith.addf %106, %11 : vector<8x512xf32>
    %108 = vector.extract_strided_slice %107 {offsets = [0, 0], sizes = [8, 128], strides = [1, 1]} : vector<8x512xf32> to vector<8x128xf32>
    %109 = arith.negf %108 : vector<8x128xf32>
    %110 = math.exp %109 : vector<8x128xf32>
    %cst_31 = arith.constant 1.000000e+00 : f32
    %111 = vector.broadcast %cst_31 : f32 to vector<8x128xf32>
    %112 = arith.addf %111, %110 : vector<8x128xf32>
    %113 = arith.divf %111, %112 : vector<8x128xf32>
    %114 = vector.extract_strided_slice %107 {offsets = [0, 128], sizes = [8, 128], strides = [1, 1]} : vector<8x512xf32> to vector<8x128xf32>
    %115 = arith.negf %114 : vector<8x128xf32>
    %116 = math.exp %115 : vector<8x128xf32>
    %cst_32 = arith.constant 1.000000e+00 : f32
    %117 = vector.broadcast %cst_32 : f32 to vector<8x128xf32>
    %118 = arith.addf %117, %116 : vector<8x128xf32>
    %119 = arith.divf %117, %118 : vector<8x128xf32>
    %120 = vector.extract_strided_slice %107 {offsets = [0, 256], sizes = [8, 128], strides = [1, 1]} : vector<8x512xf32> to vector<8x128xf32>
    %121 = math.tanh %120 : vector<8x128xf32>
    %122 = vector.extract_strided_slice %107 {offsets = [0, 384], sizes = [8, 128], strides = [1, 1]} : vector<8x512xf32> to vector<8x128xf32>
    %123 = arith.negf %122 : vector<8x128xf32>
    %124 = math.exp %123 : vector<8x128xf32>
    %cst_33 = arith.constant 1.000000e+00 : f32
    %125 = vector.broadcast %cst_33 : f32 to vector<8x128xf32>
    %126 = arith.addf %125, %124 : vector<8x128xf32>
    %127 = arith.divf %125, %126 : vector<8x128xf32>
    %128 = arith.mulf %119, %69 : vector<8x128xf32>
    %129 = arith.mulf %113, %121 : vector<8x128xf32>
    %130 = arith.addf %128, %129 : vector<8x128xf32>
    %131 = math.tanh %130 : vector<8x128xf32>
    %132 = arith.mulf %127, %131 : vector<8x128xf32>
    %133 = arith.index_cast %75 : i32 to index
    %c0_34 = arith.constant 0 : index
    %134 = vector.load %arg10[%133, %c0_34] : memref<80x128xf32, #tpu.memory_space<vmem>>, vector<8x128xf32>
    tpu.vector_store %arg10[%133, %c0_34], %132 {strides = array<i32>} : memref<80x128xf32, #tpu.memory_space<vmem>>, vector<8x128xf32>,
    %c2_i32 = arith.constant 2 : i32
    %c8_i32_35 = arith.constant 8 : i32
    %135 = arith.muli %c2_i32, %c8_i32_35 : i32
    %136 = tpu.assume_multiple %135, 8 : i32
    %137 = arith.index_cast %136 : i32 to index
    %c0_36 = arith.constant 0 : index
    %138 = vector.load %arg9[%137, %c0_36] : memref<80x512xf32, #tpu.memory_space<vmem>>, vector<8x512xf32>
    %cst_37 = arith.constant dense<0.000000e+00> : vector<8x512xf32>
    %139 = tpu.matmul %104, %7, %cst_37 {dimension_numbers = #tpu.dot_dimension_numbers<[1], [0], [0], [1], [0, 0, 1, 1], [], []>} : vector<8x128xf32>, vector<128x512xf32>, vector<8x512xf32> -> vector<8x512xf32>
    %140 = arith.addf %138, %139 : vector<8x512xf32>
    %141 = vector.extract_strided_slice %140 {offsets = [0, 0], sizes = [8, 128], strides = [1, 1]} : vector<8x512xf32> to vector<8x128xf32>
    %142 = arith.negf %141 : vector<8x128xf32>
    %143 = math.exp %142 : vector<8x128xf32>
    %cst_38 = arith.constant 1.000000e+00 : f32
    %144 = vector.broadcast %cst_38 : f32 to vector<8x128xf32>
    %145 = arith.addf %144, %143 : vector<8x128xf32>
    %146 = arith.divf %144, %145 : vector<8x128xf32>
    %147 = vector.extract_strided_slice %140 {offsets = [0, 128], sizes = [8, 128], strides = [1, 1]} : vector<8x512xf32> to vector<8x128xf32>
    %148 = arith.negf %147 : vector<8x128xf32>
    %149 = math.exp %148 : vector<8x128xf32>
    %cst_39 = arith.constant 1.000000e+00 : f32
    %150 = vector.broadcast %cst_39 : f32 to vector<8x128xf32>
    %151 = arith.addf %150, %149 : vector<8x128xf32>
    %152 = arith.divf %150, %151 : vector<8x128xf32>
    %153 = vector.extract_strided_slice %140 {offsets = [0, 256], sizes = [8, 128], strides = [1, 1]} : vector<8x512xf32> to vector<8x128xf32>
    %154 = math.tanh %153 : vector<8x128xf32>
    %155 = vector.extract_strided_slice %140 {offsets = [0, 384], sizes = [8, 128], strides = [1, 1]} : vector<8x512xf32> to vector<8x128xf32>
    %156 = arith.negf %155 : vector<8x128xf32>
    %157 = math.exp %156 : vector<8x128xf32>
    %cst_40 = arith.constant 1.000000e+00 : f32
    %158 = vector.broadcast %cst_40 : f32 to vector<8x128xf32>
    %159 = arith.addf %158, %157 : vector<8x128xf32>
    %160 = arith.divf %158, %159 : vector<8x128xf32>
    %161 = arith.mulf %152, %102 : vector<8x128xf32>
    %162 = arith.mulf %146, %154 : vector<8x128xf32>
    %163 = arith.addf %161, %162 : vector<8x128xf32>
    %164 = math.tanh %163 : vector<8x128xf32>
    %165 = arith.mulf %160, %164 : vector<8x128xf32>
    %166 = tpu.concatenate %165, %132 in 1 : vector<8x128xf32>, vector<8x128xf32> -> vector<8x256xf32>
    %cst_41 = arith.constant dense<0.000000e+00> : vector<8x512xf32>
    %167 = tpu.matmul %166, %8, %cst_41 {dimension_numbers = #tpu.dot_dimension_numbers<[1], [0], [0], [1], [0, 0, 1, 1], [], []>} : vector<8x256xf32>, vector<256x512xf32>, vector<8x512xf32> -> vector<8x512xf32>
    %168 = arith.addf %167, %11 : vector<8x512xf32>
    %169 = vector.extract_strided_slice %168 {offsets = [0, 0], sizes = [8, 128], strides = [1, 1]} : vector<8x512xf32> to vector<8x128xf32>
    %170 = arith.negf %169 : vector<8x128xf32>
    %171 = math.exp %170 : vector<8x128xf32>
    %cst_42 = arith.constant 1.000000e+00 : f32
    %172 = vector.broadcast %cst_42 : f32 to vector<8x128xf32>
    %173 = arith.addf %172, %171 : vector<8x128xf32>
    %174 = arith.divf %172, %173 : vector<8x128xf32>
    %175 = vector.extract_strided_slice %168 {offsets = [0, 128], sizes = [8, 128], strides = [1, 1]} : vector<8x512xf32> to vector<8x128xf32>
    %176 = arith.negf %175 : vector<8x128xf32>
    %177 = math.exp %176 : vector<8x128xf32>
    %cst_43 = arith.constant 1.000000e+00 : f32
    %178 = vector.broadcast %cst_43 : f32 to vector<8x128xf32>
    %179 = arith.addf %178, %177 : vector<8x128xf32>
    %180 = arith.divf %178, %179 : vector<8x128xf32>
    %181 = vector.extract_strided_slice %168 {offsets = [0, 256], sizes = [8, 128], strides = [1, 1]} : vector<8x512xf32> to vector<8x128xf32>
    %182 = math.tanh %181 : vector<8x128xf32>
    %183 = vector.extract_strided_slice %168 {offsets = [0, 384], sizes = [8, 128], strides = [1, 1]} : vector<8x512xf32> to vector<8x128xf32>
    %184 = arith.negf %183 : vector<8x128xf32>
    %185 = math.exp %184 : vector<8x128xf32>
    %cst_44 = arith.constant 1.000000e+00 : f32
    %186 = vector.broadcast %cst_44 : f32 to vector<8x128xf32>
    %187 = arith.addf %186, %185 : vector<8x128xf32>
    %188 = arith.divf %186, %187 : vector<8x128xf32>
    %189 = arith.mulf %180, %130 : vector<8x128xf32>
    %190 = arith.mulf %174, %182 : vector<8x128xf32>
    %191 = arith.addf %189, %190 : vector<8x128xf32>
    %192 = math.tanh %191 : vector<8x128xf32>
    %193 = arith.mulf %188, %192 : vector<8x128xf32>
    %194 = arith.index_cast %136 : i32 to index
    %c0_45 = arith.constant 0 : index
    %195 = vector.load %arg10[%194, %c0_45] : memref<80x128xf32, #tpu.memory_space<vmem>>, vector<8x128xf32>
    tpu.vector_store %arg10[%194, %c0_45], %193 {strides = array<i32>} : memref<80x128xf32, #tpu.memory_space<vmem>>, vector<8x128xf32>,
    %c3_i32 = arith.constant 3 : i32
    %c8_i32_46 = arith.constant 8 : i32
    %196 = arith.muli %c3_i32, %c8_i32_46 : i32
    %197 = tpu.assume_multiple %196, 8 : i32
    %198 = arith.index_cast %197 : i32 to index
    %c0_47 = arith.constant 0 : index
    %199 = vector.load %arg9[%198, %c0_47] : memref<80x512xf32, #tpu.memory_space<vmem>>, vector<8x512xf32>
    %cst_48 = arith.constant dense<0.000000e+00> : vector<8x512xf32>
    %200 = tpu.matmul %165, %7, %cst_48 {dimension_numbers = #tpu.dot_dimension_numbers<[1], [0], [0], [1], [0, 0, 1, 1], [], []>} : vector<8x128xf32>, vector<128x512xf32>, vector<8x512xf32> -> vector<8x512xf32>
    %201 = arith.addf %199, %200 : vector<8x512xf32>
    %202 = vector.extract_strided_slice %201 {offsets = [0, 0], sizes = [8, 128], strides = [1, 1]} : vector<8x512xf32> to vector<8x128xf32>
    %203 = arith.negf %202 : vector<8x128xf32>
    %204 = math.exp %203 : vector<8x128xf32>
    %cst_49 = arith.constant 1.000000e+00 : f32
    %205 = vector.broadcast %cst_49 : f32 to vector<8x128xf32>
    %206 = arith.addf %205, %204 : vector<8x128xf32>
    %207 = arith.divf %205, %206 : vector<8x128xf32>
    %208 = vector.extract_strided_slice %201 {offsets = [0, 128], sizes = [8, 128], strides = [1, 1]} : vector<8x512xf32> to vector<8x128xf32>
    %209 = arith.negf %208 : vector<8x128xf32>
    %210 = math.exp %209 : vector<8x128xf32>
    %cst_50 = arith.constant 1.000000e+00 : f32
    %211 = vector.broadcast %cst_50 : f32 to vector<8x128xf32>
    %212 = arith.addf %211, %210 : vector<8x128xf32>
    %213 = arith.divf %211, %212 : vector<8x128xf32>
    %214 = vector.extract_strided_slice %201 {offsets = [0, 256], sizes = [8, 128], strides = [1, 1]} : vector<8x512xf32> to vector<8x128xf32>
    %215 = math.tanh %214 : vector<8x128xf32>
    %216 = vector.extract_strided_slice %201 {offsets = [0, 384], sizes = [8, 128], strides = [1, 1]} : vector<8x512xf32> to vector<8x128xf32>
    %217 = arith.negf %216 : vector<8x128xf32>
    %218 = math.exp %217 : vector<8x128xf32>
    %cst_51 = arith.constant 1.000000e+00 : f32
    %219 = vector.broadcast %cst_51 : f32 to vector<8x128xf32>
    %220 = arith.addf %219, %218 : vector<8x128xf32>
    %221 = arith.divf %219, %220 : vector<8x128xf32>
    %222 = arith.mulf %213, %163 : vector<8x128xf32>
    %223 = arith.mulf %207, %215 : vector<8x128xf32>
    %224 = arith.addf %222, %223 : vector<8x128xf32>
    %225 = math.tanh %224 : vector<8x128xf32>
    %226 = arith.mulf %221, %225 : vector<8x128xf32>
    %227 = tpu.concatenate %226, %193 in 1 : vector<8x128xf32>, vector<8x128xf32> -> vector<8x256xf32>
    %cst_52 = arith.constant dense<0.000000e+00> : vector<8x512xf32>
    %228 = tpu.matmul %227, %8, %cst_52 {dimension_numbers = #tpu.dot_dimension_numbers<[1], [0], [0], [1], [0, 0, 1, 1], [], []>} : vector<8x256xf32>, vector<256x512xf32>, vector<8x512xf32> -> vector<8x512xf32>
    %229 = arith.addf %228, %11 : vector<8x512xf32>
    %230 = vector.extract_strided_slice %229 {offsets = [0, 0], sizes = [8, 128], strides = [1, 1]} : vector<8x512xf32> to vector<8x128xf32>
    %231 = arith.negf %230 : vector<8x128xf32>
    %232 = math.exp %231 : vector<8x128xf32>
    %cst_53 = arith.constant 1.000000e+00 : f32
    %233 = vector.broadcast %cst_53 : f32 to vector<8x128xf32>
    %234 = arith.addf %233, %232 : vector<8x128xf32>
    %235 = arith.divf %233, %234 : vector<8x128xf32>
    %236 = vector.extract_strided_slice %229 {offsets = [0, 128], sizes = [8, 128], strides = [1, 1]} : vector<8x512xf32> to vector<8x128xf32>
    %237 = arith.negf %236 : vector<8x128xf32>
    %238 = math.exp %237 : vector<8x128xf32>
    %cst_54 = arith.constant 1.000000e+00 : f32
    %239 = vector.broadcast %cst_54 : f32 to vector<8x128xf32>
    %240 = arith.addf %239, %238 : vector<8x128xf32>
    %241 = arith.divf %239, %240 : vector<8x128xf32>
    %242 = vector.extract_strided_slice %229 {offsets = [0, 256], sizes = [8, 128], strides = [1, 1]} : vector<8x512xf32> to vector<8x128xf32>
    %243 = math.tanh %242 : vector<8x128xf32>
    %244 = vector.extract_strided_slice %229 {offsets = [0, 384], sizes = [8, 128], strides = [1, 1]} : vector<8x512xf32> to vector<8x128xf32>
    %245 = arith.negf %244 : vector<8x128xf32>
    %246 = math.exp %245 : vector<8x128xf32>
    %cst_55 = arith.constant 1.000000e+00 : f32
    %247 = vector.broadcast %cst_55 : f32 to vector<8x128xf32>
    %248 = arith.addf %247, %246 : vector<8x128xf32>
    %249 = arith.divf %247, %248 : vector<8x128xf32>
    %250 = arith.mulf %241, %191 : vector<8x128xf32>
    %251 = arith.mulf %235, %243 : vector<8x128xf32>
    %252 = arith.addf %250, %251 : vector<8x128xf32>
    %253 = math.tanh %252 : vector<8x128xf32>
    %254 = arith.mulf %249, %253 : vector<8x128xf32>
    %255 = arith.index_cast %197 : i32 to index
    %c0_56 = arith.constant 0 : index
    %256 = vector.load %arg10[%255, %c0_56] : memref<80x128xf32, #tpu.memory_space<vmem>>, vector<8x128xf32>
    tpu.vector_store %arg10[%255, %c0_56], %254 {strides = array<i32>} : memref<80x128xf32, #tpu.memory_space<vmem>>, vector<8x128xf32>,
    %c4_i32 = arith.constant 4 : i32
    %c8_i32_57 = arith.constant 8 : i32
    %257 = arith.muli %c4_i32, %c8_i32_57 : i32
    %258 = tpu.assume_multiple %257, 8 : i32
    %259 = arith.index_cast %258 : i32 to index
    %c0_58 = arith.constant 0 : index
    %260 = vector.load %arg9[%259, %c0_58] : memref<80x512xf32, #tpu.memory_space<vmem>>, vector<8x512xf32>
    %cst_59 = arith.constant dense<0.000000e+00> : vector<8x512xf32>
    %261 = tpu.matmul %226, %7, %cst_59 {dimension_numbers = #tpu.dot_dimension_numbers<[1], [0], [0], [1], [0, 0, 1, 1], [], []>} : vector<8x128xf32>, vector<128x512xf32>, vector<8x512xf32> -> vector<8x512xf32>
    %262 = arith.addf %260, %261 : vector<8x512xf32>
    %263 = vector.extract_strided_slice %262 {offsets = [0, 0], sizes = [8, 128], strides = [1, 1]} : vector<8x512xf32> to vector<8x128xf32>
    %264 = arith.negf %263 : vector<8x128xf32>
    %265 = math.exp %264 : vector<8x128xf32>
    %cst_60 = arith.constant 1.000000e+00 : f32
    %266 = vector.broadcast %cst_60 : f32 to vector<8x128xf32>
    %267 = arith.addf %266, %265 : vector<8x128xf32>
    %268 = arith.divf %266, %267 : vector<8x128xf32>
    %269 = vector.extract_strided_slice %262 {offsets = [0, 128], sizes = [8, 128], strides = [1, 1]} : vector<8x512xf32> to vector<8x128xf32>
    %270 = arith.negf %269 : vector<8x128xf32>
    %271 = math.exp %270 : vector<8x128xf32>
    %cst_61 = arith.constant 1.000000e+00 : f32
    %272 = vector.broadcast %cst_61 : f32 to vector<8x128xf32>
    %273 = arith.addf %272, %271 : vector<8x128xf32>
    %274 = arith.divf %272, %273 : vector<8x128xf32>
    %275 = vector.extract_strided_slice %262 {offsets = [0, 256], sizes = [8, 128], strides = [1, 1]} : vector<8x512xf32> to vector<8x128xf32>
    %276 = math.tanh %275 : vector<8x128xf32>
    %277 = vector.extract_strided_slice %262 {offsets = [0, 384], sizes = [8, 128], strides = [1, 1]} : vector<8x512xf32> to vector<8x128xf32>
    %278 = arith.negf %277 : vector<8x128xf32>
    %279 = math.exp %278 : vector<8x128xf32>
    %cst_62 = arith.constant 1.000000e+00 : f32
    %280 = vector.broadcast %cst_62 : f32 to vector<8x128xf32>
    %281 = arith.addf %280, %279 : vector<8x128xf32>
    %282 = arith.divf %280, %281 : vector<8x128xf32>
    %283 = arith.mulf %274, %224 : vector<8x128xf32>
    %284 = arith.mulf %268, %276 : vector<8x128xf32>
    %285 = arith.addf %283, %284 : vector<8x128xf32>
    %286 = math.tanh %285 : vector<8x128xf32>
    %287 = arith.mulf %282, %286 : vector<8x128xf32>
    %288 = tpu.concatenate %287, %254 in 1 : vector<8x128xf32>, vector<8x128xf32> -> vector<8x256xf32>
    %cst_63 = arith.constant dense<0.000000e+00> : vector<8x512xf32>
    %289 = tpu.matmul %288, %8, %cst_63 {dimension_numbers = #tpu.dot_dimension_numbers<[1], [0], [0], [1], [0, 0, 1, 1], [], []>} : vector<8x256xf32>, vector<256x512xf32>, vector<8x512xf32> -> vector<8x512xf32>
    %290 = arith.addf %289, %11 : vector<8x512xf32>
    %291 = vector.extract_strided_slice %290 {offsets = [0, 0], sizes = [8, 128], strides = [1, 1]} : vector<8x512xf32> to vector<8x128xf32>
    %292 = arith.negf %291 : vector<8x128xf32>
    %293 = math.exp %292 : vector<8x128xf32>
    %cst_64 = arith.constant 1.000000e+00 : f32
    %294 = vector.broadcast %cst_64 : f32 to vector<8x128xf32>
    %295 = arith.addf %294, %293 : vector<8x128xf32>
    %296 = arith.divf %294, %295 : vector<8x128xf32>
    %297 = vector.extract_strided_slice %290 {offsets = [0, 128], sizes = [8, 128], strides = [1, 1]} : vector<8x512xf32> to vector<8x128xf32>
    %298 = arith.negf %297 : vector<8x128xf32>
    %299 = math.exp %298 : vector<8x128xf32>
    %cst_65 = arith.constant 1.000000e+00 : f32
    %300 = vector.broadcast %cst_65 : f32 to vector<8x128xf32>
    %301 = arith.addf %300, %299 : vector<8x128xf32>
    %302 = arith.divf %300, %301 : vector<8x128xf32>
    %303 = vector.extract_strided_slice %290 {offsets = [0, 256], sizes = [8, 128], strides = [1, 1]} : vector<8x512xf32> to vector<8x128xf32>
    %304 = math.tanh %303 : vector<8x128xf32>
    %305 = vector.extract_strided_slice %290 {offsets = [0, 384], sizes = [8, 128], strides = [1, 1]} : vector<8x512xf32> to vector<8x128xf32>
    %306 = arith.negf %305 : vector<8x128xf32>
    %307 = math.exp %306 : vector<8x128xf32>
    %cst_66 = arith.constant 1.000000e+00 : f32
    %308 = vector.broadcast %cst_66 : f32 to vector<8x128xf32>
    %309 = arith.addf %308, %307 : vector<8x128xf32>
    %310 = arith.divf %308, %309 : vector<8x128xf32>
    %311 = arith.mulf %302, %252 : vector<8x128xf32>
    %312 = arith.mulf %296, %304 : vector<8x128xf32>
    %313 = arith.addf %311, %312 : vector<8x128xf32>
    %314 = math.tanh %313 : vector<8x128xf32>
    %315 = arith.mulf %310, %314 : vector<8x128xf32>
    %316 = arith.index_cast %258 : i32 to index
    %c0_67 = arith.constant 0 : index
    %317 = vector.load %arg10[%316, %c0_67] : memref<80x128xf32, #tpu.memory_space<vmem>>, vector<8x128xf32>
    tpu.vector_store %arg10[%316, %c0_67], %315 {strides = array<i32>} : memref<80x128xf32, #tpu.memory_space<vmem>>, vector<8x128xf32>,
    %c5_i32 = arith.constant 5 : i32
    %c8_i32_68 = arith.constant 8 : i32
    %318 = arith.muli %c5_i32, %c8_i32_68 : i32
    %319 = tpu.assume_multiple %318, 8 : i32
    %320 = arith.index_cast %319 : i32 to index
    %c0_69 = arith.constant 0 : index
    %321 = vector.load %arg9[%320, %c0_69] : memref<80x512xf32, #tpu.memory_space<vmem>>, vector<8x512xf32>
    %cst_70 = arith.constant dense<0.000000e+00> : vector<8x512xf32>
    %322 = tpu.matmul %287, %7, %cst_70 {dimension_numbers = #tpu.dot_dimension_numbers<[1], [0], [0], [1], [0, 0, 1, 1], [], []>} : vector<8x128xf32>, vector<128x512xf32>, vector<8x512xf32> -> vector<8x512xf32>
    %323 = arith.addf %321, %322 : vector<8x512xf32>
    %324 = vector.extract_strided_slice %323 {offsets = [0, 0], sizes = [8, 128], strides = [1, 1]} : vector<8x512xf32> to vector<8x128xf32>
    %325 = arith.negf %324 : vector<8x128xf32>
    %326 = math.exp %325 : vector<8x128xf32>
    %cst_71 = arith.constant 1.000000e+00 : f32
    %327 = vector.broadcast %cst_71 : f32 to vector<8x128xf32>
    %328 = arith.addf %327, %326 : vector<8x128xf32>
    %329 = arith.divf %327, %328 : vector<8x128xf32>
    %330 = vector.extract_strided_slice %323 {offsets = [0, 128], sizes = [8, 128], strides = [1, 1]} : vector<8x512xf32> to vector<8x128xf32>
    %331 = arith.negf %330 : vector<8x128xf32>
    %332 = math.exp %331 : vector<8x128xf32>
    %cst_72 = arith.constant 1.000000e+00 : f32
    %333 = vector.broadcast %cst_72 : f32 to vector<8x128xf32>
    %334 = arith.addf %333, %332 : vector<8x128xf32>
    %335 = arith.divf %333, %334 : vector<8x128xf32>
    %336 = vector.extract_strided_slice %323 {offsets = [0, 256], sizes = [8, 128], strides = [1, 1]} : vector<8x512xf32> to vector<8x128xf32>
    %337 = math.tanh %336 : vector<8x128xf32>
    %338 = vector.extract_strided_slice %323 {offsets = [0, 384], sizes = [8, 128], strides = [1, 1]} : vector<8x512xf32> to vector<8x128xf32>
    %339 = arith.negf %338 : vector<8x128xf32>
    %340 = math.exp %339 : vector<8x128xf32>
    %cst_73 = arith.constant 1.000000e+00 : f32
    %341 = vector.broadcast %cst_73 : f32 to vector<8x128xf32>
    %342 = arith.addf %341, %340 : vector<8x128xf32>
    %343 = arith.divf %341, %342 : vector<8x128xf32>
    %344 = arith.mulf %335, %285 : vector<8x128xf32>
    %345 = arith.mulf %329, %337 : vector<8x128xf32>
    %346 = arith.addf %344, %345 : vector<8x128xf32>
    %347 = math.tanh %346 : vector<8x128xf32>
    %348 = arith.mulf %343, %347 : vector<8x128xf32>
    %349 = tpu.concatenate %348, %315 in 1 : vector<8x128xf32>, vector<8x128xf32> -> vector<8x256xf32>
    %cst_74 = arith.constant dense<0.000000e+00> : vector<8x512xf32>
    %350 = tpu.matmul %349, %8, %cst_74 {dimension_numbers = #tpu.dot_dimension_numbers<[1], [0], [0], [1], [0, 0, 1, 1], [], []>} : vector<8x256xf32>, vector<256x512xf32>, vector<8x512xf32> -> vector<8x512xf32>
    %351 = arith.addf %350, %11 : vector<8x512xf32>
    %352 = vector.extract_strided_slice %351 {offsets = [0, 0], sizes = [8, 128], strides = [1, 1]} : vector<8x512xf32> to vector<8x128xf32>
    %353 = arith.negf %352 : vector<8x128xf32>
    %354 = math.exp %353 : vector<8x128xf32>
    %cst_75 = arith.constant 1.000000e+00 : f32
    %355 = vector.broadcast %cst_75 : f32 to vector<8x128xf32>
    %356 = arith.addf %355, %354 : vector<8x128xf32>
    %357 = arith.divf %355, %356 : vector<8x128xf32>
    %358 = vector.extract_strided_slice %351 {offsets = [0, 128], sizes = [8, 128], strides = [1, 1]} : vector<8x512xf32> to vector<8x128xf32>
    %359 = arith.negf %358 : vector<8x128xf32>
    %360 = math.exp %359 : vector<8x128xf32>
    %cst_76 = arith.constant 1.000000e+00 : f32
    %361 = vector.broadcast %cst_76 : f32 to vector<8x128xf32>
    %362 = arith.addf %361, %360 : vector<8x128xf32>
    %363 = arith.divf %361, %362 : vector<8x128xf32>
    %364 = vector.extract_strided_slice %351 {offsets = [0, 256], sizes = [8, 128], strides = [1, 1]} : vector<8x512xf32> to vector<8x128xf32>
    %365 = math.tanh %364 : vector<8x128xf32>
    %366 = vector.extract_strided_slice %351 {offsets = [0, 384], sizes = [8, 128], strides = [1, 1]} : vector<8x512xf32> to vector<8x128xf32>
    %367 = arith.negf %366 : vector<8x128xf32>
    %368 = math.exp %367 : vector<8x128xf32>
    %cst_77 = arith.constant 1.000000e+00 : f32
    %369 = vector.broadcast %cst_77 : f32 to vector<8x128xf32>
    %370 = arith.addf %369, %368 : vector<8x128xf32>
    %371 = arith.divf %369, %370 : vector<8x128xf32>
    %372 = arith.mulf %363, %313 : vector<8x128xf32>
    %373 = arith.mulf %357, %365 : vector<8x128xf32>
    %374 = arith.addf %372, %373 : vector<8x128xf32>
    %375 = math.tanh %374 : vector<8x128xf32>
    %376 = arith.mulf %371, %375 : vector<8x128xf32>
    %377 = arith.index_cast %319 : i32 to index
    %c0_78 = arith.constant 0 : index
    %378 = vector.load %arg10[%377, %c0_78] : memref<80x128xf32, #tpu.memory_space<vmem>>, vector<8x128xf32>
    tpu.vector_store %arg10[%377, %c0_78], %376 {strides = array<i32>} : memref<80x128xf32, #tpu.memory_space<vmem>>, vector<8x128xf32>,
    %c6_i32 = arith.constant 6 : i32
    %c8_i32_79 = arith.constant 8 : i32
    %379 = arith.muli %c6_i32, %c8_i32_79 : i32
    %380 = tpu.assume_multiple %379, 8 : i32
    %381 = arith.index_cast %380 : i32 to index
    %c0_80 = arith.constant 0 : index
    %382 = vector.load %arg9[%381, %c0_80] : memref<80x512xf32, #tpu.memory_space<vmem>>, vector<8x512xf32>
    %cst_81 = arith.constant dense<0.000000e+00> : vector<8x512xf32>
    %383 = tpu.matmul %348, %7, %cst_81 {dimension_numbers = #tpu.dot_dimension_numbers<[1], [0], [0], [1], [0, 0, 1, 1], [], []>} : vector<8x128xf32>, vector<128x512xf32>, vector<8x512xf32> -> vector<8x512xf32>
    %384 = arith.addf %382, %383 : vector<8x512xf32>
    %385 = vector.extract_strided_slice %384 {offsets = [0, 0], sizes = [8, 128], strides = [1, 1]} : vector<8x512xf32> to vector<8x128xf32>
    %386 = arith.negf %385 : vector<8x128xf32>
    %387 = math.exp %386 : vector<8x128xf32>
    %cst_82 = arith.constant 1.000000e+00 : f32
    %388 = vector.broadcast %cst_82 : f32 to vector<8x128xf32>
    %389 = arith.addf %388, %387 : vector<8x128xf32>
    %390 = arith.divf %388, %389 : vector<8x128xf32>
    %391 = vector.extract_strided_slice %384 {offsets = [0, 128], sizes = [8, 128], strides = [1, 1]} : vector<8x512xf32> to vector<8x128xf32>
    %392 = arith.negf %391 : vector<8x128xf32>
    %393 = math.exp %392 : vector<8x128xf32>
    %cst_83 = arith.constant 1.000000e+00 : f32
    %394 = vector.broadcast %cst_83 : f32 to vector<8x128xf32>
    %395 = arith.addf %394, %393 : vector<8x128xf32>
    %396 = arith.divf %394, %395 : vector<8x128xf32>
    %397 = vector.extract_strided_slice %384 {offsets = [0, 256], sizes = [8, 128], strides = [1, 1]} : vector<8x512xf32> to vector<8x128xf32>
    %398 = math.tanh %397 : vector<8x128xf32>
    %399 = vector.extract_strided_slice %384 {offsets = [0, 384], sizes = [8, 128], strides = [1, 1]} : vector<8x512xf32> to vector<8x128xf32>
    %400 = arith.negf %399 : vector<8x128xf32>
    %401 = math.exp %400 : vector<8x128xf32>
    %cst_84 = arith.constant 1.000000e+00 : f32
    %402 = vector.broadcast %cst_84 : f32 to vector<8x128xf32>
    %403 = arith.addf %402, %401 : vector<8x128xf32>
    %404 = arith.divf %402, %403 : vector<8x128xf32>
    %405 = arith.mulf %396, %346 : vector<8x128xf32>
    %406 = arith.mulf %390, %398 : vector<8x128xf32>
    %407 = arith.addf %405, %406 : vector<8x128xf32>
    %408 = math.tanh %407 : vector<8x128xf32>
    %409 = arith.mulf %404, %408 : vector<8x128xf32>
    %410 = tpu.concatenate %409, %376 in 1 : vector<8x128xf32>, vector<8x128xf32> -> vector<8x256xf32>
    %cst_85 = arith.constant dense<0.000000e+00> : vector<8x512xf32>
    %411 = tpu.matmul %410, %8, %cst_85 {dimension_numbers = #tpu.dot_dimension_numbers<[1], [0], [0], [1], [0, 0, 1, 1], [], []>} : vector<8x256xf32>, vector<256x512xf32>, vector<8x512xf32> -> vector<8x512xf32>
    %412 = arith.addf %411, %11 : vector<8x512xf32>
    %413 = vector.extract_strided_slice %412 {offsets = [0, 0], sizes = [8, 128], strides = [1, 1]} : vector<8x512xf32> to vector<8x128xf32>
    %414 = arith.negf %413 : vector<8x128xf32>
    %415 = math.exp %414 : vector<8x128xf32>
    %cst_86 = arith.constant 1.000000e+00 : f32
    %416 = vector.broadcast %cst_86 : f32 to vector<8x128xf32>
    %417 = arith.addf %416, %415 : vector<8x128xf32>
    %418 = arith.divf %416, %417 : vector<8x128xf32>
    %419 = vector.extract_strided_slice %412 {offsets = [0, 128], sizes = [8, 128], strides = [1, 1]} : vector<8x512xf32> to vector<8x128xf32>
    %420 = arith.negf %419 : vector<8x128xf32>
    %421 = math.exp %420 : vector<8x128xf32>
    %cst_87 = arith.constant 1.000000e+00 : f32
    %422 = vector.broadcast %cst_87 : f32 to vector<8x128xf32>
    %423 = arith.addf %422, %421 : vector<8x128xf32>
    %424 = arith.divf %422, %423 : vector<8x128xf32>
    %425 = vector.extract_strided_slice %412 {offsets = [0, 256], sizes = [8, 128], strides = [1, 1]} : vector<8x512xf32> to vector<8x128xf32>
    %426 = math.tanh %425 : vector<8x128xf32>
    %427 = vector.extract_strided_slice %412 {offsets = [0, 384], sizes = [8, 128], strides = [1, 1]} : vector<8x512xf32> to vector<8x128xf32>
    %428 = arith.negf %427 : vector<8x128xf32>
    %429 = math.exp %428 : vector<8x128xf32>
    %cst_88 = arith.constant 1.000000e+00 : f32
    %430 = vector.broadcast %cst_88 : f32 to vector<8x128xf32>
    %431 = arith.addf %430, %429 : vector<8x128xf32>
    %432 = arith.divf %430, %431 : vector<8x128xf32>
    %433 = arith.mulf %424, %374 : vector<8x128xf32>
    %434 = arith.mulf %418, %426 : vector<8x128xf32>
    %435 = arith.addf %433, %434 : vector<8x128xf32>
    %436 = math.tanh %435 : vector<8x128xf32>
    %437 = arith.mulf %432, %436 : vector<8x128xf32>
    %438 = arith.index_cast %380 : i32 to index
    %c0_89 = arith.constant 0 : index
    %439 = vector.load %arg10[%438, %c0_89] : memref<80x128xf32, #tpu.memory_space<vmem>>, vector<8x128xf32>
    tpu.vector_store %arg10[%438, %c0_89], %437 {strides = array<i32>} : memref<80x128xf32, #tpu.memory_space<vmem>>, vector<8x128xf32>,
    %c7_i32 = arith.constant 7 : i32
    %c8_i32_90 = arith.constant 8 : i32
    %440 = arith.muli %c7_i32, %c8_i32_90 : i32
    %441 = tpu.assume_multiple %440, 8 : i32
    %442 = arith.index_cast %441 : i32 to index
    %c0_91 = arith.constant 0 : index
    %443 = vector.load %arg9[%442, %c0_91] : memref<80x512xf32, #tpu.memory_space<vmem>>, vector<8x512xf32>
    %cst_92 = arith.constant dense<0.000000e+00> : vector<8x512xf32>
    %444 = tpu.matmul %409, %7, %cst_92 {dimension_numbers = #tpu.dot_dimension_numbers<[1], [0], [0], [1], [0, 0, 1, 1], [], []>} : vector<8x128xf32>, vector<128x512xf32>, vector<8x512xf32> -> vector<8x512xf32>
    %445 = arith.addf %443, %444 : vector<8x512xf32>
    %446 = vector.extract_strided_slice %445 {offsets = [0, 0], sizes = [8, 128], strides = [1, 1]} : vector<8x512xf32> to vector<8x128xf32>
    %447 = arith.negf %446 : vector<8x128xf32>
    %448 = math.exp %447 : vector<8x128xf32>
    %cst_93 = arith.constant 1.000000e+00 : f32
    %449 = vector.broadcast %cst_93 : f32 to vector<8x128xf32>
    %450 = arith.addf %449, %448 : vector<8x128xf32>
    %451 = arith.divf %449, %450 : vector<8x128xf32>
    %452 = vector.extract_strided_slice %445 {offsets = [0, 128], sizes = [8, 128], strides = [1, 1]} : vector<8x512xf32> to vector<8x128xf32>
    %453 = arith.negf %452 : vector<8x128xf32>
    %454 = math.exp %453 : vector<8x128xf32>
    %cst_94 = arith.constant 1.000000e+00 : f32
    %455 = vector.broadcast %cst_94 : f32 to vector<8x128xf32>
    %456 = arith.addf %455, %454 : vector<8x128xf32>
    %457 = arith.divf %455, %456 : vector<8x128xf32>
    %458 = vector.extract_strided_slice %445 {offsets = [0, 256], sizes = [8, 128], strides = [1, 1]} : vector<8x512xf32> to vector<8x128xf32>
    %459 = math.tanh %458 : vector<8x128xf32>
    %460 = vector.extract_strided_slice %445 {offsets = [0, 384], sizes = [8, 128], strides = [1, 1]} : vector<8x512xf32> to vector<8x128xf32>
    %461 = arith.negf %460 : vector<8x128xf32>
    %462 = math.exp %461 : vector<8x128xf32>
    %cst_95 = arith.constant 1.000000e+00 : f32
    %463 = vector.broadcast %cst_95 : f32 to vector<8x128xf32>
    %464 = arith.addf %463, %462 : vector<8x128xf32>
    %465 = arith.divf %463, %464 : vector<8x128xf32>
    %466 = arith.mulf %457, %407 : vector<8x128xf32>
    %467 = arith.mulf %451, %459 : vector<8x128xf32>
    %468 = arith.addf %466, %467 : vector<8x128xf32>
    %469 = math.tanh %468 : vector<8x128xf32>
    %470 = arith.mulf %465, %469 : vector<8x128xf32>
    %471 = tpu.concatenate %470, %437 in 1 : vector<8x128xf32>, vector<8x128xf32> -> vector<8x256xf32>
    %cst_96 = arith.constant dense<0.000000e+00> : vector<8x512xf32>
    %472 = tpu.matmul %471, %8, %cst_96 {dimension_numbers = #tpu.dot_dimension_numbers<[1], [0], [0], [1], [0, 0, 1, 1], [], []>} : vector<8x256xf32>, vector<256x512xf32>, vector<8x512xf32> -> vector<8x512xf32>
    %473 = arith.addf %472, %11 : vector<8x512xf32>
    %474 = vector.extract_strided_slice %473 {offsets = [0, 0], sizes = [8, 128], strides = [1, 1]} : vector<8x512xf32> to vector<8x128xf32>
    %475 = arith.negf %474 : vector<8x128xf32>
    %476 = math.exp %475 : vector<8x128xf32>
    %cst_97 = arith.constant 1.000000e+00 : f32
    %477 = vector.broadcast %cst_97 : f32 to vector<8x128xf32>
    %478 = arith.addf %477, %476 : vector<8x128xf32>
    %479 = arith.divf %477, %478 : vector<8x128xf32>
    %480 = vector.extract_strided_slice %473 {offsets = [0, 128], sizes = [8, 128], strides = [1, 1]} : vector<8x512xf32> to vector<8x128xf32>
    %481 = arith.negf %480 : vector<8x128xf32>
    %482 = math.exp %481 : vector<8x128xf32>
    %cst_98 = arith.constant 1.000000e+00 : f32
    %483 = vector.broadcast %cst_98 : f32 to vector<8x128xf32>
    %484 = arith.addf %483, %482 : vector<8x128xf32>
    %485 = arith.divf %483, %484 : vector<8x128xf32>
    %486 = vector.extract_strided_slice %473 {offsets = [0, 256], sizes = [8, 128], strides = [1, 1]} : vector<8x512xf32> to vector<8x128xf32>
    %487 = math.tanh %486 : vector<8x128xf32>
    %488 = vector.extract_strided_slice %473 {offsets = [0, 384], sizes = [8, 128], strides = [1, 1]} : vector<8x512xf32> to vector<8x128xf32>
    %489 = arith.negf %488 : vector<8x128xf32>
    %490 = math.exp %489 : vector<8x128xf32>
    %cst_99 = arith.constant 1.000000e+00 : f32
    %491 = vector.broadcast %cst_99 : f32 to vector<8x128xf32>
    %492 = arith.addf %491, %490 : vector<8x128xf32>
    %493 = arith.divf %491, %492 : vector<8x128xf32>
    %494 = arith.mulf %485, %435 : vector<8x128xf32>
    %495 = arith.mulf %479, %487 : vector<8x128xf32>
    %496 = arith.addf %494, %495 : vector<8x128xf32>
    %497 = math.tanh %496 : vector<8x128xf32>
    %498 = arith.mulf %493, %497 : vector<8x128xf32>
    %499 = arith.index_cast %441 : i32 to index
    %c0_100 = arith.constant 0 : index
    %500 = vector.load %arg10[%499, %c0_100] : memref<80x128xf32, #tpu.memory_space<vmem>>, vector<8x128xf32>
    tpu.vector_store %arg10[%499, %c0_100], %498 {strides = array<i32>} : memref<80x128xf32, #tpu.memory_space<vmem>>, vector<8x128xf32>,
    %c8_i32_101 = arith.constant 8 : i32
    %c8_i32_102 = arith.constant 8 : i32
    %501 = arith.muli %c8_i32_101, %c8_i32_102 : i32
    %502 = tpu.assume_multiple %501, 8 : i32
    %503 = arith.index_cast %502 : i32 to index
    %c0_103 = arith.constant 0 : index
    %504 = vector.load %arg9[%503, %c0_103] : memref<80x512xf32, #tpu.memory_space<vmem>>, vector<8x512xf32>
    %cst_104 = arith.constant dense<0.000000e+00> : vector<8x512xf32>
    %505 = tpu.matmul %470, %7, %cst_104 {dimension_numbers = #tpu.dot_dimension_numbers<[1], [0], [0], [1], [0, 0, 1, 1], [], []>} : vector<8x128xf32>, vector<128x512xf32>, vector<8x512xf32> -> vector<8x512xf32>
    %506 = arith.addf %504, %505 : vector<8x512xf32>
    %507 = vector.extract_strided_slice %506 {offsets = [0, 0], sizes = [8, 128], strides = [1, 1]} : vector<8x512xf32> to vector<8x128xf32>
    %508 = arith.negf %507 : vector<8x128xf32>
    %509 = math.exp %508 : vector<8x128xf32>
    %cst_105 = arith.constant 1.000000e+00 : f32
    %510 = vector.broadcast %cst_105 : f32 to vector<8x128xf32>
    %511 = arith.addf %510, %509 : vector<8x128xf32>
    %512 = arith.divf %510, %511 : vector<8x128xf32>
    %513 = vector.extract_strided_slice %506 {offsets = [0, 128], sizes = [8, 128], strides = [1, 1]} : vector<8x512xf32> to vector<8x128xf32>
    %514 = arith.negf %513 : vector<8x128xf32>
    %515 = math.exp %514 : vector<8x128xf32>
    %cst_106 = arith.constant 1.000000e+00 : f32
    %516 = vector.broadcast %cst_106 : f32 to vector<8x128xf32>
    %517 = arith.addf %516, %515 : vector<8x128xf32>
    %518 = arith.divf %516, %517 : vector<8x128xf32>
    %519 = vector.extract_strided_slice %506 {offsets = [0, 256], sizes = [8, 128], strides = [1, 1]} : vector<8x512xf32> to vector<8x128xf32>
    %520 = math.tanh %519 : vector<8x128xf32>
    %521 = vector.extract_strided_slice %506 {offsets = [0, 384], sizes = [8, 128], strides = [1, 1]} : vector<8x512xf32> to vector<8x128xf32>
    %522 = arith.negf %521 : vector<8x128xf32>
    %523 = math.exp %522 : vector<8x128xf32>
    %cst_107 = arith.constant 1.000000e+00 : f32
    %524 = vector.broadcast %cst_107 : f32 to vector<8x128xf32>
    %525 = arith.addf %524, %523 : vector<8x128xf32>
    %526 = arith.divf %524, %525 : vector<8x128xf32>
    %527 = arith.mulf %518, %468 : vector<8x128xf32>
    %528 = arith.mulf %512, %520 : vector<8x128xf32>
    %529 = arith.addf %527, %528 : vector<8x128xf32>
    %530 = math.tanh %529 : vector<8x128xf32>
    %531 = arith.mulf %526, %530 : vector<8x128xf32>
    %532 = tpu.concatenate %531, %498 in 1 : vector<8x128xf32>, vector<8x128xf32> -> vector<8x256xf32>
    %cst_108 = arith.constant dense<0.000000e+00> : vector<8x512xf32>
    %533 = tpu.matmul %532, %8, %cst_108 {dimension_numbers = #tpu.dot_dimension_numbers<[1], [0], [0], [1], [0, 0, 1, 1], [], []>} : vector<8x256xf32>, vector<256x512xf32>, vector<8x512xf32> -> vector<8x512xf32>
    %534 = arith.addf %533, %11 : vector<8x512xf32>
    %535 = vector.extract_strided_slice %534 {offsets = [0, 0], sizes = [8, 128], strides = [1, 1]} : vector<8x512xf32> to vector<8x128xf32>
    %536 = arith.negf %535 : vector<8x128xf32>
    %537 = math.exp %536 : vector<8x128xf32>
    %cst_109 = arith.constant 1.000000e+00 : f32
    %538 = vector.broadcast %cst_109 : f32 to vector<8x128xf32>
    %539 = arith.addf %538, %537 : vector<8x128xf32>
    %540 = arith.divf %538, %539 : vector<8x128xf32>
    %541 = vector.extract_strided_slice %534 {offsets = [0, 128], sizes = [8, 128], strides = [1, 1]} : vector<8x512xf32> to vector<8x128xf32>
    %542 = arith.negf %541 : vector<8x128xf32>
    %543 = math.exp %542 : vector<8x128xf32>
    %cst_110 = arith.constant 1.000000e+00 : f32
    %544 = vector.broadcast %cst_110 : f32 to vector<8x128xf32>
    %545 = arith.addf %544, %543 : vector<8x128xf32>
    %546 = arith.divf %544, %545 : vector<8x128xf32>
    %547 = vector.extract_strided_slice %534 {offsets = [0, 256], sizes = [8, 128], strides = [1, 1]} : vector<8x512xf32> to vector<8x128xf32>
    %548 = math.tanh %547 : vector<8x128xf32>
    %549 = vector.extract_strided_slice %534 {offsets = [0, 384], sizes = [8, 128], strides = [1, 1]} : vector<8x512xf32> to vector<8x128xf32>
    %550 = arith.negf %549 : vector<8x128xf32>
    %551 = math.exp %550 : vector<8x128xf32>
    %cst_111 = arith.constant 1.000000e+00 : f32
    %552 = vector.broadcast %cst_111 : f32 to vector<8x128xf32>
    %553 = arith.addf %552, %551 : vector<8x128xf32>
    %554 = arith.divf %552, %553 : vector<8x128xf32>
    %555 = arith.mulf %546, %496 : vector<8x128xf32>
    %556 = arith.mulf %540, %548 : vector<8x128xf32>
    %557 = arith.addf %555, %556 : vector<8x128xf32>
    %558 = math.tanh %557 : vector<8x128xf32>
    %559 = arith.mulf %554, %558 : vector<8x128xf32>
    %560 = arith.index_cast %502 : i32 to index
    %c0_112 = arith.constant 0 : index
    %561 = vector.load %arg10[%560, %c0_112] : memref<80x128xf32, #tpu.memory_space<vmem>>, vector<8x128xf32>
    tpu.vector_store %arg10[%560, %c0_112], %559 {strides = array<i32>} : memref<80x128xf32, #tpu.memory_space<vmem>>, vector<8x128xf32>,
    %c9_i32 = arith.constant 9 : i32
    %c8_i32_113 = arith.constant 8 : i32
    %562 = arith.muli %c9_i32, %c8_i32_113 : i32
    %563 = tpu.assume_multiple %562, 8 : i32
    %564 = arith.index_cast %563 : i32 to index
    %c0_114 = arith.constant 0 : index
    %565 = vector.load %arg9[%564, %c0_114] : memref<80x512xf32, #tpu.memory_space<vmem>>, vector<8x512xf32>
    %cst_115 = arith.constant dense<0.000000e+00> : vector<8x512xf32>
    %566 = tpu.matmul %531, %7, %cst_115 {dimension_numbers = #tpu.dot_dimension_numbers<[1], [0], [0], [1], [0, 0, 1, 1], [], []>} : vector<8x128xf32>, vector<128x512xf32>, vector<8x512xf32> -> vector<8x512xf32>
    %567 = arith.addf %565, %566 : vector<8x512xf32>
    %568 = vector.extract_strided_slice %567 {offsets = [0, 0], sizes = [8, 128], strides = [1, 1]} : vector<8x512xf32> to vector<8x128xf32>
    %569 = arith.negf %568 : vector<8x128xf32>
    %570 = math.exp %569 : vector<8x128xf32>
    %cst_116 = arith.constant 1.000000e+00 : f32
    %571 = vector.broadcast %cst_116 : f32 to vector<8x128xf32>
    %572 = arith.addf %571, %570 : vector<8x128xf32>
    %573 = arith.divf %571, %572 : vector<8x128xf32>
    %574 = vector.extract_strided_slice %567 {offsets = [0, 128], sizes = [8, 128], strides = [1, 1]} : vector<8x512xf32> to vector<8x128xf32>
    %575 = arith.negf %574 : vector<8x128xf32>
    %576 = math.exp %575 : vector<8x128xf32>
    %cst_117 = arith.constant 1.000000e+00 : f32
    %577 = vector.broadcast %cst_117 : f32 to vector<8x128xf32>
    %578 = arith.addf %577, %576 : vector<8x128xf32>
    %579 = arith.divf %577, %578 : vector<8x128xf32>
    %580 = vector.extract_strided_slice %567 {offsets = [0, 256], sizes = [8, 128], strides = [1, 1]} : vector<8x512xf32> to vector<8x128xf32>
    %581 = math.tanh %580 : vector<8x128xf32>
    %582 = vector.extract_strided_slice %567 {offsets = [0, 384], sizes = [8, 128], strides = [1, 1]} : vector<8x512xf32> to vector<8x128xf32>
    %583 = arith.negf %582 : vector<8x128xf32>
    %584 = math.exp %583 : vector<8x128xf32>
    %cst_118 = arith.constant 1.000000e+00 : f32
    %585 = vector.broadcast %cst_118 : f32 to vector<8x128xf32>
    %586 = arith.addf %585, %584 : vector<8x128xf32>
    %587 = arith.divf %585, %586 : vector<8x128xf32>
    %588 = arith.mulf %579, %529 : vector<8x128xf32>
    %589 = arith.mulf %573, %581 : vector<8x128xf32>
    %590 = arith.addf %588, %589 : vector<8x128xf32>
    %591 = math.tanh %590 : vector<8x128xf32>
    %592 = arith.mulf %587, %591 : vector<8x128xf32>
    %593 = tpu.concatenate %592, %559 in 1 : vector<8x128xf32>, vector<8x128xf32> -> vector<8x256xf32>
    %cst_119 = arith.constant dense<0.000000e+00> : vector<8x512xf32>
    %594 = tpu.matmul %593, %8, %cst_119 {dimension_numbers = #tpu.dot_dimension_numbers<[1], [0], [0], [1], [0, 0, 1, 1], [], []>} : vector<8x256xf32>, vector<256x512xf32>, vector<8x512xf32> -> vector<8x512xf32>
    %595 = arith.addf %594, %11 : vector<8x512xf32>
    %596 = vector.extract_strided_slice %595 {offsets = [0, 0], sizes = [8, 128], strides = [1, 1]} : vector<8x512xf32> to vector<8x128xf32>
    %597 = arith.negf %596 : vector<8x128xf32>
    %598 = math.exp %597 : vector<8x128xf32>
    %cst_120 = arith.constant 1.000000e+00 : f32
    %599 = vector.broadcast %cst_120 : f32 to vector<8x128xf32>
    %600 = arith.addf %599, %598 : vector<8x128xf32>
    %601 = arith.divf %599, %600 : vector<8x128xf32>
    %602 = vector.extract_strided_slice %595 {offsets = [0, 128], sizes = [8, 128], strides = [1, 1]} : vector<8x512xf32> to vector<8x128xf32>
    %603 = arith.negf %602 : vector<8x128xf32>
    %604 = math.exp %603 : vector<8x128xf32>
    %cst_121 = arith.constant 1.000000e+00 : f32
    %605 = vector.broadcast %cst_121 : f32 to vector<8x128xf32>
    %606 = arith.addf %605, %604 : vector<8x128xf32>
    %607 = arith.divf %605, %606 : vector<8x128xf32>
    %608 = vector.extract_strided_slice %595 {offsets = [0, 256], sizes = [8, 128], strides = [1, 1]} : vector<8x512xf32> to vector<8x128xf32>
    %609 = math.tanh %608 : vector<8x128xf32>
    %610 = vector.extract_strided_slice %595 {offsets = [0, 384], sizes = [8, 128], strides = [1, 1]} : vector<8x512xf32> to vector<8x128xf32>
    %611 = arith.negf %610 : vector<8x128xf32>
    %612 = math.exp %611 : vector<8x128xf32>
    %cst_122 = arith.constant 1.000000e+00 : f32
    %613 = vector.broadcast %cst_122 : f32 to vector<8x128xf32>
    %614 = arith.addf %613, %612 : vector<8x128xf32>
    %615 = arith.divf %613, %614 : vector<8x128xf32>
    %616 = arith.mulf %607, %557 : vector<8x128xf32>
    %617 = arith.mulf %601, %609 : vector<8x128xf32>
    %618 = arith.addf %616, %617 : vector<8x128xf32>
    %619 = math.tanh %618 : vector<8x128xf32>
    %620 = arith.mulf %615, %619 : vector<8x128xf32>
    %621 = arith.index_cast %563 : i32 to index
    %c0_123 = arith.constant 0 : index
    %622 = vector.load %arg10[%621, %c0_123] : memref<80x128xf32, #tpu.memory_space<vmem>>, vector<8x128xf32>
    tpu.vector_store %arg10[%621, %c0_123], %620 {strides = array<i32>} : memref<80x128xf32, #tpu.memory_space<vmem>>, vector<8x128xf32>,
    %c10_i32 = arith.constant 10 : i32
    %c0_124 = arith.constant 0 : index
    %c0_125 = arith.constant 0 : index
    %623 = vector.load %arg10[%c0_124, %c0_125] : memref<80x128xf32, #tpu.memory_space<vmem>>, vector<80x128xf32>
    %c0_126 = arith.constant 0 : index
    %c0_127 = arith.constant 0 : index
    %624 = vector.load %arg6[%c0_126, %c0_127] : memref<128x128xf32, #tpu.memory_space<vmem>>, vector<128x128xf32>
    %cst_128 = arith.constant dense<0.000000e+00> : vector<80x128xf32>
    %625 = tpu.matmul %623, %624, %cst_128 {dimension_numbers = #tpu.dot_dimension_numbers<[1], [0], [0], [1], [0, 0, 1, 1], [], []>} : vector<80x128xf32>, vector<128x128xf32>, vector<80x128xf32> -> vector<80x128xf32>
    %c0_129 = arith.constant 0 : index
    %c0_130 = arith.constant 0 : index
    %626 = vector.load %arg7[%c0_129, %c0_130] : memref<1x128xf32, #tpu.memory_space<vmem>>, vector<1x128xf32>
    %627 = vector.broadcast %626 : vector<1x128xf32> to vector<80x128xf32>
    %628 = arith.addf %625, %627 : vector<80x128xf32>
    %c0_131 = arith.constant 0 : index
    %c0_132 = arith.constant 0 : index
    %629 = vector.load %arg8[%c0_131, %c0_132] : memref<80x128xf32, #tpu.memory_space<vmem>>, vector<80x128xf32>
    tpu.vector_store %arg8[%c0_131, %c0_132], %628 {strides = array<i32>} : memref<80x128xf32, #tpu.memory_space<vmem>>, vector<80x128xf32>,
    return
  }
}

</mosaic_0001>

<bundles_post_ra>
// kernel: lstm_forward.1
= control target key start
LH: loop header
LB: loop body
LE: loop exit
PB: predicated region body
PF: predicated region fallthrough
CT: control target
= control target key end

     0   :  { %v9183_v3 = vmov 0.0   ;;  %s9174_s1 = inlined_call_operand.vmem [shape: f32[128,512], index: 1, kind: input, shape index: {}]   ;;  %s9175_s3 = inlined_call_operand.vmem [shape: f32[128,512], index: 3, kind: input, shape index: {}]   ;;  %s9176_s0 = inlined_call_operand.vmem [shape: f32[80,128], index: 0, kind: input, shape index: {}]   ;;  %s9177_s4 = inlined_call_operand.vmem [shape: f32[256,512], index: 4, kind: input, shape index: {}]   ;;  %s9178_s2 = inlined_call_operand.vmem [shape: f32[1,512], index: 2, kind: input, shape index: {}]   ;;  %s9179_s5 = inlined_call_operand.vmem [shape: f32[1,512], index: 5, kind: input, shape index: {}]   ;;  %s9180_s6 = inlined_call_operand.vmem [shape: f32[128,128], index: 6, kind: input, shape index: {}]   ;;  %s9181_s7 = inlined_call_operand.vmem [shape: f32[1,128], index: 7, kind: input, shape index: {}]   ;;  %s9182_s8 = inlined_call_operand.vmem [shape: f32[80,128], index: 8, kind: output, shape index: {}]  }
   0x1   :  { %v42_v0 = vld [vmem:[%s9174_s1 + $0x18] sm:$0xff]  ;;  %v41_v2 = vld [vmem:[%s9174_s1 + $0x10] sm:$0xff]  ;;  %314 = vmatprep.mubr.f32.mxu1 %v9183_v3  ;;  %189 = vmatprep.mubr.f32.mxu0 %v9183_v3  ;;  %v40_v30 = vld [vmem:[%s9174_s1 + $0x8] sm:$0xff] }
   0x2   :  { %v46_v1 = vld [vmem:[%s9174_s1 + $0x38] sm:$0xff]  ;;  %v45_v5 = vld [vmem:[%s9174_s1 + $0x30] sm:$0xff]  ;;  %v44_v31 = vld [vmem:[%s9174_s1 + $0x28] sm:$0xff] }
   0x3   :  { %v4415_v4 = vpack.c.bf16 %v46_v1, %v42_v0  ;;  %v50_v6 = vld [vmem:[%s9174_s1 + $0x58] sm:$0xff]  ;;  %v4417_v8 = vpack.c.bf16 %v45_v5, %v41_v2  ;;  %v49_v10 = vld [vmem:[%s9174_s1 + $0x50] sm:$0xff]  ;;  %v4383_v34 = vpack.c.bf16 %v44_v31, %v40_v30  ;;  %v39_v35 = vld [vmem:[%s9174_s1] sm:$0xff] }
   0x4   :  { %v54_v7 = vld [vmem:[%s9174_s1 + $0x78] sm:$0xff]  ;;  %v53_v11 = vld [vmem:[%s9174_s1 + $0x70] sm:$0xff]  ;;  %v43_v36 = vld [vmem:[%s9174_s1 + $0x20] sm:$0xff] }
   0x5   :  { %v4419_v9 = vpack.c.bf16 %v54_v7, %v50_v6  ;;  %v58_v12 = vld [vmem:[%s9174_s1 + $0x98] sm:$0xff]  ;;  %4416 = vmatprep.subr.bf16.mxu1 %v4415_v4  ;;  %v4421_v14 = vpack.c.bf16 %v53_v11, %v49_v10  ;;  %v57_v16 = vld [vmem:[%s9174_s1 + $0x90] sm:$0xff]  ;;  %v48_v37 = vld [vmem:[%s9174_s1 + $0x48] sm:$0xff]  ;;  %4384 = vmatprep.subr.bf16.mxu0 %v4383_v34  ;;  %v4385_v40 = vpack.c.bf16 %v43_v36, %v39_v35 }
   0x6   :  { %v62_v13 = vld [vmem:[%s9174_s1 + $0xb8] sm:$0xff]  ;;  %4418 = vmatpush1.bf16.msra.mxu1 %v4417_v8  ;;  %v61_v17 = vld [vmem:[%s9174_s1 + $0xb0] sm:$0xff]  ;;  %v52_v41 = vld [vmem:[%s9174_s1 + $0x68] sm:$0xff] }
   0x7   :  { %4420 = vmatprep.subr.bf16.mxu1 %v4419_v9  ;;  %v4423_v15 = vpack.c.bf16 %v62_v13, %v58_v12  ;;  %v66_v18 = vld [vmem:[%s9174_s1 + $0xd8] sm:$0xff]  ;;  %v4425_v20 = vpack.c.bf16 %v61_v17, %v57_v16  ;;  %v65_v22 = vld [vmem:[%s9174_s1 + $0xd0] sm:$0xff]  ;;  %v4387_v44 = vpack.c.bf16 %v52_v41, %v48_v37  ;;  %v47_v45 = vld [vmem:[%s9174_s1 + $0x40] sm:$0xff]  ;;  %4386 = vmatpush1.bf16.msra.mxu0 %v4385_v40 }
   0x8   :  { %v70_v19 = vld [vmem:[%s9174_s1 + $0xf8] sm:$0xff]  ;;  %v69_v23 = vld [vmem:[%s9174_s1 + $0xf0] sm:$0xff]  ;;  %v51_v46 = vld [vmem:[%s9174_s1 + $0x60] sm:$0xff] }
   0x9   :  { %v4427_v21 = vpack.c.bf16 %v70_v19, %v66_v18  ;;  %v74_v24 = vld [vmem:[%s9174_s1 + $0x118] sm:$0xff]  ;;  %v4429_v26 = vpack.c.bf16 %v69_v23, %v65_v22  ;;  %v73_v27 = vld [vmem:[%s9174_s1 + $0x110] sm:$0xff]  ;;  %v4389_v49 = vpack.c.bf16 %v51_v46, %v47_v45  ;;  %v56_v50 = vld [vmem:[%s9174_s1 + $0x88] sm:$0xff]  ;;  %4388 = vmatprep.subr.bf16.mxu0 %v4387_v44 }
   0xa   :  { %4422 = vmatpush1.bf16.msra.mxu1 %v4421_v14  ;;  %v78_v25 = vld [vmem:[%s9174_s1 + $0x138] sm:$0xff]  ;;  %v77_v29 = vld [vmem:[%s9174_s1 + $0x130] sm:$0xff]  ;;  %v60_v51 = vld [vmem:[%s9174_s1 + $0xa8] sm:$0xff] }
   0xb   :  { %4424 = vmatprep.subr.bf16.mxu1 %v4423_v15  ;;  %v4431_v28 = vpack.c.bf16 %v78_v25, %v74_v24  ;;  %v82_v32 = vld [vmem:[%s9174_s1 + $0x158] sm:$0xff]  ;;  %v4433_v38 = vpack.c.bf16 %v77_v29, %v73_v27  ;;  %v81_v39 = vld [vmem:[%s9174_s1 + $0x150] sm:$0xff]  ;;  %v55_v52 = vld [vmem:[%s9174_s1 + $0x80] sm:$0xff]  ;;  %v4391_v55 = vpack.c.bf16 %v60_v51, %v56_v50  ;;  %4390 = vmatpush1.bf16.msra.mxu0 %v4389_v49 }
   0xc   :  { %v86_v33 = vld [vmem:[%s9174_s1 + $0x178] sm:$0xff]  ;;  %v85_v43 = vld [vmem:[%s9174_s1 + $0x170] sm:$0xff]  ;;  %v59_v53 = vld [vmem:[%s9174_s1 + $0xa0] sm:$0xff] }
   0xd   :  { %v4435_v42 = vpack.c.bf16 %v86_v33, %v82_v32  ;;  %v90_v47 = vld [vmem:[%s9174_s1 + $0x198] sm:$0xff]  ;;  %v4437_v54 = vpack.c.bf16 %v85_v43, %v81_v39  ;;  %v89_v57 = vld [vmem:[%s9174_s1 + $0x190] sm:$0xff]  ;;  %v64_v59 = vld [vmem:[%s9174_s1 + $0xc8] sm:$0xff]  ;;  %v4393_v62 = vpack.c.bf16 %v59_v53, %v55_v52  ;;  %4392 = vmatprep.subr.bf16.mxu0 %v4391_v55 }
   0xe   :  { %4426 = vmatpush1.bf16.msra.mxu1 %v4425_v20  ;;  %v94_v48 = vld [vmem:[%s9174_s1 + $0x1b8] sm:$0xff]  ;;  %v93_v58 = vld [vmem:[%s9174_s1 + $0x1b0] sm:$0xff]  ;;  %v68_v63 = vld [vmem:[%s9174_s1 + $0xe8] sm:$0xff] }
   0xf   :  { %4428 = vmatprep.subr.bf16.mxu1 %v4427_v21  ;;  %v4439_v56 = vpack.c.bf16 %v94_v48, %v90_v47  ;;  %v98_v60 = vld [vmem:[%s9174_s1 + $0x1d8] sm:$0xff]  ;;  %v4395_v0 = vpack.c.bf16 %v68_v63, %v64_v59  ;;  %v63_v1 = vld [vmem:[%s9174_s1 + $0xc0] sm:$0xff]  ;;  %v4441_v4 = vpack.c.bf16 %v93_v58, %v89_v57  ;;  %v72_v5 = vld [vmem:[%s9174_s1 + $0x108] sm:$0xff]  ;;  %4394 = vmatpush1.bf16.msra.mxu0 %v4393_v62 }
  0x10   :  { %v102_v61 = vld [vmem:[%s9174_s1 + $0x1f8] sm:$0xff]  ;;  %v67_v2 = vld [vmem:[%s9174_s1 + $0xe0] sm:$0xff]  ;;  %v97_v7 = vld [vmem:[%s9174_s1 + $0x1d0] sm:$0xff] }
  0x11   :  { %v4443_v6 = vpack.c.bf16 %v102_v61, %v98_v60  ;;  %v101_v8 = vld [vmem:[%s9174_s1 + $0x1f0] sm:$0xff]  ;;  %v76_v9 = vld [vmem:[%s9174_s1 + $0x128] sm:$0xff]  ;;  %v4397_v12 = vpack.c.bf16 %v67_v2, %v63_v1  ;;  %4396 = vmatprep.subr.bf16.mxu0 %v4395_v0  ;;  %v71_v14 = vld [vmem:[%s9174_s1 + $0x100] sm:$0xff] }
  0x12   :  { %4430 = vmatpush1.bf16.msra.mxu1 %v4429_v26  ;;  %v416_v10 = vld [vmem:[%s9175_s3 + $0x8] sm:$0xff]  ;;  %v4399_v13 = vpack.c.bf16 %v76_v9, %v72_v5  ;;  %v75_v15 = vld [vmem:[%s9174_s1 + $0x120] sm:$0xff]  ;;  %v4445_v16 = vpack.c.bf16 %v101_v8, %v97_v7  ;;  %v32_v62 = vld [vmem:[%s9176_s0 + $0x18] sm:$0xff] }
  0x13   :  { %4432 = vmatprep.subr.bf16.mxu1 %v4431_v28  ;;  %v420_v11 = vld [vmem:[%s9175_s3 + $0x28] sm:$0xff]  ;;  %v415_v20 = vld [vmem:[%s9175_s3] sm:$0xff]  ;;  %4398 = vmatpush1.bf16.msra.mxu0 %v4397_v12  ;;  %v4401_v24 = vpack.c.bf16 %v75_v15, %v71_v14 }
  0x14   :  { %v80_v17 = vld [vmem:[%s9174_s1 + $0x148] sm:$0xff]  ;;  %v7016_v19 = vpack.c.bf16 %v420_v11, %v416_v10  ;;  %v419_v21 = vld [vmem:[%s9175_s3 + $0x20] sm:$0xff]  ;;  %4400 = vmatprep.subr.bf16.mxu0 %v4399_v13 }
  0x15   :  { %v84_v18 = vld [vmem:[%s9174_s1 + $0x168] sm:$0xff]  ;;  %v79_v26 = vld [vmem:[%s9174_s1 + $0x140] sm:$0xff]  ;;  %v7041_v29 = vpack.c.bf16 %v419_v21, %v415_v20  ;;  %v35_v21 = vld [vmem:[%s9176_s0 + $0x30] sm:$0xff] }
  0x16   :  { %4434 = vmatpush1.bf16.msra.mxu1 %v4433_v38  ;;  %9322 = vst [vmem:[#allocation4_spill] sm:$0xff] %v7016_v19  ;;  %v424_v22 = vld [vmem:[%s9175_s3 + $0x48] sm:$0xff]  ;;  %v4403_v25 = vpack.c.bf16 %v84_v18, %v80_v17  ;;  %v83_v27 = vld [vmem:[%s9174_s1 + $0x160] sm:$0xff] }
  0x17   :  { %4436 = vmatprep.subr.bf16.mxu1 %v4435_v42  ;;  %v428_v23 = vld [vmem:[%s9175_s3 + $0x68] sm:$0xff]  ;;  %v7039_v28 = vld [vmem:[%s9176_s0] sm:$0xff]  ;;  %4402 = vmatpush1.bf16.msra.mxu0 %v4401_v24  ;;  %v4405_v37 = vpack.c.bf16 %v83_v27, %v79_v26  ;;  %v418_v26 = vld [vmem:[%s9175_s3 + $0x18] sm:$0xff] }
  0x18   :  { %v88_v30 = vld [vmem:[%s9174_s1 + $0x188] sm:$0xff]  ;;  %v7050_v32 = vpack.c.bf16 %v428_v23, %v424_v22  ;;  %v423_v33 = vld [vmem:[%s9175_s3 + $0x40] sm:$0xff]  ;;  %4404 = vmatprep.subr.bf16.mxu0 %v4403_v25  ;;  %v422_v27 = vld [vmem:[%s9175_s3 + $0x38] sm:$0xff] }
  0x19   :  { %v92_v31 = vld [vmem:[%s9174_s1 + $0x1a8] sm:$0xff]  ;;  %v427_v34 = vld [vmem:[%s9175_s3 + $0x60] sm:$0xff] }
  0x1a   :  { %4438 = vmatpush1.bf16.msra.mxu1 %v4437_v54  ;;  %v432_v35 = vld [vmem:[%s9175_s3 + $0x88] sm:$0xff]  ;;  %v4407_v38 = vpack.c.bf16 %v92_v31, %v88_v30  ;;  %v87_v39 = vld [vmem:[%s9174_s1 + $0x180] sm:$0xff]  ;;  %v7078_v42 = vpack.c.bf16 %v427_v34, %v423_v33  ;;  %v31_v54 = vld [vmem:[%s9176_s0 + $0x10] sm:$0xff]  ;;  %v7231_v31 = vpack.c.bf16 %v422_v27, %v418_v26 }
  0x1b   :  { %4440 = vmatprep.subr.bf16.mxu1 %v4439_v56  ;;  %v436_v36 = vld [vmem:[%s9175_s3 + $0xa8] sm:$0xff]  ;;  %v91_v40 = vld [vmem:[%s9174_s1 + $0x1a0] sm:$0xff]  ;;  %4406 = vmatpush1.bf16.msra.mxu0 %v4405_v37  ;;  %v426_v37 = vld [vmem:[%s9175_s3 + $0x58] sm:$0xff] }
  0x1c   :  { %v7076_v41 = vld [vmem:[%s9176_s0 + $0x8] sm:$0xff]  ;;  %v7087_v45 = vpack.c.bf16 %v436_v36, %v432_v35  ;;  %v431_v46 = vld [vmem:[%s9175_s3 + $0x80] sm:$0xff]  ;;  %v4409_v50 = vpack.c.bf16 %v91_v40, %v87_v39  ;;  %4408 = vmatprep.subr.bf16.mxu0 %v4407_v38  ;;  %9323 = vst [vmem:[#allocation5_spill] sm:$0xff] %v7231_v31  ;;  %v417_v35 = vld [vmem:[%s9175_s3 + $0x10] sm:$0xff] }
  0x1d   :  { %v96_v43 = vld [vmem:[%s9174_s1 + $0x1c8] sm:$0xff]  ;;  %v435_v47 = vld [vmem:[%s9175_s3 + $0xa0] sm:$0xff]  ;;  %v421_v36 = vld [vmem:[%s9175_s3 + $0x30] sm:$0xff] }
  0x1e   :  { %4442 = vmatpush1.bf16.msra.mxu1 %v4441_v4  ;;  %v100_v44 = vld [vmem:[%s9174_s1 + $0x1e8] sm:$0xff]  ;;  %v95_v52 = vld [vmem:[%s9174_s1 + $0x1c0] sm:$0xff]  ;;  %v7113_v55 = vpack.c.bf16 %v435_v47, %v431_v46  ;;  %v430_v38 = vld [vmem:[%s9175_s3 + $0x78] sm:$0xff]  ;;  %v7259_v39 = vpack.c.bf16 %v421_v36, %v417_v35 }
  0x1f   :  { %4444 = vmatprep.subr.bf16.mxu1 %v4443_v6  ;;  %v440_v48 = vld [vmem:[%s9175_s3 + $0xc8] sm:$0xff]  ;;  %v4411_v51 = vpack.c.bf16 %v100_v44, %v96_v43  ;;  %v99_v53 = vld [vmem:[%s9174_s1 + $0x1e0] sm:$0xff]  ;;  %4410 = vmatpush1.bf16.msra.mxu0 %v4409_v50  ;;  %v7261_v40 = vpack.c.bf16 %v430_v38, %v426_v37  ;;  %v429_v43 = vld [vmem:[%s9175_s3 + $0x70] sm:$0xff] }
  0x20   :  { %v444_v49 = vld [vmem:[%s9175_s3 + $0xe8] sm:$0xff]  ;;  %v439_v57 = vld [vmem:[%s9175_s3 + $0xc0] sm:$0xff]  ;;  %v4413_v61 = vpack.c.bf16 %v99_v53, %v95_v52  ;;  %v434_v44 = vld [vmem:[%s9175_s3 + $0x98] sm:$0xff] }
  0x21   :  { %v7116_v56 = vpack.c.bf16 %v444_v49, %v440_v48  ;;  %v443_v58 = vld [vmem:[%s9175_s3 + $0xe0] sm:$0xff]  ;;  %v448_v59 = vld [vmem:[%s9175_s3 + $0x108] sm:$0xff]  ;;  %4412 = vmatprep.subr.bf16.mxu0 %v4411_v51  ;;  %v438_v46 = vld [vmem:[%s9175_s3 + $0xb8] sm:$0xff] }
  0x22   :  { %4446 = vmatpush1.bf16.msra.mxu1 %v4445_v16  ;;  %v452_v60 = vld [vmem:[%s9175_s3 + $0x128] sm:$0xff]  ;;  %v7135_v63 = vpack.c.bf16 %v443_v58, %v439_v57  ;;  %v447_v1 = vld [vmem:[%s9175_s3 + $0x100] sm:$0xff]  ;;  %v7282_v48 = vpack.c.bf16 %v438_v46, %v434_v44  ;;  %v433_v49 = vld [vmem:[%s9175_s3 + $0x90] sm:$0xff] }
  0x23   :  { %4448 = vmatprep.subr.bf16.mxu1 %v7016_v19  ;;  %v7138_v0 = vpack.c.bf16 %v452_v60, %v448_v59  ;;  %v451_v2 = vld [vmem:[%s9175_s3 + $0x120] sm:$0xff]  ;;  %v456_v4 = vld [vmem:[%s9175_s3 + $0x148] sm:$0xff]  ;;  %4414 = vmatpush1.bf16.msra.mxu0 %v4413_v61  ;;  %v437_v50 = vld [vmem:[%s9175_s3 + $0xb0] sm:$0xff] }
  0x24   :  { %v460_v5 = vld [vmem:[%s9175_s3 + $0x168] sm:$0xff]  ;;  %v33_v6 = vld [vmem:[%s9176_s0 + $0x20] sm:$0xff]  ;;  %v7157_v7 = vpack.c.bf16 %v451_v2, %v447_v1  ;;  %v442_v51 = vld [vmem:[%s9175_s3 + $0xd8] sm:$0xff]  ;;  %v7298_v53 = vpack.c.bf16 %v437_v50, %v433_v49 }
  0x25   :  { %315 = vmatmul.mubr.f32.vlgmr.msra.gmra.mrb[0].mxu1 %v7039_v28  ;;  %v7160_v8 = vpack.c.bf16 %v460_v5, %v456_v4  ;;  %v455_v9 = vld [vmem:[%s9175_s3 + $0x140] sm:$0xff]  ;;  %v464_v11 = vld [vmem:[%s9175_s3 + $0x188] sm:$0xff]  ;;  %v446_v52 = vld [vmem:[%s9175_s3 + $0xf8] sm:$0xff] }
  0x26   :  { %4450 = vmatpush1.bf16.msra.mxu1 %v7041_v29  ;;  %320 = vmatprep.mubr.f32.mxu1 %v9183_v3  ;;  %v459_v10 = vld [vmem:[%s9175_s3 + $0x160] sm:$0xff]  ;;  %v468_v12 = vld [vmem:[%s9175_s3 + $0x1a8] sm:$0xff]  ;;  %v441_v57 = vld [vmem:[%s9175_s3 + $0xd0] sm:$0xff] }
  0x27   :  { %4452 = vmatprep.subr.bf16.mxu1 %v7050_v32  ;;  %190 = vmatmul.mubr.f32.vlgmr.msra.gmra.mrb[0].mxu0 %v7039_v28  ;;  %v34_v13 = vld [vmem:[%s9176_s0 + $0x28] sm:$0xff]  ;;  %v7181_v14 = vpack.c.bf16 %v459_v10, %v455_v9  ;;  %v7184_v15 = vpack.c.bf16 %v468_v12, %v464_v11  ;;  %v463_v16 = vld [vmem:[%s9175_s3 + $0x180] sm:$0xff]  ;;  %v36_v28 = vld [vmem:[%s9176_s0 + $0x38] sm:$0xff] }
  0x28   :  { %195 = vmatprep.mubr.f32.mxu0 %v9183_v3  ;;  %v467_v17 = vld [vmem:[%s9175_s3 + $0x1a0] sm:$0xff]  ;;  %v472_v18 = vld [vmem:[%s9175_s3 + $0x1c8] sm:$0xff]  ;;  %v445_v58 = vld [vmem:[%s9175_s3 + $0xf0] sm:$0xff] }
  0x29   :  { %321 = vmatmul.mubr.f32.gmra.mrb[2].mxu1 %v7076_v41  ;;  %v476_v20 = vld [vmem:[%s9175_s3 + $0x1e8] sm:$0xff]  ;;  %v7205_v22 = vpack.c.bf16 %v467_v17, %v463_v16  ;;  %v471_v24 = vld [vmem:[%s9175_s3 + $0x1c0] sm:$0xff]  ;;  %v450_v59 = vld [vmem:[%s9175_s3 + $0x118] sm:$0xff]  ;;  %v7317_v61 = vpack.c.bf16 %v445_v58, %v441_v57 }
  0x2a   :  { %4454 = vmatpush1.bf16.msra.mxu1 %v7078_v42  ;;  %326 = vmatprep.mubr.f32.mxu1 %v9183_v3  ;;  %v7208_v23 = vpack.c.bf16 %v476_v20, %v472_v18  ;;  %v475_v25 = vld [vmem:[%s9175_s3 + $0x1e0] sm:$0xff]  ;;  %v38_v34 = vld [vmem:[%s9176_s0 + $0x48] sm:$0xff]  ;;  %v454_v60 = vld [vmem:[%s9175_s3 + $0x138] sm:$0xff] }
  0x2b   :  { %4456 = vmatprep.subr.bf16.mxu1 %v7087_v45  ;;  %196 = vmatmul.mubr.f32.gmra.mrb[2].mxu0 %v7076_v41  ;;  %v7228_v30 = vpack.c.bf16 %v475_v25, %v471_v24  ;;  %v37_v33 = vld [vmem:[%s9176_s0 + $0x40] sm:$0xff]  ;;  %v425_v41 = vld [vmem:[%s9175_s3 + $0x50] sm:$0xff]  ;;  %v458_v4 = vld [vmem:[%s9175_s3 + $0x158] sm:$0xff] }
  0x2c   :  { %201 = vmatprep.mubr.f32.mxu0 %v9183_v3  ;;  %v7278_v47 = vpack.c.bf16 %v429_v43, %v425_v41  ;;  %v449_v1 = vld [vmem:[%s9175_s3 + $0x110] sm:$0xff]  ;;  %v462_v5 = vld [vmem:[%s9175_s3 + $0x178] sm:$0xff]  ;;  %v484_v35 = vld [vmem:[%s9177_s4 + $0x28] sm:$0xff] }
  0x2d   :  { %327 = vmatmul.mubr.f32.gmra.mrb[4].mxu1 %v31_v54  ;;  %v453_v2 = vld [vmem:[%s9175_s3 + $0x130] sm:$0xff]  ;;  %v7339_v9 = vpack.c.bf16 %v462_v5, %v458_v4  ;;  %v466_v12 = vld [vmem:[%s9175_s3 + $0x198] sm:$0xff]  ;;  %v479_v41 = vld [vmem:[%s9177_s4] sm:$0xff] }
  0x2e   :  { %332 = vmatprep.mubr.f32.mxu1 %v9183_v3  ;;  %4458 = vmatpush1.bf16.msra.mxu1 %v7113_v55  ;;  %v457_v10 = vld [vmem:[%s9175_s3 + $0x150] sm:$0xff]  ;;  %v478_v24 = vld [vmem:[%s9175_s3 + $0x1f8] sm:$0xff]  ;;  %v483_v43 = vld [vmem:[%s9177_s4 + $0x20] sm:$0xff] }
  0x2f   :  { %4460 = vmatprep.subr.bf16.mxu1 %v7116_v56  ;;  %202 = vmatmul.mubr.f32.gmra.mrb[4].mxu0 %v31_v54  ;;  %v7301_v54 = vpack.c.bf16 %v446_v52, %v442_v51  ;;  %v461_v11 = vld [vmem:[%s9175_s3 + $0x170] sm:$0xff]  ;;  %v482_v36 = vld [vmem:[%s9177_s4 + $0x18] sm:$0xff]  ;;  %v7412_v46 = vpack.c.bf16 %v483_v43, %v479_v41  ;;  %v488_v52 = vld [vmem:[%s9177_s4 + $0x48] sm:$0xff] }
  0x30   :  { %207 = vmatprep.mubr.f32.mxu0 %v9183_v3  ;;  %v7354_v16 = vpack.c.bf16 %v461_v11, %v457_v10  ;;  %v465_v18 = vld [vmem:[%s9175_s3 + $0x190] sm:$0xff]  ;;  %v486_v38 = vld [vmem:[%s9177_s4 + $0x38] sm:$0xff]  ;;  %v492_v57 = vld [vmem:[%s9177_s4 + $0x68] sm:$0xff] }
  0x31   :  { %333 = vmatmul.mubr.f32.gmra.mrb[6].mxu1 %v32_v62  ;;  %v469_v20 = vld [vmem:[%s9175_s3 + $0x1b0] sm:$0xff]  ;;  %v7410_v44 = vpack.c.bf16 %v486_v38, %v482_v36  ;;  %v490_v58 = vld [vmem:[%s9177_s4 + $0x58] sm:$0xff]  ;;  %v504_v43 = vld [vmem:[%s9177_s4 + $0xc8] sm:$0xff] }
  0x32   :  { %338 = vmatprep.mubr.f32.mxu1 %v9183_v3  ;;  %4462 = vmatpush1.bf16.msra.mxu1 %v7135_v63  ;;  %v7372_v25 = vpack.c.bf16 %v469_v20, %v465_v18  ;;  %v473_v27 = vld [vmem:[%s9175_s3 + $0x1d0] sm:$0xff]  ;;  %v500_v18 = vld [vmem:[%s9177_s4 + $0xa8] sm:$0xff]  ;;  %v498_v20 = vld [vmem:[%s9177_s4 + $0x98] sm:$0xff] }
  0x33   :  { %4464 = vmatprep.subr.bf16.mxu1 %v7138_v0  ;;  %208 = vmatmul.mubr.f32.gmra.mrb[6].mxu0 %v32_v62  ;;  %v7320_v62 = vpack.c.bf16 %v454_v60, %v450_v59  ;;  %v481_v49 = vld [vmem:[%s9177_s4 + $0x10] sm:$0xff]  ;;  %v7435_v59 = vpack.c.bf16 %v492_v57, %v488_v52  ;;  %v494_v60 = vld [vmem:[%s9177_s4 + $0x78] sm:$0xff] }
  0x34   :  { %213 = vmatprep.mubr.f32.mxu0 %v9183_v3  ;;  %v485_v50 = vld [vmem:[%s9177_s4 + $0x30] sm:$0xff]  ;;  %v7446_v4 = vpack.c.bf16 %v494_v60, %v490_v58  ;;  %v510_v57 = vld [vmem:[%s9177_s4 + $0xf8] sm:$0xff]  ;;  %v503_v58 = vld [vmem:[%s9177_s4 + $0xc0] sm:$0xff] }
  0x35   :  { %339 = vmatmul.mubr.f32.gmra.mrb[8].mxu1 %v33_v6  ;;  %v7421_v51 = vpack.c.bf16 %v485_v50, %v481_v49  ;;  %v489_v10 = vld [vmem:[%s9177_s4 + $0x50] sm:$0xff]  ;;  %v508_v49 = vld [vmem:[%s9177_s4 + $0xe8] sm:$0xff]  ;;  %v506_v50 = vld [vmem:[%s9177_s4 + $0xd8] sm:$0xff] }
  0x36   :  { %344 = vmatprep.mubr.f32.mxu1 %v9183_v3  ;;  %4466 = vmatpush1.bf16.msra.mxu1 %v7157_v7  ;;  %v493_v11 = vld [vmem:[%s9177_s4 + $0x70] sm:$0xff]  ;;  %v7507_v52 = vpack.c.bf16 %v508_v49, %v504_v43  ;;  %v507_v60 = vld [vmem:[%s9177_s4 + $0xe0] sm:$0xff] }
  0x37   :  { %4468 = vmatprep.subr.bf16.mxu1 %v7160_v8  ;;  %214 = vmatmul.mubr.f32.gmra.mrb[8].mxu0 %v33_v6  ;;  %v7336_v6 = vpack.c.bf16 %v453_v2, %v449_v1  ;;  %v487_v1 = vld [vmem:[%s9177_s4 + $0x40] sm:$0xff]  ;;  %v497_v36 = vld [vmem:[%s9177_s4 + $0x90] sm:$0xff] }
  0x38   :  { %219 = vmatprep.mubr.f32.mxu0 %v9183_v3  ;;  %v491_v2 = vld [vmem:[%s9177_s4 + $0x60] sm:$0xff]  ;;  %v501_v38 = vld [vmem:[%s9177_s4 + $0xb0] sm:$0xff]  ;;  %9328 = vst [vmem:[#allocation10_spill] sm:$0xff] %v7507_v52 }
  0x39   :  { %345 = vmatmul.mubr.f32.gmra.mrb[10].mxu1 %v34_v13  ;;  %v7448_v5 = vpack.c.bf16 %v491_v2, %v487_v1  ;;  %v7493_v41 = vpack.c.bf16 %v501_v38, %v497_v36  ;;  %v7518_v1 = vpack.c.bf16 %v510_v57, %v506_v50  ;;  %v7520_v2 = vpack.c.bf16 %v507_v60, %v503_v58  ;;  %v511_v36 = vld [vmem:[%s9177_s4 + $0x100] sm:$0xff]  ;;  %v513_v50 = vld [vmem:[%s9177_s4 + $0x110] sm:$0xff]  ;;  %v520_v60 = vld [vmem:[%s9177_s4 + $0x148] sm:$0xff] }
  0x3a   :  { %350 = vmatprep.mubr.f32.mxu1 %v9183_v3  ;;  %4470 = vmatpush1.bf16.msra.mxu1 %v7181_v14  ;;  %v515_v38 = vld [vmem:[%s9177_s4 + $0x120] sm:$0xff]  ;;  %v517_v57 = vld [vmem:[%s9177_s4 + $0x130] sm:$0xff] }
  0x3b   :  { %4472 = vmatprep.subr.bf16.mxu1 %v7184_v15  ;;  %220 = vmatmul.mubr.f32.gmra.mrb[10].mxu0 %v34_v13  ;;  %v470_v13 = vld [vmem:[%s9175_s3 + $0x1b8] sm:$0xff]  ;;  %9327 = vst [vmem:[#allocation9_spill] sm:$0xff] %v7493_v41  ;;  %9329 = vst [vmem:[#allocation11_spill] sm:$0xff] %v7518_v1  ;;  %v7556_v49 = vpack.c.bf16 %v515_v38, %v511_v36  ;;  %v7565_v58 = vpack.c.bf16 %v517_v57, %v513_v50  ;;  %v521_v50 = vld [vmem:[%s9177_s4 + $0x150] sm:$0xff] }
  0x3c   :  { %225 = vmatprep.mubr.f32.mxu0 %v9183_v3  ;;  %v7357_v17 = vpack.c.bf16 %v470_v13, %v466_v12  ;;  %v7457_v12 = vpack.c.bf16 %v493_v11, %v489_v10  ;;  %v496_v13 = vld [vmem:[%s9177_s4 + $0x88] sm:$0xff]  ;;  %9330 = vst [vmem:[#allocation12_spill] sm:$0xff] %v7520_v2  ;;  %v505_v10 = vld [vmem:[%s9177_s4 + $0xd0] sm:$0xff] }
  0x3d   :  { %351 = vmatmul.mubr.f32.gmra.mrb[12].mxu1 %v35_v21  ;;  %v509_v11 = vld [vmem:[%s9177_s4 + $0xf0] sm:$0xff]  ;;  %9334 = vst [vmem:[#allocation16_spill] sm:$0xff] %v7556_v49  ;;  %9335 = vst [vmem:[#allocation17_spill] sm:$0xff] %v7565_v58 }
  0x3e   :  { %356 = vmatprep.mubr.f32.mxu1 %v9183_v3  ;;  %4474 = vmatpush1.bf16.msra.mxu1 %v7205_v22  ;;  %v525_v57 = vld [vmem:[%s9177_s4 + $0x170] sm:$0xff] }
  0x3f   :  { %4476 = vmatprep.subr.bf16.mxu1 %v7208_v23  ;;  %226 = vmatmul.mubr.f32.gmra.mrb[12].mxu0 %v35_v21  ;;  %v474_v21 = vld [vmem:[%s9175_s3 + $0x1d8] sm:$0xff] }
  0x40   :  { %231 = vmatprep.mubr.f32.mxu0 %v9183_v3  ;;  %v7375_v26 = vpack.c.bf16 %v478_v24, %v474_v21  ;;  %v7471_v21 = vpack.c.bf16 %v500_v18, %v496_v13  ;;  %v502_v24 = vld [vmem:[%s9177_s4 + $0xb8] sm:$0xff]  ;;  %v7529_v13 = vpack.c.bf16 %v509_v11, %v505_v10  ;;  %v512_v18 = vld [vmem:[%s9177_s4 + $0x108] sm:$0xff] }
  0x41   :  { %357 = vmatmul.mubr.f32.gmra.mrb[14].mxu1 %v36_v28  ;;  %v524_v10 = vld [vmem:[%s9177_s4 + $0x168] sm:$0xff]  ;;  %v522_v11 = vld [vmem:[%s9177_s4 + $0x158] sm:$0xff] }
  0x42   :  { %362 = vmatprep.mubr.f32.mxu1 %v9183_v3  ;;  %4478 = vmatpush1.bf16.msra.mxu1 %v7228_v30  ;;  %9324 = vst [vmem:[#allocation6_spill] sm:$0xff] %v7471_v21  ;;  %9331 = vst [vmem:[#allocation13_spill] sm:$0xff] %v7529_v13 }
  0x43   :  { %4480 = vmatprep.subr.bf16.mxu1 %v7231_v31  ;;  %232 = vmatmul.mubr.f32.gmra.mrb[14].mxu0 %v36_v28  ;;  %v477_v28 = vld [vmem:[%s9175_s3 + $0x1f0] sm:$0xff] }
  0x44   :  { %237 = vmatprep.mubr.f32.mxu0 %v9183_v3 }
  0x45   :  { %363 = vmatmul.mubr.f32.gmra.mrb[16].mxu1 %v37_v33 }
  0x46   :  { %368 = vmatprep.mubr.f32.mxu1 %v9183_v3 }
  0x47   :  { %238 = vmatmul.mubr.f32.gmra.mrb[16].mxu0 %v37_v33  ;;  %v7384_v33 = vpack.c.bf16 %v477_v28, %v473_v27  ;;  %v495_v27 = vld [vmem:[%s9177_s4 + $0x80] sm:$0xff] }
  0x48   :  { %243 = vmatprep.mubr.f32.mxu0 %v9183_v3  ;;  %v499_v28 = vld [vmem:[%s9177_s4 + $0xa0] sm:$0xff] }
  0x49   :  { %369 = vmatmul.mubr.f32.gmra.mrb[18].mxu1 %v38_v34 }
  0x4a   :  { %700 = vmatprep.mubr.f32.mxu1 %v9183_v3 }
  0x4b   :  { %244 = vmatmul.mubr.f32.gmra.mrb[18].mxu0 %v38_v34  ;;  %v480_v34 = vld [vmem:[%s9177_s4 + $0x8] sm:$0xff] }
  0x4c   :  { %870 = vmatprep.mubr.f32.mxu0 %v9183_v3  ;;  %v7399_v37 = vpack.c.bf16 %v484_v35, %v480_v34  ;;  %v7482_v34 = vpack.c.bf16 %v502_v24, %v498_v20  ;;  %v7484_v35 = vpack.c.bf16 %v499_v28, %v495_v27  ;;  %v516_v20 = vld [vmem:[%s9177_s4 + $0x128] sm:$0xff]  ;;  %v514_v24 = vld [vmem:[%s9177_s4 + $0x118] sm:$0xff] }
  0x4d   :  { %701 = vmatmul.mubr.f32.vlgmr.msra.gmra.mrb[20].mxu1 %v9183_v3  ;;  %v7543_v27 = vpack.c.bf16 %v516_v20, %v512_v18  ;;  %v518_v28 = vld [vmem:[%s9177_s4 + $0x138] sm:$0xff]  ;;  %v7579_v18 = vpack.c.bf16 %v524_v10, %v520_v60  ;;  %v7601_v60 = vpack.c.bf16 %v525_v57, %v521_v50  ;;  %v528_v10 = vld [vmem:[%s9177_s4 + $0x188] sm:$0xff]  ;;  %v527_v50 = vld [vmem:[%s9177_s4 + $0x180] sm:$0xff] }
  0x4e   :  { %4482 = vmatpush1.bf16.msra.mxu1 %v7259_v39  ;;  %771 = vmatprep.mubr.f32.mxu1 %v9183_v3  ;;  %9325 = vst [vmem:[#allocation7_spill] sm:$0xff] %v7482_v34  ;;  %9326 = vst [vmem:[#allocation8_spill] sm:$0xff] %v7484_v35  ;;  %v7554_v43 = vpack.c.bf16 %v518_v28, %v514_v24  ;;  %v526_v20 = vld [vmem:[%s9177_s4 + $0x178] sm:$0xff]  ;;  %v519_v24 = vld [vmem:[%s9177_s4 + $0x140] sm:$0xff] }
  0x4f   :  { %4484 = vmatprep.subr.bf16.mxu1 %v7261_v40  ;;  %4512 = vmatprep.subr.bf16.mxu0 %v7399_v37  ;;  %9332 = vst [vmem:[#allocation14_spill] sm:$0xff] %v7543_v27  ;;  %9336 = vst [vmem:[#allocation18_spill] sm:$0xff] %v7579_v18  ;;  %v523_v28 = vld [vmem:[%s9177_s4 + $0x160] sm:$0xff]  ;;  %v7590_v36 = vpack.c.bf16 %v526_v20, %v522_v11  ;;  %v532_v11 = vld [vmem:[%s9177_s4 + $0x1a8] sm:$0xff] }
  0x50   :  { %4514 = vmatpush1.bf16.msra.mxu0 %v7412_v46  ;;  %9333 = vst [vmem:[#allocation15_spill] sm:$0xff] %v7554_v43  ;;  %v7592_v38 = vpack.c.bf16 %v523_v28, %v519_v24  ;;  %9339 = vst [vmem:[#allocation21_spill] sm:$0xff] %v7601_v60  ;;  %v530_v20 = vld [vmem:[%s9177_s4 + $0x198] sm:$0xff]  ;;  %v7615_v24 = vpack.c.bf16 %v532_v11, %v528_v10  ;;  %v531_v57 = vld [vmem:[%s9177_s4 + $0x1a0] sm:$0xff] }
  0x51   :  { %4516 = vmatprep.subr.bf16.mxu0 %v7435_v59  ;;  %9337 = vst [vmem:[#allocation19_spill] sm:$0xff] %v7590_v36  ;;  %v534_v28 = vld [vmem:[%s9177_s4 + $0x1b8] sm:$0xff]  ;;  %v529_v10 = vld [vmem:[%s9177_s4 + $0x190] sm:$0xff] }
  0x52   :  { %4486 = vmatpush1.bf16.msra.mxu1 %v7278_v47  ;;  %9338 = vst [vmem:[#allocation20_spill] sm:$0xff] %v7592_v38  ;;  %9340 = vst [vmem:[#allocation22_spill] sm:$0xff] %v7615_v24  ;;  %v533_v11 = vld [vmem:[%s9177_s4 + $0x1b0] sm:$0xff] }
  0x53   :  { %4488 = vmatprep.subr.bf16.mxu1 %v7282_v48 }
  0x54   :  { %4518 = vmatpush1.bf16.msra.mxu0 %v7448_v5 }
  0x55   :  { %4520 = vmatprep.subr.bf16.mxu0 %v7471_v21 }
  0x56   :  { %4490 = vmatpush1.bf16.msra.mxu1 %v7298_v53 }
  0x57   :  { %4492 = vmatprep.subr.bf16.mxu1 %v7301_v54 }
  0x58   :  { %4522 = vmatpush1.bf16.msra.mxu0 %v7484_v35 }
  0x59   :  { %4524 = vmatprep.subr.bf16.mxu0 %v7507_v52 }
  0x5a   :  { %4494 = vmatpush1.bf16.msra.mxu1 %v7317_v61 }
  0x5b   :  { %4496 = vmatprep.subr.bf16.mxu1 %v7320_v62 }
  0x5c   :  { %4526 = vmatpush1.bf16.msra.mxu0 %v7520_v2 }
  0x5d   :  { %4528 = vmatprep.subr.bf16.mxu0 %v7543_v27 }
  0x5e   :  { %4498 = vmatpush1.bf16.msra.mxu1 %v7336_v6 }
  0x5f   :  { %4500 = vmatprep.subr.bf16.mxu1 %v7339_v9 }
  0x60   :  { %4530 = vmatpush1.bf16.msra.mxu0 %v7556_v49 }
  0x61   :  { %4532 = vmatprep.subr.bf16.mxu0 %v7579_v18 }
  0x62   :  { %4502 = vmatpush1.bf16.msra.mxu1 %v7354_v16 }
  0x63   :  { %4504 = vmatprep.subr.bf16.mxu1 %v7357_v17 }
  0x64   :  { %4534 = vmatpush1.bf16.msra.mxu0 %v7592_v38  ;;  %v7628_v38 = vpack.c.bf16 %v531_v57, %v527_v50  ;;  %v538_v50 = vld [vmem:[%s9177_s4 + $0x1d8] sm:$0xff] }
  0x65   :  { %4536 = vmatprep.subr.bf16.mxu0 %v7615_v24 }
  0x66   :  { %4506 = vmatpush1.bf16.msra.mxu1 %v7372_v25  ;;  %9342 = vst [vmem:[#allocation24_spill] sm:$0xff] %v7628_v38 }
  0x67   :  { %4508 = vmatprep.subr.bf16.mxu1 %v7375_v26 }
  0x68   :  { %4538 = vmatpush1.bf16.msra.mxu0 %v7628_v38  ;;  %v539_v38 = vld [vmem:[%s9177_s4 + $0x1e0] sm:$0xff] }
  0x6a   :  { %4510 = vmatpush1.bf16.msra.mxu1 %v7384_v33 }
  0x6b   :  { %4576 = vmatprep.subr.bf16.mxu1 %v7410_v44 }
  0x6d   :  { %772 = vmatmul.mubr.f32.vlgmr.msra.gmra.mrb[0].mxu1 %v9183_v3 }
  0x6e   :  { %941 = vmatprep.mubr.f32.mxu1 %v9183_v3  ;;  %4578 = vmatpush1.bf16.msra.mxu1 %v7421_v51  ;;  %v7626_v3 = vpack.c.bf16 %v534_v28, %v530_v20  ;;  %v536_v20 = vld [vmem:[%s9177_s4 + $0x1c8] sm:$0xff] }
  0x6f   :  { %4580 = vmatprep.subr.bf16.mxu1 %v7446_v4  ;;  %v540_v28 = vld [vmem:[%s9177_s4 + $0x1e8] sm:$0xff] }
  0x70   :  { %9341 = vst [vmem:[#allocation23_spill] sm:$0xff] %v7626_v3  ;;  %v7651_v57 = vpack.c.bf16 %v540_v28, %v536_v20  ;;  %v537_v20 = vld [vmem:[%s9177_s4 + $0x1d0] sm:$0xff] }
  0x71   :  { %v541_v28 = vld [vmem:[%s9177_s4 + $0x1f0] sm:$0xff] }
  0x72   :  { %4582 = vmatpush1.bf16.msra.mxu1 %v7457_v12  ;;  %9344 = vst [vmem:[#allocation26_spill] sm:$0xff] %v7651_v57  ;;  %4540 = vmatprep.subr.bf16.mxu0 %v7651_v57 }
  0x73   :  { %4584 = vmatprep.subr.bf16.mxu1 %v7482_v34 }
  0x76   :  { %4586 = vmatpush1.bf16.msra.mxu1 %v7493_v41 }
  0x77   :  { %4588 = vmatprep.subr.bf16.mxu1 %v7518_v1 }
  0x7a   :  { %4590 = vmatpush1.bf16.msra.mxu1 %v7529_v13 }
  0x7b   :  { %4592 = vmatprep.subr.bf16.mxu1 %v7554_v43 }
  0x7e   :  { %4594 = vmatpush1.bf16.msra.mxu1 %v7565_v58 }
  0x7f   :  { %4596 = vmatprep.subr.bf16.mxu1 %v7590_v36  ;;  %v592_v36 = vld [vmem:[%s9177_s4 + $0x388] sm:$0xff] }
  0x82   :  { %4598 = vmatpush1.bf16.msra.mxu1 %v7601_v60  ;;  %v7637_v60 = vpack.c.bf16 %v533_v11, %v529_v10  ;;  %v542_v10 = vld [vmem:[%s9177_s4 + $0x1f8] sm:$0xff]  ;;  %v535_v11 = vld [vmem:[%s9177_s4 + $0x1c0] sm:$0xff] }
  0x83   :  { %4600 = vmatprep.subr.bf16.mxu1 %v7626_v3  ;;  %v7662_v3 = vpack.c.bf16 %v542_v10, %v538_v50  ;;  %v7664_v24 = vpack.c.bf16 %v539_v38, %v535_v11  ;;  %v544_v38 = vld [vmem:[%s9177_s4 + $0x208] sm:$0xff]  ;;  %v546_v10 = vld [vmem:[%s9177_s4 + $0x218] sm:$0xff] }
  0x84   :  { %9343 = vst [vmem:[#allocation25_spill] sm:$0xff] %v7637_v60  ;;  %v548_v50 = vld [vmem:[%s9177_s4 + $0x228] sm:$0xff] }
  0x85   :  { %9345 = vst [vmem:[#allocation27_spill] sm:$0xff] %v7662_v3  ;;  %9346 = vst [vmem:[#allocation28_spill] sm:$0xff] %v7664_v24  ;;  %4542 = vmatpush1.bf16.msra.mxu0 %v7664_v24  ;;  %v7687_v11 = vpack.c.bf16 %v548_v50, %v544_v38  ;;  %v547_v24 = vld [vmem:[%s9177_s4 + $0x220] sm:$0xff]  ;;  %v545_v38 = vld [vmem:[%s9177_s4 + $0x210] sm:$0xff] }
  0x86   :  { %4602 = vmatpush1.bf16.msra.mxu1 %v7637_v60  ;;  %v7673_v60 = vpack.c.bf16 %v541_v28, %v537_v20  ;;  %v550_v20 = vld [vmem:[%s9177_s4 + $0x238] sm:$0xff]  ;;  %v543_v28 = vld [vmem:[%s9177_s4 + $0x200] sm:$0xff]  ;;  %v549_v50 = vld [vmem:[%s9177_s4 + $0x230] sm:$0xff] }
  0x87   :  { %4604 = vmatprep.subr.bf16.mxu1 %v7662_v3  ;;  %9348 = vst [vmem:[#allocation30_spill] sm:$0xff] %v7687_v11  ;;  %v7698_v3 = vpack.c.bf16 %v550_v20, %v546_v10  ;;  %v7700_v57 = vpack.c.bf16 %v547_v24, %v543_v28  ;;  %4544 = vmatprep.subr.bf16.mxu0 %v7687_v11  ;;  %v552_v24 = vld [vmem:[%s9177_s4 + $0x248] sm:$0xff]  ;;  %v554_v20 = vld [vmem:[%s9177_s4 + $0x258] sm:$0xff] }
  0x88   :  { %9347 = vst [vmem:[#allocation29_spill] sm:$0xff] %v7673_v60  ;;  %v556_v10 = vld [vmem:[%s9177_s4 + $0x268] sm:$0xff] }
  0x89   :  { %9349 = vst [vmem:[#allocation31_spill] sm:$0xff] %v7698_v3  ;;  %9350 = vst [vmem:[#allocation32_spill] sm:$0xff] %v7700_v57  ;;  %4546 = vmatpush1.bf16.msra.mxu0 %v7700_v57  ;;  %v7723_v28 = vpack.c.bf16 %v556_v10, %v552_v24  ;;  %v555_v57 = vld [vmem:[%s9177_s4 + $0x260] sm:$0xff]  ;;  %v553_v24 = vld [vmem:[%s9177_s4 + $0x250] sm:$0xff] }
  0x8a   :  { %4606 = vmatpush1.bf16.msra.mxu1 %v7673_v60  ;;  %v7709_v60 = vpack.c.bf16 %v549_v50, %v545_v38  ;;  %v558_v38 = vld [vmem:[%s9177_s4 + $0x278] sm:$0xff]  ;;  %v551_v50 = vld [vmem:[%s9177_s4 + $0x240] sm:$0xff]  ;;  %v557_v10 = vld [vmem:[%s9177_s4 + $0x270] sm:$0xff] }
  0x8b   :  { %4608 = vmatprep.subr.bf16.mxu1 %v7698_v3  ;;  %9352 = vst [vmem:[#allocation34_spill] sm:$0xff] %v7723_v28  ;;  %v7734_v3 = vpack.c.bf16 %v558_v38, %v554_v20  ;;  %v7736_v11 = vpack.c.bf16 %v555_v57, %v551_v50  ;;  %4548 = vmatprep.subr.bf16.mxu0 %v7723_v28  ;;  %v560_v57 = vld [vmem:[%s9177_s4 + $0x288] sm:$0xff]  ;;  %v562_v38 = vld [vmem:[%s9177_s4 + $0x298] sm:$0xff] }
  0x8c   :  { %9351 = vst [vmem:[#allocation33_spill] sm:$0xff] %v7709_v60  ;;  %v564_v20 = vld [vmem:[%s9177_s4 + $0x2a8] sm:$0xff] }
  0x8d   :  { %9353 = vst [vmem:[#allocation35_spill] sm:$0xff] %v7734_v3  ;;  %9354 = vst [vmem:[#allocation36_spill] sm:$0xff] %v7736_v11  ;;  %4550 = vmatpush1.bf16.msra.mxu0 %v7736_v11  ;;  %v7759_v50 = vpack.c.bf16 %v564_v20, %v560_v57  ;;  %v563_v11 = vld [vmem:[%s9177_s4 + $0x2a0] sm:$0xff]  ;;  %v561_v57 = vld [vmem:[%s9177_s4 + $0x290] sm:$0xff] }
  0x8e   :  { %4610 = vmatpush1.bf16.msra.mxu1 %v7709_v60  ;;  %v7745_v60 = vpack.c.bf16 %v557_v10, %v553_v24  ;;  %v566_v24 = vld [vmem:[%s9177_s4 + $0x2b8] sm:$0xff]  ;;  %v559_v10 = vld [vmem:[%s9177_s4 + $0x280] sm:$0xff]  ;;  %v565_v20 = vld [vmem:[%s9177_s4 + $0x2b0] sm:$0xff] }
  0x8f   :  { %4612 = vmatprep.subr.bf16.mxu1 %v7734_v3  ;;  %9356 = vst [vmem:[#allocation38_spill] sm:$0xff] %v7759_v50  ;;  %v7770_v3 = vpack.c.bf16 %v566_v24, %v562_v38  ;;  %v7772_v28 = vpack.c.bf16 %v563_v11, %v559_v10  ;;  %4552 = vmatprep.subr.bf16.mxu0 %v7759_v50  ;;  %v568_v11 = vld [vmem:[%s9177_s4 + $0x2c8] sm:$0xff]  ;;  %v570_v24 = vld [vmem:[%s9177_s4 + $0x2d8] sm:$0xff] }
  0x90   :  { %9355 = vst [vmem:[#allocation37_spill] sm:$0xff] %v7745_v60  ;;  %v572_v38 = vld [vmem:[%s9177_s4 + $0x2e8] sm:$0xff] }
  0x91   :  { %9357 = vst [vmem:[#allocation39_spill] sm:$0xff] %v7770_v3  ;;  %9358 = vst [vmem:[#allocation40_spill] sm:$0xff] %v7772_v28  ;;  %4554 = vmatpush1.bf16.msra.mxu0 %v7772_v28  ;;  %v7795_v10 = vpack.c.bf16 %v572_v38, %v568_v11  ;;  %v571_v28 = vld [vmem:[%s9177_s4 + $0x2e0] sm:$0xff]  ;;  %v569_v11 = vld [vmem:[%s9177_s4 + $0x2d0] sm:$0xff] }
  0x92   :  { %4614 = vmatpush1.bf16.msra.mxu1 %v7745_v60  ;;  %v7781_v60 = vpack.c.bf16 %v565_v20, %v561_v57  ;;  %v574_v57 = vld [vmem:[%s9177_s4 + $0x2f8] sm:$0xff]  ;;  %v567_v20 = vld [vmem:[%s9177_s4 + $0x2c0] sm:$0xff]  ;;  %v573_v38 = vld [vmem:[%s9177_s4 + $0x2f0] sm:$0xff] }
  0x93   :  { %4616 = vmatprep.subr.bf16.mxu1 %v7770_v3  ;;  %9360 = vst [vmem:[#allocation42_spill] sm:$0xff] %v7795_v10  ;;  %v7806_v3 = vpack.c.bf16 %v574_v57, %v570_v24  ;;  %v7808_v50 = vpack.c.bf16 %v571_v28, %v567_v20  ;;  %4556 = vmatprep.subr.bf16.mxu0 %v7795_v10  ;;  %v576_v28 = vld [vmem:[%s9177_s4 + $0x308] sm:$0xff]  ;;  %v578_v57 = vld [vmem:[%s9177_s4 + $0x318] sm:$0xff] }
  0x94   :  { %9359 = vst [vmem:[#allocation41_spill] sm:$0xff] %v7781_v60  ;;  %v580_v24 = vld [vmem:[%s9177_s4 + $0x328] sm:$0xff] }
  0x95   :  { %9361 = vst [vmem:[#allocation43_spill] sm:$0xff] %v7806_v3  ;;  %9362 = vst [vmem:[#allocation44_spill] sm:$0xff] %v7808_v50  ;;  %4558 = vmatpush1.bf16.msra.mxu0 %v7808_v50  ;;  %v7831_v20 = vpack.c.bf16 %v580_v24, %v576_v28  ;;  %v579_v50 = vld [vmem:[%s9177_s4 + $0x320] sm:$0xff]  ;;  %v577_v28 = vld [vmem:[%s9177_s4 + $0x310] sm:$0xff] }
  0x96   :  { %4618 = vmatpush1.bf16.msra.mxu1 %v7781_v60  ;;  %v7817_v60 = vpack.c.bf16 %v573_v38, %v569_v11  ;;  %v582_v11 = vld [vmem:[%s9177_s4 + $0x338] sm:$0xff]  ;;  %v575_v38 = vld [vmem:[%s9177_s4 + $0x300] sm:$0xff]  ;;  %v581_v24 = vld [vmem:[%s9177_s4 + $0x330] sm:$0xff] }
  0x97   :  { %4620 = vmatprep.subr.bf16.mxu1 %v7806_v3  ;;  %9364 = vst [vmem:[#allocation46_spill] sm:$0xff] %v7831_v20  ;;  %v7842_v3 = vpack.c.bf16 %v582_v11, %v578_v57  ;;  %v7844_v10 = vpack.c.bf16 %v579_v50, %v575_v38  ;;  %4560 = vmatprep.subr.bf16.mxu0 %v7831_v20  ;;  %v584_v50 = vld [vmem:[%s9177_s4 + $0x348] sm:$0xff]  ;;  %v586_v11 = vld [vmem:[%s9177_s4 + $0x358] sm:$0xff] }
  0x98   :  { %9363 = vst [vmem:[#allocation45_spill] sm:$0xff] %v7817_v60  ;;  %v588_v57 = vld [vmem:[%s9177_s4 + $0x368] sm:$0xff] }
  0x99   :  { %9365 = vst [vmem:[#allocation47_spill] sm:$0xff] %v7842_v3  ;;  %9366 = vst [vmem:[#allocation48_spill] sm:$0xff] %v7844_v10  ;;  %4562 = vmatpush1.bf16.msra.mxu0 %v7844_v10  ;;  %v7867_v38 = vpack.c.bf16 %v588_v57, %v584_v50  ;;  %v587_v10 = vld [vmem:[%s9177_s4 + $0x360] sm:$0xff]  ;;  %v585_v50 = vld [vmem:[%s9177_s4 + $0x350] sm:$0xff] }
  0x9a   :  { %4622 = vmatpush1.bf16.msra.mxu1 %v7817_v60  ;;  %v7853_v60 = vpack.c.bf16 %v581_v24, %v577_v28  ;;  %v590_v28 = vld [vmem:[%s9177_s4 + $0x378] sm:$0xff]  ;;  %v583_v24 = vld [vmem:[%s9177_s4 + $0x340] sm:$0xff]  ;;  %v589_v57 = vld [vmem:[%s9177_s4 + $0x370] sm:$0xff] }
  0x9b   :  { %4624 = vmatprep.subr.bf16.mxu1 %v7842_v3  ;;  %9368 = vst [vmem:[#allocation50_spill] sm:$0xff] %v7867_v38  ;;  %v7878_v3 = vpack.c.bf16 %v590_v28, %v586_v11  ;;  %v7880_v20 = vpack.c.bf16 %v587_v10, %v583_v24  ;;  %4564 = vmatprep.subr.bf16.mxu0 %v7867_v38  ;;  %v596_v10 = vld [vmem:[%s9177_s4 + $0x3a8] sm:$0xff]  ;;  %v594_v11 = vld [vmem:[%s9177_s4 + $0x398] sm:$0xff] }
  0x9c   :  { %9367 = vst [vmem:[#allocation49_spill] sm:$0xff] %v7853_v60  ;;  %v7902_v28 = vpack.c.bf16 %v596_v10, %v592_v36  ;;  %v598_v24 = vld [vmem:[%s9177_s4 + $0x3b8] sm:$0xff]  ;;  %v593_v36 = vld [vmem:[%s9177_s4 + $0x390] sm:$0xff] }
  0x9d   :  { %9369 = vst [vmem:[#allocation51_spill] sm:$0xff] %v7878_v3  ;;  %9370 = vst [vmem:[#allocation52_spill] sm:$0xff] %v7880_v20  ;;  %4566 = vmatpush1.bf16.msra.mxu0 %v7880_v20  ;;  %v7914_v38 = vpack.c.bf16 %v598_v24, %v594_v11  ;;  %v597_v10 = vld [vmem:[%s9177_s4 + $0x3b0] sm:$0xff]  ;;  %v600_v20 = vld [vmem:[%s9177_s4 + $0x3c8] sm:$0xff] }
  0x9e   :  { %4626 = vmatpush1.bf16.msra.mxu1 %v7853_v60  ;;  %v7889_v60 = vpack.c.bf16 %v589_v57, %v585_v50  ;;  %9372 = vst [vmem:[#allocation54_spill] sm:$0xff] %v7902_v28  ;;  %v591_v50 = vld [vmem:[%s9177_s4 + $0x380] sm:$0xff]  ;;  %4568 = vmatprep.subr.bf16.mxu0 %v7902_v28  ;;  %v7928_v18 = vpack.c.bf16 %v597_v10, %v593_v36  ;;  %v604_v11 = vld [vmem:[%s9177_s4 + $0x3e8] sm:$0xff]  ;;  %v602_v24 = vld [vmem:[%s9177_s4 + $0x3d8] sm:$0xff] }
  0x9f   :  { %4628 = vmatprep.subr.bf16.mxu1 %v7878_v3  ;;  %v595_v57 = vld [vmem:[%s9177_s4 + $0x3a0] sm:$0xff]  ;;  %9373 = vst [vmem:[#allocation55_spill] sm:$0xff] %v7914_v38  ;;  %v601_v28 = vld [vmem:[%s9177_s4 + $0x3d0] sm:$0xff] }
  0xa0   :  { %9371 = vst [vmem:[#allocation53_spill] sm:$0xff] %v7889_v60  ;;  %v7916_v3 = vpack.c.bf16 %v595_v57, %v591_v50  ;;  %9375 = vst [vmem:[#allocation57_spill] sm:$0xff] %v7928_v18  ;;  %v606_v50 = vld [vmem:[%s9177_s4 + $0x3f8] sm:$0xff]  ;;  %v7940_v57 = vpack.c.bf16 %v604_v11, %v600_v20  ;;  %v599_v36 = vld [vmem:[%s9177_s4 + $0x3c0] sm:$0xff] }
  0xa1   :  { %v603_v10 = vld [vmem:[%s9177_s4 + $0x3e0] sm:$0xff]  ;;  %v605_v20 = vld [vmem:[%s9177_s4 + $0x3f0] sm:$0xff] }
  0xa2   :  { %4630 = vmatpush1.bf16.msra.mxu1 %v7889_v60  ;;  %9374 = vst [vmem:[#allocation56_spill] sm:$0xff] %v7916_v3  ;;  %9376 = vst [vmem:[#allocation58_spill] sm:$0xff] %v7940_v57  ;;  %v7942_v60 = vpack.c.bf16 %v606_v50, %v602_v24  ;;  %4570 = vmatpush1.bf16.msra.mxu0 %v7916_v3  ;;  %v7954_v58 = vpack.c.bf16 %v603_v10, %v599_v36  ;;  %v105_v36 = vlaneseq }
  0xa3   :  { %4632 = vmatprep.subr.bf16.mxu1 %v7914_v38  ;;  %4572 = vmatprep.subr.bf16.mxu0 %v7940_v57  ;;  %v7961_v11 = vpack.c.bf16 %v605_v20, %v601_v28  ;;  %v103_v28 = vld [vmem:[%s9178_s2] sm:$0xf] }
  0xa4   :  { %9377 = vst [vmem:[#allocation59_spill] sm:$0xff] %v7942_v60  ;;  %9378 = vst [vmem:[#allocation60_spill] sm:$0xff] %v7954_v58  ;;  %v7968_v10 = vshrl.u32 %v105_v36, 7 }
  0xa5   :  { %9379 = vst [vmem:[#allocation61_spill] sm:$0xff] %v7961_v11 }
  0xa6   :  { %4634 = vmatpush1.bf16.msra.mxu1 %v7928_v18  ;;  %4574 = vmatpush1.bf16.msra.mxu0 %v7954_v58  ;;  %v9283_v18 = vsub.s32 0, %v7968_v10  ;;  %v9288_v20 = vsub.s32 1, %v7968_v10  ;;  %v9289_v43 = vsub.s32 2, %v7968_v10  ;;  %v9294_v27 = vsub.s32 3, %v7968_v10 }
  0xa7   :  { %4636 = vmatprep.subr.bf16.mxu1 %v7942_v60  ;;  %4640 = vmatprep.subr.bf16.mxu0 %v7016_v19 }
  0xaa   :  { %4638 = vmatpush1.bf16.msra.mxu1 %v7961_v11  ;;  %v7977_v11 = vrot.slane %v103_v28, %v9283_v18 }
  0xab   :  { %4672 = vmatprep.subr.bf16.mxu1 %v7231_v31  ;;  %v7981_v31 = vrot.slane %v103_v28, %v9288_v20 }
  0xac   :  { %9380 = vst [vmem:[#allocation62_spill] sm:$0xff] %v7977_v11 }
  0xad   :  { %9381 = vst [vmem:[#allocation63_spill] sm:$0xff] %v7981_v31 }
  0xfa   :  { %v191_v24 = vpop.f32.mrb[0].mxu0 }
  0xfb   :  { %v193_v50 = vpop.f32.mrb[1].mxu0  ;;  %v192_v19 = vadd.f32 %v191_v24, %v7977_v11  ;;  %v7989_v24 = vrot.slane %v103_v28, %v9289_v43 }
  0xfc   :  { %v194_v36 = vadd.f32 %v193_v50, %v7981_v31 }
 0x120   :  { %v702_v58 = vpop.f32.mrb[20].mxu1 }
 0x121   :  { %v778_v60 = vadd.f32 %v702_v58, %v192_v19  ;;  %v704_v57 = vpop.f32.mrb[21].mxu1  ;;  %v7993_v19 = vrot.slane %v103_v28, %v9294_v27  ;;  %v9396_v27 = vld [vmem:[#allocation26_spill] sm:$0xff] }
 0x122   :  { %v779_v3 = vadd.f32 %v704_v57, %v194_v36 }
 0x123   :  { %v4249_v49 = vmul.f32 -1.442695, %v778_v60 }
 0x124   :  { %v4250_v38 = vmul.f32 -1.442695, %v779_v3 }
 0x126   :  { %6480 = vpow2.f32 %v4250_v38 }
 0x127   :  { %6482 = vpow2.f32 %v4249_v49 }
 0x130   :  { %v6481_v18 = vpop.eup %6480 }
 0x131   :  { %v6483_v13 = vpop.eup %6482  ;;  %v791_v20 = vadd.f32 1.0, %v6481_v18 }
 0x132   :  { %v785_v50 = vadd.f32 1.0, %v6483_v13 }
 0x133   :  { %6484 = vrcp.f32 %v791_v20 }
 0x134   :  { %6486 = vrcp.f32 %v785_v50 }
 0x13d   :  { %v6485_v18 = vpop.eup %6484 }
 0x13e   :  { %v6487_v57 = vpop.eup %6486  ;;  %v801_v43 = vmul.f32 0.0, %v6485_v18  ;;  %v9388_v18 = vld [vmem:[#allocation18_spill] sm:$0xff] }
 0x140   :  { %v773_v3 = vpop.f32.mrb[0].mxu1 }
 0x141   :  { %v6421_v49 = vadd.f32 %v773_v3, %v7989_v24  ;;  %v775_v58 = vpop.f32.mrb[1].mxu1 }
 0x142   :  { %v6422_v60 = vadd.f32 %v775_v58, %v7993_v19  ;;  %v9385_v58 = vld [vmem:[#allocation15_spill] sm:$0xff] }
 0x143   :  { %6488 = vtanh.f32 %v6421_v49  ;;  %v9382_v49 = vmov 0.0  }
 0x144   :  { %v4251_v38 = vmul.f32 -1.442695, %v6422_v60  ;;  %v9386_v60 = vld [vmem:[#allocation16_spill] sm:$0xff] }
 0x146   :  { %6490 = vpow2.f32 %v4251_v38  ;;  %v9387_v38 = vld [vmem:[#allocation17_spill] sm:$0xff] }
 0x14d   :  { %v6489_v36 = vpop.eup %6488 }
 0x14e   :  { %v802_v13 = vmul.f32 %v6489_v36, %v6487_v57  ;;  %v9389_v57 = vld [vmem:[#allocation19_spill] sm:$0xff]  ;;  %v9390_v36 = vld [vmem:[#allocation20_spill] sm:$0xff] }
 0x150   :  { %v6491_v31 = vpop.eup %6490  ;;  %v7997_v11 = vadd.f32 %v802_v13, %v801_v43  ;;  %v9384_v43 = vld [vmem:[#allocation14_spill] sm:$0xff]  ;;  %v9391_v13 = vld [vmem:[#allocation21_spill] sm:$0xff] }
 0x151   :  { %v798_v28 = vadd.f32 1.0, %v6491_v31  ;;  %v9383_v31 = vld [vmem:[#allocation13_spill] sm:$0xff] }
 0x152   :  { %6492 = vtanh.f32 %v7997_v11 }
 0x153   :  { %6494 = vrcp.f32 %v798_v28  ;;  %v9392_v28 = vld [vmem:[#allocation22_spill] sm:$0xff] }
 0x15c   :  { %v6493_v20 = vpop.eup %6492 }
 0x15d   :  { %v6495_v3 = vpop.eup %6494 }
 0x15e   :  { %v805_v50 = vmul.f32 %v6495_v3, %v6493_v20  ;;  %v9393_v20 = vld [vmem:[#allocation23_spill] sm:$0xff]  ;;  %v9394_v3 = vld [vmem:[#allocation24_spill] sm:$0xff] }
 0x160   :  { %871 = vmatmul.mubr.f32.vlgmr.msra.gmra.mrb[20].mxu0 %v805_v50  ;;  %942 = vmatmul.mubr.f32.vlgmr.msra.gmra.mrb[22].mxu1 %v805_v50 }
 0x161   :  { %4642 = vmatpush1.bf16.msra.mxu0 %v7041_v29  ;;  %4674 = vmatpush1.bf16.msra.mxu1 %v7259_v39 }
 0x162   :  { %4644 = vmatprep.subr.bf16.mxu0 %v7050_v32  ;;  %4676 = vmatprep.subr.bf16.mxu1 %v7261_v40 }
 0x163   :  { %1044 = vmatprep.mubr.f32.mxu0 %v9382_v49  ;;  %1115 = vmatprep.mubr.f32.mxu1 %v9382_v49 }
 0x165   :  { %4646 = vmatpush1.bf16.msra.mxu0 %v7078_v42  ;;  %4678 = vmatpush1.bf16.msra.mxu1 %v7278_v47 }
 0x166   :  { %4648 = vmatprep.subr.bf16.mxu0 %v7087_v45  ;;  %4680 = vmatprep.subr.bf16.mxu1 %v7282_v48 }
 0x169   :  { %4650 = vmatpush1.bf16.msra.mxu0 %v7113_v55  ;;  %4682 = vmatpush1.bf16.msra.mxu1 %v7298_v53 }
 0x16a   :  { %4652 = vmatprep.subr.bf16.mxu0 %v7116_v56  ;;  %4684 = vmatprep.subr.bf16.mxu1 %v7301_v54 }
 0x16d   :  { %4654 = vmatpush1.bf16.msra.mxu0 %v7135_v63  ;;  %4686 = vmatpush1.bf16.msra.mxu1 %v7317_v61 }
 0x16e   :  { %4656 = vmatprep.subr.bf16.mxu0 %v7138_v0  ;;  %4688 = vmatprep.subr.bf16.mxu1 %v7320_v62 }
 0x171   :  { %4658 = vmatpush1.bf16.msra.mxu0 %v7157_v7  ;;  %4690 = vmatpush1.bf16.msra.mxu1 %v7336_v6 }
 0x172   :  { %4660 = vmatprep.subr.bf16.mxu0 %v7160_v8  ;;  %4692 = vmatprep.subr.bf16.mxu1 %v7339_v9 }
 0x175   :  { %4662 = vmatpush1.bf16.msra.mxu0 %v7181_v14  ;;  %4694 = vmatpush1.bf16.msra.mxu1 %v7354_v16 }
 0x176   :  { %4664 = vmatprep.subr.bf16.mxu0 %v7184_v15  ;;  %4696 = vmatprep.subr.bf16.mxu1 %v7357_v17 }
 0x179   :  { %4666 = vmatpush1.bf16.msra.mxu0 %v7205_v22  ;;  %4698 = vmatpush1.bf16.msra.mxu1 %v7372_v25 }
 0x17a   :  { %4668 = vmatprep.subr.bf16.mxu0 %v7208_v23  ;;  %4700 = vmatprep.subr.bf16.mxu1 %v7375_v26 }
 0x17d   :  { %4670 = vmatpush1.bf16.msra.mxu0 %v7228_v30  ;;  %4702 = vmatpush1.bf16.msra.mxu1 %v7384_v33 }
 0x17e   :  { %4704 = vmatprep.subr.bf16.mxu0 %v7399_v37  ;;  %4768 = vmatprep.subr.bf16.mxu1 %v7410_v44 }
 0x180   :  { %1045 = vmatmul.mubr.f32.vlgmr.msra.gmra.mrb[2].mxu0 %v805_v50  ;;  %1116 = vmatmul.mubr.f32.vlgmr.msra.gmra.mrb[2].mxu1 %v805_v50  ;;  %v9395_v50 = vld [vmem:[#allocation25_spill] sm:$0xff] }
 0x181   :  { %4706 = vmatpush1.bf16.msra.mxu0 %v7412_v46  ;;  %4770 = vmatpush1.bf16.msra.mxu1 %v7421_v51 }
 0x182   :  { %4708 = vmatprep.subr.bf16.mxu0 %v7435_v59  ;;  %4772 = vmatprep.subr.bf16.mxu1 %v7446_v4 }
 0x185   :  { %4710 = vmatpush1.bf16.msra.mxu0 %v7448_v5  ;;  %4774 = vmatpush1.bf16.msra.mxu1 %v7457_v12 }
 0x186   :  { %4712 = vmatprep.subr.bf16.mxu0 %v7471_v21  ;;  %4776 = vmatprep.subr.bf16.mxu1 %v7482_v34 }
 0x189   :  { %4714 = vmatpush1.bf16.msra.mxu0 %v7484_v35  ;;  %4778 = vmatpush1.bf16.msra.mxu1 %v7493_v41 }
 0x18a   :  { %4716 = vmatprep.subr.bf16.mxu0 %v7507_v52  ;;  %4780 = vmatprep.subr.bf16.mxu1 %v7518_v1 }
 0x18d   :  { %4718 = vmatpush1.bf16.msra.mxu0 %v7520_v2  ;;  %4782 = vmatpush1.bf16.msra.mxu1 %v9383_v31  ;;  %v9437_v31 = vsub.s32 3, %v7968_v10 }
 0x18e   :  { %4720 = vmatprep.subr.bf16.mxu0 %v9384_v43  ;;  %4784 = vmatprep.subr.bf16.mxu1 %v9385_v58 }
 0x191   :  { %4722 = vmatpush1.bf16.msra.mxu0 %v9386_v60  ;;  %4786 = vmatpush1.bf16.msra.mxu1 %v9387_v38  ;;  %v9397_v60 = vld [vmem:[#allocation27_spill] sm:$0xff]  ;;  %v9398_v38 = vld [vmem:[#allocation28_spill] sm:$0xff] }
 0x192   :  { %4724 = vmatprep.subr.bf16.mxu0 %v9388_v18  ;;  %4788 = vmatprep.subr.bf16.mxu1 %v9389_v57  ;;  %v9399_v18 = vld [vmem:[#allocation29_spill] sm:$0xff]  ;;  %v9400_v57 = vld [vmem:[#allocation30_spill] sm:$0xff] }
 0x195   :  { %4726 = vmatpush1.bf16.msra.mxu0 %v9390_v36  ;;  %4790 = vmatpush1.bf16.msra.mxu1 %v9391_v13  ;;  %v9401_v36 = vld [vmem:[#allocation31_spill] sm:$0xff]  ;;  %v9402_v13 = vld [vmem:[#allocation32_spill] sm:$0xff] }
 0x196   :  { %4728 = vmatprep.subr.bf16.mxu0 %v9392_v28  ;;  %4792 = vmatprep.subr.bf16.mxu1 %v9393_v20  ;;  %v9403_v28 = vld [vmem:[#allocation33_spill] sm:$0xff]  ;;  %v9404_v20 = vld [vmem:[#allocation34_spill] sm:$0xff] }
 0x199   :  { %4730 = vmatpush1.bf16.msra.mxu0 %v9394_v3  ;;  %4794 = vmatpush1.bf16.msra.mxu1 %v9395_v50  ;;  %v9405_v3 = vld [vmem:[#allocation35_spill] sm:$0xff]  ;;  %v9406_v50 = vld [vmem:[#allocation36_spill] sm:$0xff] }
 0x19a   :  { %4732 = vmatprep.subr.bf16.mxu0 %v9396_v27  ;;  %4796 = vmatprep.subr.bf16.mxu1 %v9397_v60  ;;  %v9407_v27 = vld [vmem:[#allocation37_spill] sm:$0xff]  ;;  %v9408_v60 = vld [vmem:[#allocation38_spill] sm:$0xff] }
 0x19d   :  { %4734 = vmatpush1.bf16.msra.mxu0 %v9398_v38  ;;  %4798 = vmatpush1.bf16.msra.mxu1 %v9399_v18  ;;  %v9409_v38 = vld [vmem:[#allocation39_spill] sm:$0xff]  ;;  %v9410_v18 = vld [vmem:[#allocation40_spill] sm:$0xff] }
 0x19e   :  { %4736 = vmatprep.subr.bf16.mxu0 %v9400_v57  ;;  %4800 = vmatprep.subr.bf16.mxu1 %v9401_v36  ;;  %v9411_v57 = vld [vmem:[#allocation41_spill] sm:$0xff]  ;;  %v9412_v36 = vld [vmem:[#allocation42_spill] sm:$0xff] }
 0x1a1   :  { %4738 = vmatpush1.bf16.msra.mxu0 %v9402_v13  ;;  %4802 = vmatpush1.bf16.msra.mxu1 %v9403_v28  ;;  %v9413_v13 = vld [vmem:[#allocation43_spill] sm:$0xff]  ;;  %v9414_v28 = vld [vmem:[#allocation44_spill] sm:$0xff] }
 0x1a2   :  { %4740 = vmatprep.subr.bf16.mxu0 %v9404_v20  ;;  %4804 = vmatprep.subr.bf16.mxu1 %v9405_v3  ;;  %v9415_v20 = vld [vmem:[#allocation45_spill] sm:$0xff]  ;;  %v9416_v3 = vld [vmem:[#allocation46_spill] sm:$0xff] }
 0x1a5   :  { %4742 = vmatpush1.bf16.msra.mxu0 %v9406_v50  ;;  %4806 = vmatpush1.bf16.msra.mxu1 %v9407_v27  ;;  %v9417_v50 = vld [vmem:[#allocation47_spill] sm:$0xff]  ;;  %v9418_v27 = vld [vmem:[#allocation48_spill] sm:$0xff] }
 0x1a6   :  { %4744 = vmatprep.subr.bf16.mxu0 %v9408_v60  ;;  %4808 = vmatprep.subr.bf16.mxu1 %v9409_v38  ;;  %v9419_v60 = vld [vmem:[#allocation49_spill] sm:$0xff]  ;;  %v9420_v38 = vld [vmem:[#allocation50_spill] sm:$0xff] }
 0x1a9   :  { %4746 = vmatpush1.bf16.msra.mxu0 %v9410_v18  ;;  %4810 = vmatpush1.bf16.msra.mxu1 %v9411_v57  ;;  %v9421_v18 = vld [vmem:[#allocation51_spill] sm:$0xff]  ;;  %v9422_v57 = vld [vmem:[#allocation52_spill] sm:$0xff] }
 0x1aa   :  { %4748 = vmatprep.subr.bf16.mxu0 %v9412_v36  ;;  %4812 = vmatprep.subr.bf16.mxu1 %v9413_v13  ;;  %v9423_v36 = vld [vmem:[#allocation53_spill] sm:$0xff]  ;;  %v9424_v13 = vld [vmem:[#allocation54_spill] sm:$0xff] }
 0x1ad   :  { %4750 = vmatpush1.bf16.msra.mxu0 %v9414_v28  ;;  %4814 = vmatpush1.bf16.msra.mxu1 %v9415_v20  ;;  %v9425_v28 = vld [vmem:[#allocation55_spill] sm:$0xff]  ;;  %v9426_v20 = vld [vmem:[#allocation56_spill] sm:$0xff] }
 0x1ae   :  { %4752 = vmatprep.subr.bf16.mxu0 %v9416_v3  ;;  %4816 = vmatprep.subr.bf16.mxu1 %v9417_v50  ;;  %v9427_v3 = vld [vmem:[#allocation57_spill] sm:$0xff]  ;;  %v9428_v50 = vld [vmem:[#allocation58_spill] sm:$0xff] }
 0x1b1   :  { %4754 = vmatpush1.bf16.msra.mxu0 %v9418_v27  ;;  %4818 = vmatpush1.bf16.msra.mxu1 %v9419_v60  ;;  %v9429_v27 = vld [vmem:[#allocation59_spill] sm:$0xff]  ;;  %v9430_v60 = vld [vmem:[#allocation60_spill] sm:$0xff] }
 0x1b2   :  { %4756 = vmatprep.subr.bf16.mxu0 %v9420_v38  ;;  %4820 = vmatprep.subr.bf16.mxu1 %v9421_v18  ;;  %v9431_v38 = vld [vmem:[#allocation61_spill] sm:$0xff]  ;;  %v9432_v18 = vld [vmem:[#allocation4_spill] sm:$0xff] }
 0x1b5   :  { %4758 = vmatpush1.bf16.msra.mxu0 %v9422_v57  ;;  %4822 = vmatpush1.bf16.msra.mxu1 %v9423_v36  ;;  %v9433_v57 = vld [vmem:[#allocation5_spill] sm:$0xff] }
 0x1b6   :  { %4760 = vmatprep.subr.bf16.mxu0 %v9424_v13  ;;  %4824 = vmatprep.subr.bf16.mxu1 %v9425_v28  ;;  %v607_v28 = vld [vmem:[%s9179_s5] sm:$0xf] }
 0x1b7   :  { %v8113_v2 = vrot.slane %v607_v28, %v9437_v31 }
 0x1b9   :  { %4762 = vmatpush1.bf16.msra.mxu0 %v9426_v20  ;;  %4826 = vmatpush1.bf16.msra.mxu1 %v9427_v3  ;;  %v9434_v20 = vsub.s32 0, %v7968_v10  ;;  %9438 = vst [vmem:[#allocation65_spill] sm:$0xff] %v8113_v2 }
 0x1ba   :  { %4764 = vmatprep.subr.bf16.mxu0 %v9428_v50  ;;  %4828 = vmatprep.subr.bf16.mxu1 %v9429_v27  ;;  %v9436_v50 = vsub.s32 1, %v7968_v10 }
 0x1bb   :  { %v8103_v13 = vrot.slane %v607_v28, %v9434_v20 }
 0x1bc   :  { %v8107_v3 = vrot.slane %v607_v28, %v9436_v50  ;;  %v9439_v50 = vsub.s32 2, %v7968_v10 }
 0x1bd   :  { %4766 = vmatpush1.bf16.msra.mxu0 %v9430_v60  ;;  %4830 = vmatpush1.bf16.msra.mxu1 %v9431_v38  ;;  %9435 = vst [vmem:[#allocation64_spill] sm:$0xff] %v8103_v13 }
 0x1be   :  { %4832 = vmatprep.subr.bf16.mxu0 %v9432_v18  ;;  %4864 = vmatprep.subr.bf16.mxu1 %v9433_v57  ;;  %v8118_v1 = vrot.slane %v607_v28, %v9439_v50 }
 0x1c0   :  { %9440 = vst [vmem:[#allocation66_spill] sm:$0xff] %v8118_v1 }
 0x233   :  { %v872_v27 = vpop.f32.mrb[20].mxu0  ;;  %v943_v60 = vpop.f32.mrb[22].mxu1 }
 0x234   :  { %v873_v38 = vadd.f32 %v872_v27, %v8103_v13  ;;  %v874_v36 = vpop.f32.mrb[21].mxu0  ;;  %v945_v18 = vpop.f32.mrb[23].mxu1  ;;  %v944_v27 = vadd.f32 %v943_v60, %v8118_v1  ;;  %v9441_v60 = vld [vmem:[#allocation62_spill] sm:$0xff] }
 0x235   :  { %v875_v57 = vadd.f32 %v874_v36, %v8107_v3  ;;  %v946_v20 = vadd.f32 %v945_v18, %v8113_v2 }
 0x236   :  { %v4252_v58 = vmul.f32 -1.442695, %v873_v38 }
 0x237   :  { %v4253_v43 = vmul.f32 -1.442695, %v875_v57  ;;  %v4254_v52 = vmul.f32 -1.442695, %v946_v20 }
 0x238   :  { %6496 = vpow2.f32 %v4252_v58 }
 0x239   :  { %6498 = vpow2.f32 %v4253_v43 }
 0x23a   :  { %6500 = vpow2.f32 %v4254_v52 }
 0x23b   :  { %6502 = vtanh.f32 %v944_v27 }
 0x242   :  { %v6497_v13 = vpop.eup %6496 }
 0x243   :  { %v6499_v41 = vpop.eup %6498  ;;  %v951_v36 = vadd.f32 1.0, %v6497_v13 }
 0x244   :  { %v957_v38 = vadd.f32 1.0, %v6499_v41  ;;  %v6501_v31 = vpop.eup %6500  ;;  %v9442_v41 = vld [vmem:[#allocation63_spill] sm:$0xff] }
 0x245   :  { %6504 = vrcp.f32 %v951_v36  ;;  %v6503_v58 = vpop.eup %6502  ;;  %v964_v2 = vadd.f32 1.0, %v6501_v31 }
 0x246   :  { %6506 = vrcp.f32 %v957_v38 }
 0x247   :  { %6508 = vrcp.f32 %v964_v2 }
 0x24f   :  { %v6505_v43 = vpop.eup %6504 }
 0x250   :  { %v6507_v57 = vpop.eup %6506  ;;  %v968_v18 = vmul.f32 %v6505_v43, %v6503_v58 }
 0x251   :  { %v967_v10 = vmul.f32 0.0, %v6507_v57  ;;  %v6509_v58 = vpop.eup %6508 }
 0x253   :  { %v8121_v28 = vadd.f32 %v968_v18, %v967_v10  ;;  %v1046_v20 = vpop.f32.mrb[2].mxu0  ;;  %v1117_v50 = vpop.f32.mrb[2].mxu1 }
 0x254   :  { %v6403_v1 = vadd.f32 %v1046_v20, %v9441_v60  ;;  %v1048_v13 = vpop.f32.mrb[3].mxu0  ;;  %v1119_v52 = vpop.f32.mrb[3].mxu1  ;;  %v6423_v18 = vadd.f32 %v1117_v50, %v7989_v24 }
 0x255   :  { %6510 = vtanh.f32 %v8121_v28  ;;  %v6404_v27 = vadd.f32 %v1048_v13, %v9442_v41  ;;  %v6424_v31 = vadd.f32 %v1119_v52, %v7993_v19 }
 0x256   :  { %v4255_v36 = vmul.f32 -1.442695, %v6403_v1 }
 0x257   :  { %v4256_v38 = vmul.f32 -1.442695, %v6404_v27  ;;  %v4257_v57 = vmul.f32 -1.442695, %v6424_v31 }
 0x258   :  { %6512 = vpow2.f32 %v4255_v36 }
 0x259   :  { %6514 = vpow2.f32 %v4256_v38 }
 0x25a   :  { %6516 = vpow2.f32 %v4257_v57 }
 0x25b   :  { %6518 = vtanh.f32 %v6423_v18  ;;  %v9445_v18 = vld [vmem:[#allocation10_spill] sm:$0xff] }
 0x25f   :  { %v6511_v43 = vpop.eup %6510 }
 0x260   :  { %v8128_v2 = vmul.f32 %v6511_v43, %v6509_v58 }
 0x262   :  { %9443 = vst [vmem:[#allocation62_spill] sm:$0xff] %v8128_v2  ;;  %v6513_v10 = vpop.eup %6512  ;;  %1214 = vmatprep.mubr.f32.mxu0 %v8128_v2  ;;  %1285 = vmatprep.mubr.f32.mxu1 %v8128_v2 }
 0x263   :  { %v6515_v20 = vpop.eup %6514  ;;  %v1129_v13 = vadd.f32 1.0, %v6513_v10 }
 0x264   :  { %v1135_v1 = vadd.f32 1.0, %v6515_v20  ;;  %v6517_v52 = vpop.eup %6516  ;;  %v9447_v20 = vld [vmem:[#allocation12_spill] sm:$0xff] }
 0x265   :  { %6520 = vrcp.f32 %v1129_v13  ;;  %v6519_v27 = vpop.eup %6518  ;;  %v1142_v50 = vadd.f32 1.0, %v6517_v52  ;;  %v9448_v13 = vld [vmem:[#allocation13_spill] sm:$0xff]  ;;  %v9450_v52 = vld [vmem:[#allocation15_spill] sm:$0xff] }
 0x266   :  { %6522 = vrcp.f32 %v1135_v1  ;;  %v9449_v1 = vld [vmem:[#allocation14_spill] sm:$0xff] }
 0x267   :  { %6524 = vrcp.f32 %v1142_v50  ;;  %v9455_v50 = vld [vmem:[#allocation20_spill] sm:$0xff] }
 0x26f   :  { %v6521_v36 = vpop.eup %6520 }
 0x270   :  { %v6523_v38 = vpop.eup %6522  ;;  %v1146_v31 = vmul.f32 %v6521_v36, %v6519_v27  ;;  %v9451_v27 = vld [vmem:[#allocation16_spill] sm:$0xff]  ;;  %v9452_v36 = vld [vmem:[#allocation17_spill] sm:$0xff] }
 0x271   :  { %v1145_v58 = vmul.f32 %v6523_v38, %v7997_v11  ;;  %v6525_v2 = vpop.eup %6524  ;;  %v9444_v11 = vld [vmem:[#allocation9_spill] sm:$0xff]  ;;  %v9453_v38 = vld [vmem:[#allocation18_spill] sm:$0xff] }
 0x273   :  { %v8133_v43 = vadd.f32 %v1146_v31, %v1145_v58  ;;  %v9454_v31 = vld [vmem:[#allocation19_spill] sm:$0xff]  ;;  %v9456_v58 = vld [vmem:[#allocation21_spill] sm:$0xff] }
 0x275   :  { %6526 = vtanh.f32 %v8133_v43 }
 0x27f   :  { %v6527_v10 = vpop.eup %6526 }
 0x280   :  { %v1149_v57 = vmul.f32 %v6527_v10, %v6525_v2  ;;  %v9446_v2 = vld [vmem:[#allocation11_spill] sm:$0xff]  ;;  %v9457_v10 = vld [vmem:[#allocation22_spill] sm:$0xff] }
 0x282   :  { %1215 = vmatmul.mubr.f32.vlgmr.msra.gmra.mrb[22].mxu0 %v1149_v57  ;;  %1286 = vmatmul.mubr.f32.vlgmr.msra.gmra.mrb[24].mxu1 %v1149_v57 }
 0x283   :  { %4834 = vmatpush1.bf16.msra.mxu0 %v7041_v29  ;;  %4866 = vmatpush1.bf16.msra.mxu1 %v7259_v39 }
 0x284   :  { %4836 = vmatprep.subr.bf16.mxu0 %v7050_v32  ;;  %4868 = vmatprep.subr.bf16.mxu1 %v7261_v40 }
 0x285   :  { %1389 = vmatprep.mubr.f32.mxu0 %v9382_v49  ;;  %1460 = vmatprep.mubr.f32.mxu1 %v9382_v49 }
 0x287   :  { %4838 = vmatpush1.bf16.msra.mxu0 %v7078_v42  ;;  %4870 = vmatpush1.bf16.msra.mxu1 %v7278_v47 }
 0x288   :  { %4840 = vmatprep.subr.bf16.mxu0 %v7087_v45  ;;  %4872 = vmatprep.subr.bf16.mxu1 %v7282_v48 }
 0x28b   :  { %4842 = vmatpush1.bf16.msra.mxu0 %v7113_v55  ;;  %4874 = vmatpush1.bf16.msra.mxu1 %v7298_v53 }
 0x28c   :  { %4844 = vmatprep.subr.bf16.mxu0 %v7116_v56  ;;  %4876 = vmatprep.subr.bf16.mxu1 %v7301_v54 }
 0x28f   :  { %4846 = vmatpush1.bf16.msra.mxu0 %v7135_v63  ;;  %4878 = vmatpush1.bf16.msra.mxu1 %v7317_v61 }
 0x290   :  { %4848 = vmatprep.subr.bf16.mxu0 %v7138_v0  ;;  %4880 = vmatprep.subr.bf16.mxu1 %v7320_v62 }
 0x293   :  { %4850 = vmatpush1.bf16.msra.mxu0 %v7157_v7  ;;  %4882 = vmatpush1.bf16.msra.mxu1 %v7336_v6 }
 0x294   :  { %4852 = vmatprep.subr.bf16.mxu0 %v7160_v8  ;;  %4884 = vmatprep.subr.bf16.mxu1 %v7339_v9 }
 0x297   :  { %4854 = vmatpush1.bf16.msra.mxu0 %v7181_v14  ;;  %4886 = vmatpush1.bf16.msra.mxu1 %v7354_v16 }
 0x298   :  { %4856 = vmatprep.subr.bf16.mxu0 %v7184_v15  ;;  %4888 = vmatprep.subr.bf16.mxu1 %v7357_v17 }
 0x29b   :  { %4858 = vmatpush1.bf16.msra.mxu0 %v7205_v22  ;;  %4890 = vmatpush1.bf16.msra.mxu1 %v7372_v25 }
 0x29c   :  { %4860 = vmatprep.subr.bf16.mxu0 %v7208_v23  ;;  %4892 = vmatprep.subr.bf16.mxu1 %v7375_v26 }
 0x29f   :  { %4862 = vmatpush1.bf16.msra.mxu0 %v7228_v30  ;;  %4894 = vmatpush1.bf16.msra.mxu1 %v7384_v33 }
 0x2a0   :  { %4896 = vmatprep.subr.bf16.mxu0 %v7399_v37  ;;  %4960 = vmatprep.subr.bf16.mxu1 %v7410_v44 }
 0x2a2   :  { %1390 = vmatmul.mubr.f32.vlgmr.msra.gmra.mrb[4].mxu0 %v1149_v57  ;;  %1461 = vmatmul.mubr.f32.vlgmr.msra.gmra.mrb[4].mxu1 %v1149_v57  ;;  %v9458_v57 = vld [vmem:[#allocation23_spill] sm:$0xff] }
 0x2a3   :  { %4898 = vmatpush1.bf16.msra.mxu0 %v7412_v46  ;;  %4962 = vmatpush1.bf16.msra.mxu1 %v7421_v51 }
 0x2a4   :  { %4900 = vmatprep.subr.bf16.mxu0 %v7435_v59  ;;  %4964 = vmatprep.subr.bf16.mxu1 %v7446_v4 }
 0x2a7   :  { %4902 = vmatpush1.bf16.msra.mxu0 %v7448_v5  ;;  %4966 = vmatpush1.bf16.msra.mxu1 %v7457_v12 }
 0x2a8   :  { %4904 = vmatprep.subr.bf16.mxu0 %v7471_v21  ;;  %4968 = vmatprep.subr.bf16.mxu1 %v7482_v34 }
 0x2ab   :  { %4906 = vmatpush1.bf16.msra.mxu0 %v7484_v35  ;;  %4970 = vmatpush1.bf16.msra.mxu1 %v9444_v11 }
 0x2ac   :  { %4908 = vmatprep.subr.bf16.mxu0 %v9445_v18  ;;  %4972 = vmatprep.subr.bf16.mxu1 %v9446_v2 }
 0x2af   :  { %4910 = vmatpush1.bf16.msra.mxu0 %v9447_v20  ;;  %4974 = vmatpush1.bf16.msra.mxu1 %v9448_v13  ;;  %v9459_v13 = vld [vmem:[#allocation24_spill] sm:$0xff] }
 0x2b0   :  { %4912 = vmatprep.subr.bf16.mxu0 %v9449_v1  ;;  %4976 = vmatprep.subr.bf16.mxu1 %v9450_v52  ;;  %v9460_v1 = vld [vmem:[#allocation25_spill] sm:$0xff]  ;;  %v9461_v52 = vld [vmem:[#allocation26_spill] sm:$0xff]  ;;  %v9499_v20 = vld [vmem:[#allocation64_spill] sm:$0xff] }
 0x2b3   :  { %4914 = vmatpush1.bf16.msra.mxu0 %v9451_v27  ;;  %4978 = vmatpush1.bf16.msra.mxu1 %v9452_v36  ;;  %v9462_v27 = vld [vmem:[#allocation27_spill] sm:$0xff]  ;;  %v9463_v36 = vld [vmem:[#allocation28_spill] sm:$0xff] }
 0x2b4   :  { %4916 = vmatprep.subr.bf16.mxu0 %v9453_v38  ;;  %4980 = vmatprep.subr.bf16.mxu1 %v9454_v31  ;;  %v9464_v38 = vld [vmem:[#allocation29_spill] sm:$0xff]  ;;  %v9465_v31 = vld [vmem:[#allocation30_spill] sm:$0xff] }
 0x2b7   :  { %4918 = vmatpush1.bf16.msra.mxu0 %v9455_v50  ;;  %4982 = vmatpush1.bf16.msra.mxu1 %v9456_v58  ;;  %v9466_v50 = vld [vmem:[#allocation31_spill] sm:$0xff]  ;;  %v9467_v58 = vld [vmem:[#allocation32_spill] sm:$0xff] }
 0x2b8   :  { %4920 = vmatprep.subr.bf16.mxu0 %v9457_v10  ;;  %4984 = vmatprep.subr.bf16.mxu1 %v9458_v57  ;;  %v9468_v10 = vld [vmem:[#allocation33_spill] sm:$0xff]  ;;  %v9469_v57 = vld [vmem:[#allocation34_spill] sm:$0xff] }
 0x2bb   :  { %4922 = vmatpush1.bf16.msra.mxu0 %v9459_v13  ;;  %4986 = vmatpush1.bf16.msra.mxu1 %v9460_v1  ;;  %v9470_v13 = vld [vmem:[#allocation35_spill] sm:$0xff]  ;;  %v9471_v1 = vld [vmem:[#allocation36_spill] sm:$0xff] }
 0x2bc   :  { %4924 = vmatprep.subr.bf16.mxu0 %v9461_v52  ;;  %4988 = vmatprep.subr.bf16.mxu1 %v9462_v27  ;;  %v9472_v52 = vld [vmem:[#allocation37_spill] sm:$0xff]  ;;  %v9473_v27 = vld [vmem:[#allocation38_spill] sm:$0xff] }
 0x2bf   :  { %4926 = vmatpush1.bf16.msra.mxu0 %v9463_v36  ;;  %4990 = vmatpush1.bf16.msra.mxu1 %v9464_v38  ;;  %v9474_v36 = vld [vmem:[#allocation39_spill] sm:$0xff]  ;;  %v9475_v38 = vld [vmem:[#allocation40_spill] sm:$0xff] }
 0x2c0   :  { %4928 = vmatprep.subr.bf16.mxu0 %v9465_v31  ;;  %4992 = vmatprep.subr.bf16.mxu1 %v9466_v50  ;;  %v9476_v31 = vld [vmem:[#allocation41_spill] sm:$0xff]  ;;  %v9477_v50 = vld [vmem:[#allocation42_spill] sm:$0xff] }
 0x2c3   :  { %4930 = vmatpush1.bf16.msra.mxu0 %v9467_v58  ;;  %4994 = vmatpush1.bf16.msra.mxu1 %v9468_v10  ;;  %v9478_v58 = vld [vmem:[#allocation43_spill] sm:$0xff]  ;;  %v9479_v10 = vld [vmem:[#allocation44_spill] sm:$0xff] }
 0x2c4   :  { %4932 = vmatprep.subr.bf16.mxu0 %v9469_v57  ;;  %4996 = vmatprep.subr.bf16.mxu1 %v9470_v13  ;;  %v9480_v57 = vld [vmem:[#allocation45_spill] sm:$0xff]  ;;  %v9481_v13 = vld [vmem:[#allocation46_spill] sm:$0xff] }
 0x2c7   :  { %4934 = vmatpush1.bf16.msra.mxu0 %v9471_v1  ;;  %4998 = vmatpush1.bf16.msra.mxu1 %v9472_v52  ;;  %v9482_v1 = vld [vmem:[#allocation47_spill] sm:$0xff]  ;;  %v9483_v52 = vld [vmem:[#allocation48_spill] sm:$0xff] }
 0x2c8   :  { %4936 = vmatprep.subr.bf16.mxu0 %v9473_v27  ;;  %5000 = vmatprep.subr.bf16.mxu1 %v9474_v36  ;;  %v9484_v27 = vld [vmem:[#allocation49_spill] sm:$0xff]  ;;  %v9485_v36 = vld [vmem:[#allocation50_spill] sm:$0xff] }
 0x2cb   :  { %4938 = vmatpush1.bf16.msra.mxu0 %v9475_v38  ;;  %5002 = vmatpush1.bf16.msra.mxu1 %v9476_v31  ;;  %v9486_v38 = vld [vmem:[#allocation51_spill] sm:$0xff]  ;;  %v9487_v31 = vld [vmem:[#allocation52_spill] sm:$0xff] }
 0x2cc   :  { %4940 = vmatprep.subr.bf16.mxu0 %v9477_v50  ;;  %5004 = vmatprep.subr.bf16.mxu1 %v9478_v58  ;;  %v9488_v50 = vld [vmem:[#allocation53_spill] sm:$0xff]  ;;  %v9489_v58 = vld [vmem:[#allocation54_spill] sm:$0xff] }
 0x2cf   :  { %4942 = vmatpush1.bf16.msra.mxu0 %v9479_v10  ;;  %5006 = vmatpush1.bf16.msra.mxu1 %v9480_v57  ;;  %v9490_v10 = vld [vmem:[#allocation55_spill] sm:$0xff]  ;;  %v9491_v57 = vld [vmem:[#allocation56_spill] sm:$0xff] }
 0x2d0   :  { %4944 = vmatprep.subr.bf16.mxu0 %v9481_v13  ;;  %5008 = vmatprep.subr.bf16.mxu1 %v9482_v1  ;;  %v9492_v13 = vld [vmem:[#allocation57_spill] sm:$0xff]  ;;  %v9493_v1 = vld [vmem:[#allocation58_spill] sm:$0xff] }
 0x2d3   :  { %4946 = vmatpush1.bf16.msra.mxu0 %v9483_v52  ;;  %5010 = vmatpush1.bf16.msra.mxu1 %v9484_v27  ;;  %v9494_v52 = vld [vmem:[#allocation59_spill] sm:$0xff]  ;;  %v9495_v27 = vld [vmem:[#allocation60_spill] sm:$0xff] }
 0x2d4   :  { %4948 = vmatprep.subr.bf16.mxu0 %v9485_v36  ;;  %5012 = vmatprep.subr.bf16.mxu1 %v9486_v38  ;;  %v9496_v36 = vld [vmem:[#allocation61_spill] sm:$0xff]  ;;  %v9497_v38 = vld [vmem:[#allocation4_spill] sm:$0xff] }
 0x2d7   :  { %4950 = vmatpush1.bf16.msra.mxu0 %v9487_v31  ;;  %5014 = vmatpush1.bf16.msra.mxu1 %v9488_v50  ;;  %v9498_v31 = vld [vmem:[#allocation5_spill] sm:$0xff] }
 0x2d8   :  { %4952 = vmatprep.subr.bf16.mxu0 %v9489_v58  ;;  %5016 = vmatprep.subr.bf16.mxu1 %v9490_v10 }
 0x2db   :  { %4954 = vmatpush1.bf16.msra.mxu0 %v9491_v57  ;;  %5018 = vmatpush1.bf16.msra.mxu1 %v9492_v13 }
 0x2dc   :  { %4956 = vmatprep.subr.bf16.mxu0 %v9493_v1  ;;  %5020 = vmatprep.subr.bf16.mxu1 %v9494_v52  ;;  %v9500_v52 = vld [vmem:[#allocation65_spill] sm:$0xff] }
 0x2df   :  { %4958 = vmatpush1.bf16.msra.mxu0 %v9495_v27  ;;  %5022 = vmatpush1.bf16.msra.mxu1 %v9496_v36  ;;  %v9501_v36 = vld [vmem:[#allocation66_spill] sm:$0xff] }
 0x2e0   :  { %5024 = vmatprep.subr.bf16.mxu0 %v9497_v38  ;;  %5056 = vmatprep.subr.bf16.mxu1 %v9498_v31 }
 0x355   :  { %v1216_v50 = vpop.f32.mrb[22].mxu0  ;;  %v1287_v58 = vpop.f32.mrb[24].mxu1 }
 0x356   :  { %v1217_v10 = vadd.f32 %v1216_v50, %v9499_v20  ;;  %v1218_v2 = vpop.f32.mrb[23].mxu0  ;;  %v1289_v57 = vpop.f32.mrb[25].mxu1  ;;  %v1288_v35 = vadd.f32 %v1287_v58, %v9501_v36 }
 0x357   :  { %v1219_v13 = vadd.f32 %v1218_v2, %v8107_v3  ;;  %v1290_v27 = vadd.f32 %v1289_v57, %v9500_v52 }
 0x358   :  { %v4258_v18 = vmul.f32 -1.442695, %v1217_v10 }
 0x359   :  { %v4259_v1 = vmul.f32 -1.442695, %v1219_v13  ;;  %v4260_v11 = vmul.f32 -1.442695, %v1290_v27 }
 0x35a   :  { %6528 = vpow2.f32 %v4258_v18 }
 0x35b   :  { %6530 = vpow2.f32 %v4259_v1 }
 0x35c   :  { %6532 = vpow2.f32 %v4260_v11 }
 0x35d   :  { %6534 = vtanh.f32 %v1288_v35 }
 0x364   :  { %v6529_v38 = vpop.eup %6528 }
 0x365   :  { %v6531_v34 = vpop.eup %6530  ;;  %v1295_v31 = vadd.f32 1.0, %v6529_v38 }
 0x366   :  { %v1301_v21 = vadd.f32 1.0, %v6531_v34  ;;  %v6533_v50 = vpop.eup %6532 }
 0x367   :  { %6536 = vrcp.f32 %v1295_v31  ;;  %v6535_v20 = vpop.eup %6534  ;;  %v1308_v18 = vadd.f32 1.0, %v6533_v50 }
 0x368   :  { %6538 = vrcp.f32 %v1301_v21 }
 0x369   :  { %6540 = vrcp.f32 %v1308_v18 }
 0x371   :  { %v6537_v2 = vpop.eup %6536 }
 0x372   :  { %v6539_v10 = vpop.eup %6538  ;;  %v1312_v13 = vmul.f32 %v6537_v2, %v6535_v20 }
 0x373   :  { %v1311_v1 = vmul.f32 %v6539_v10, %v8121_v28  ;;  %v6541_v28 = vpop.eup %6540 }
 0x375   :  { %v1391_v57 = vpop.f32.mrb[4].mxu0  ;;  %v1462_v27 = vpop.f32.mrb[4].mxu1  ;;  %v8239_v52 = vadd.f32 %v1312_v13, %v1311_v1 }
 0x376   :  { %v6405_v38 = vadd.f32 %v1391_v57, %v9441_v60  ;;  %v1393_v11 = vpop.f32.mrb[5].mxu0  ;;  %v1464_v35 = vpop.f32.mrb[5].mxu1  ;;  %v6425_v2 = vadd.f32 %v1462_v27, %v7989_v24 }
 0x377   :  { %v6406_v34 = vadd.f32 %v1393_v11, %v9442_v41  ;;  %6542 = vtanh.f32 %v8239_v52  ;;  %v6426_v20 = vadd.f32 %v1464_v35, %v7993_v19 }
 0x378   :  { %v4261_v21 = vmul.f32 -1.442695, %v6405_v38 }
 0x379   :  { %v4262_v31 = vmul.f32 -1.442695, %v6406_v34  ;;  %v4263_v50 = vmul.f32 -1.442695, %v6426_v20 }
 0x37a   :  { %6544 = vpow2.f32 %v4261_v21 }
 0x37b   :  { %6546 = vpow2.f32 %v4262_v31 }
 0x37c   :  { %6548 = vpow2.f32 %v4263_v50 }
 0x37d   :  { %6550 = vtanh.f32 %v6425_v2  ;;  %v9504_v2 = vld [vmem:[#allocation7_spill] sm:$0xff] }
 0x381   :  { %v6543_v58 = vpop.eup %6542 }
 0x382   :  { %v8246_v10 = vmul.f32 %v6543_v58, %v6541_v28 }
 0x384   :  { %9502 = vst [vmem:[#allocation63_spill] sm:$0xff] %v8246_v10  ;;  %v6545_v13 = vpop.eup %6544  ;;  %1559 = vmatprep.mubr.f32.mxu0 %v8246_v10  ;;  %1630 = vmatprep.mubr.f32.mxu1 %v8246_v10  ;;  %v9519_v10 = vld [vmem:[#allocation22_spill] sm:$0xff] }
 0x385   :  { %v6547_v18 = vpop.eup %6546  ;;  %v1474_v1 = vadd.f32 1.0, %v6545_v13  ;;  %v9505_v13 = vld [vmem:[#allocation8_spill] sm:$0xff] }
 0x386   :  { %v1480_v57 = vadd.f32 1.0, %v6547_v18  ;;  %v6549_v38 = vpop.eup %6548  ;;  %v9506_v18 = vld [vmem:[#allocation9_spill] sm:$0xff] }
 0x387   :  { %6552 = vrcp.f32 %v1474_v1  ;;  %v6551_v11 = vpop.eup %6550  ;;  %v1487_v27 = vadd.f32 1.0, %v6549_v38  ;;  %v9507_v1 = vld [vmem:[#allocation10_spill] sm:$0xff]  ;;  %v9509_v38 = vld [vmem:[#allocation12_spill] sm:$0xff] }
 0x388   :  { %6554 = vrcp.f32 %v1480_v57  ;;  %v9508_v57 = vld [vmem:[#allocation11_spill] sm:$0xff] }
 0x389   :  { %6556 = vrcp.f32 %v1487_v27  ;;  %v9514_v27 = vld [vmem:[#allocation17_spill] sm:$0xff] }
 0x391   :  { %v6553_v35 = vpop.eup %6552 }
 0x392   :  { %v6555_v34 = vpop.eup %6554  ;;  %v1491_v21 = vmul.f32 %v6553_v35, %v6551_v11  ;;  %v9510_v11 = vld [vmem:[#allocation13_spill] sm:$0xff]  ;;  %v9511_v35 = vld [vmem:[#allocation14_spill] sm:$0xff] }
 0x393   :  { %v1490_v31 = vmul.f32 %v6555_v34, %v8133_v43  ;;  %v6557_v28 = vpop.eup %6556  ;;  %v9503_v43 = vld [vmem:[#allocation6_spill] sm:$0xff]  ;;  %v9512_v34 = vld [vmem:[#allocation15_spill] sm:$0xff] }
 0x395   :  { %v8251_v20 = vadd.f32 %v1491_v21, %v1490_v31  ;;  %v9513_v21 = vld [vmem:[#allocation16_spill] sm:$0xff]  ;;  %v9515_v31 = vld [vmem:[#allocation18_spill] sm:$0xff] }
 0x397   :  { %6558 = vtanh.f32 %v8251_v20 }
 0x3a1   :  { %v6559_v58 = vpop.eup %6558 }
 0x3a2   :  { %v1494_v50 = vmul.f32 %v6559_v58, %v6557_v28  ;;  %v9516_v28 = vld [vmem:[#allocation19_spill] sm:$0xff]  ;;  %v9517_v58 = vld [vmem:[#allocation20_spill] sm:$0xff] }
 0x3a4   :  { %1560 = vmatmul.mubr.f32.vlgmr.msra.gmra.mrb[24].mxu0 %v1494_v50  ;;  %1631 = vmatmul.mubr.f32.vlgmr.msra.gmra.mrb[26].mxu1 %v1494_v50 }
 0x3a5   :  { %5026 = vmatpush1.bf16.msra.mxu0 %v7041_v29  ;;  %5058 = vmatpush1.bf16.msra.mxu1 %v7259_v39 }
 0x3a6   :  { %5028 = vmatprep.subr.bf16.mxu0 %v7050_v32  ;;  %5060 = vmatprep.subr.bf16.mxu1 %v7261_v40 }
 0x3a7   :  { %1734 = vmatprep.mubr.f32.mxu0 %v9382_v49  ;;  %1805 = vmatprep.mubr.f32.mxu1 %v9382_v49 }
 0x3a9   :  { %5030 = vmatpush1.bf16.msra.mxu0 %v7078_v42  ;;  %5062 = vmatpush1.bf16.msra.mxu1 %v7278_v47 }
 0x3aa   :  { %5032 = vmatprep.subr.bf16.mxu0 %v7087_v45  ;;  %5064 = vmatprep.subr.bf16.mxu1 %v7282_v48 }
 0x3ad   :  { %5034 = vmatpush1.bf16.msra.mxu0 %v7113_v55  ;;  %5066 = vmatpush1.bf16.msra.mxu1 %v7298_v53 }
 0x3ae   :  { %5036 = vmatprep.subr.bf16.mxu0 %v7116_v56  ;;  %5068 = vmatprep.subr.bf16.mxu1 %v7301_v54 }
 0x3b1   :  { %5038 = vmatpush1.bf16.msra.mxu0 %v7135_v63  ;;  %5070 = vmatpush1.bf16.msra.mxu1 %v7317_v61 }
 0x3b2   :  { %5040 = vmatprep.subr.bf16.mxu0 %v7138_v0  ;;  %5072 = vmatprep.subr.bf16.mxu1 %v7320_v62 }
 0x3b5   :  { %5042 = vmatpush1.bf16.msra.mxu0 %v7157_v7  ;;  %5074 = vmatpush1.bf16.msra.mxu1 %v7336_v6 }
 0x3b6   :  { %5044 = vmatprep.subr.bf16.mxu0 %v7160_v8  ;;  %5076 = vmatprep.subr.bf16.mxu1 %v7339_v9 }
 0x3b9   :  { %5046 = vmatpush1.bf16.msra.mxu0 %v7181_v14  ;;  %5078 = vmatpush1.bf16.msra.mxu1 %v7354_v16 }
 0x3ba   :  { %5048 = vmatprep.subr.bf16.mxu0 %v7184_v15  ;;  %5080 = vmatprep.subr.bf16.mxu1 %v7357_v17 }
 0x3bd   :  { %5050 = vmatpush1.bf16.msra.mxu0 %v7205_v22  ;;  %5082 = vmatpush1.bf16.msra.mxu1 %v7372_v25 }
 0x3be   :  { %5052 = vmatprep.subr.bf16.mxu0 %v7208_v23  ;;  %5084 = vmatprep.subr.bf16.mxu1 %v7375_v26 }
 0x3c1   :  { %5054 = vmatpush1.bf16.msra.mxu0 %v7228_v30  ;;  %5086 = vmatpush1.bf16.msra.mxu1 %v7384_v33 }
 0x3c2   :  { %5088 = vmatprep.subr.bf16.mxu0 %v7399_v37  ;;  %5152 = vmatprep.subr.bf16.mxu1 %v7410_v44 }
 0x3c4   :  { %1735 = vmatmul.mubr.f32.vlgmr.msra.gmra.mrb[6].mxu0 %v1494_v50  ;;  %1806 = vmatmul.mubr.f32.vlgmr.msra.gmra.mrb[6].mxu1 %v1494_v50  ;;  %v9518_v50 = vld [vmem:[#allocation21_spill] sm:$0xff] }
 0x3c5   :  { %5090 = vmatpush1.bf16.msra.mxu0 %v7412_v46  ;;  %5154 = vmatpush1.bf16.msra.mxu1 %v7421_v51 }
 0x3c6   :  { %5092 = vmatprep.subr.bf16.mxu0 %v7435_v59  ;;  %5156 = vmatprep.subr.bf16.mxu1 %v7446_v4 }
 0x3c9   :  { %5094 = vmatpush1.bf16.msra.mxu0 %v7448_v5  ;;  %5158 = vmatpush1.bf16.msra.mxu1 %v7457_v12 }
 0x3ca   :  { %5096 = vmatprep.subr.bf16.mxu0 %v9503_v43  ;;  %5160 = vmatprep.subr.bf16.mxu1 %v9504_v2 }
 0x3cd   :  { %5098 = vmatpush1.bf16.msra.mxu0 %v9505_v13  ;;  %5162 = vmatpush1.bf16.msra.mxu1 %v9506_v18 }
 0x3ce   :  { %5100 = vmatprep.subr.bf16.mxu0 %v9507_v1  ;;  %5164 = vmatprep.subr.bf16.mxu1 %v9508_v57  ;;  %v9561_v57 = vld [vmem:[#allocation64_spill] sm:$0xff] }
 0x3d1   :  { %5102 = vmatpush1.bf16.msra.mxu0 %v9509_v38  ;;  %5166 = vmatpush1.bf16.msra.mxu1 %v9510_v11  ;;  %v9520_v38 = vld [vmem:[#allocation23_spill] sm:$0xff]  ;;  %v9521_v11 = vld [vmem:[#allocation24_spill] sm:$0xff] }
 0x3d2   :  { %5104 = vmatprep.subr.bf16.mxu0 %v9511_v35  ;;  %5168 = vmatprep.subr.bf16.mxu1 %v9512_v34  ;;  %v9522_v35 = vld [vmem:[#allocation25_spill] sm:$0xff]  ;;  %v9523_v34 = vld [vmem:[#allocation26_spill] sm:$0xff] }
 0x3d5   :  { %5106 = vmatpush1.bf16.msra.mxu0 %v9513_v21  ;;  %5170 = vmatpush1.bf16.msra.mxu1 %v9514_v27  ;;  %v9524_v21 = vld [vmem:[#allocation27_spill] sm:$0xff]  ;;  %v9525_v27 = vld [vmem:[#allocation28_spill] sm:$0xff] }
 0x3d6   :  { %5108 = vmatprep.subr.bf16.mxu0 %v9515_v31  ;;  %5172 = vmatprep.subr.bf16.mxu1 %v9516_v28  ;;  %v9526_v31 = vld [vmem:[#allocation29_spill] sm:$0xff]  ;;  %v9527_v28 = vld [vmem:[#allocation30_spill] sm:$0xff] }
 0x3d9   :  { %5110 = vmatpush1.bf16.msra.mxu0 %v9517_v58  ;;  %5174 = vmatpush1.bf16.msra.mxu1 %v9518_v50  ;;  %v9528_v58 = vld [vmem:[#allocation31_spill] sm:$0xff]  ;;  %v9529_v50 = vld [vmem:[#allocation32_spill] sm:$0xff] }
 0x3da   :  { %5112 = vmatprep.subr.bf16.mxu0 %v9519_v10  ;;  %5176 = vmatprep.subr.bf16.mxu1 %v9520_v38  ;;  %v9530_v10 = vld [vmem:[#allocation33_spill] sm:$0xff]  ;;  %v9531_v38 = vld [vmem:[#allocation34_spill] sm:$0xff] }
 0x3dd   :  { %5114 = vmatpush1.bf16.msra.mxu0 %v9521_v11  ;;  %5178 = vmatpush1.bf16.msra.mxu1 %v9522_v35  ;;  %v9532_v11 = vld [vmem:[#allocation35_spill] sm:$0xff]  ;;  %v9533_v35 = vld [vmem:[#allocation36_spill] sm:$0xff] }
 0x3de   :  { %5116 = vmatprep.subr.bf16.mxu0 %v9523_v34  ;;  %5180 = vmatprep.subr.bf16.mxu1 %v9524_v21  ;;  %v9534_v34 = vld [vmem:[#allocation37_spill] sm:$0xff]  ;;  %v9535_v21 = vld [vmem:[#allocation38_spill] sm:$0xff] }
 0x3e1   :  { %5118 = vmatpush1.bf16.msra.mxu0 %v9525_v27  ;;  %5182 = vmatpush1.bf16.msra.mxu1 %v9526_v31  ;;  %v9536_v27 = vld [vmem:[#allocation39_spill] sm:$0xff]  ;;  %v9537_v31 = vld [vmem:[#allocation40_spill] sm:$0xff] }
 0x3e2   :  { %5120 = vmatprep.subr.bf16.mxu0 %v9527_v28  ;;  %5184 = vmatprep.subr.bf16.mxu1 %v9528_v58  ;;  %v9538_v28 = vld [vmem:[#allocation41_spill] sm:$0xff]  ;;  %v9539_v58 = vld [vmem:[#allocation42_spill] sm:$0xff] }
 0x3e5   :  { %5122 = vmatpush1.bf16.msra.mxu0 %v9529_v50  ;;  %5186 = vmatpush1.bf16.msra.mxu1 %v9530_v10  ;;  %v9540_v50 = vld [vmem:[#allocation43_spill] sm:$0xff]  ;;  %v9541_v10 = vld [vmem:[#allocation44_spill] sm:$0xff] }
 0x3e6   :  { %5124 = vmatprep.subr.bf16.mxu0 %v9531_v38  ;;  %5188 = vmatprep.subr.bf16.mxu1 %v9532_v11  ;;  %v9542_v38 = vld [vmem:[#allocation45_spill] sm:$0xff]  ;;  %v9543_v11 = vld [vmem:[#allocation46_spill] sm:$0xff] }
 0x3e9   :  { %5126 = vmatpush1.bf16.msra.mxu0 %v9533_v35  ;;  %5190 = vmatpush1.bf16.msra.mxu1 %v9534_v34  ;;  %v9544_v35 = vld [vmem:[#allocation47_spill] sm:$0xff]  ;;  %v9545_v34 = vld [vmem:[#allocation48_spill] sm:$0xff] }
 0x3ea   :  { %5128 = vmatprep.subr.bf16.mxu0 %v9535_v21  ;;  %5192 = vmatprep.subr.bf16.mxu1 %v9536_v27  ;;  %v9546_v21 = vld [vmem:[#allocation49_spill] sm:$0xff]  ;;  %v9547_v27 = vld [vmem:[#allocation50_spill] sm:$0xff] }
 0x3ed   :  { %5130 = vmatpush1.bf16.msra.mxu0 %v9537_v31  ;;  %5194 = vmatpush1.bf16.msra.mxu1 %v9538_v28  ;;  %v9548_v31 = vld [vmem:[#allocation51_spill] sm:$0xff]  ;;  %v9549_v28 = vld [vmem:[#allocation52_spill] sm:$0xff] }
 0x3ee   :  { %5132 = vmatprep.subr.bf16.mxu0 %v9539_v58  ;;  %5196 = vmatprep.subr.bf16.mxu1 %v9540_v50  ;;  %v9550_v58 = vld [vmem:[#allocation53_spill] sm:$0xff]  ;;  %v9551_v50 = vld [vmem:[#allocation54_spill] sm:$0xff] }
 0x3f1   :  { %5134 = vmatpush1.bf16.msra.mxu0 %v9541_v10  ;;  %5198 = vmatpush1.bf16.msra.mxu1 %v9542_v38  ;;  %v9552_v10 = vld [vmem:[#allocation55_spill] sm:$0xff]  ;;  %v9553_v38 = vld [vmem:[#allocation56_spill] sm:$0xff] }
 0x3f2   :  { %5136 = vmatprep.subr.bf16.mxu0 %v9543_v11  ;;  %5200 = vmatprep.subr.bf16.mxu1 %v9544_v35  ;;  %v9554_v11 = vld [vmem:[#allocation57_spill] sm:$0xff]  ;;  %v9555_v35 = vld [vmem:[#allocation58_spill] sm:$0xff] }
 0x3f5   :  { %5138 = vmatpush1.bf16.msra.mxu0 %v9545_v34  ;;  %5202 = vmatpush1.bf16.msra.mxu1 %v9546_v21  ;;  %v9556_v34 = vld [vmem:[#allocation59_spill] sm:$0xff]  ;;  %v9557_v21 = vld [vmem:[#allocation60_spill] sm:$0xff] }
 0x3f6   :  { %5140 = vmatprep.subr.bf16.mxu0 %v9547_v27  ;;  %5204 = vmatprep.subr.bf16.mxu1 %v9548_v31  ;;  %v9558_v27 = vld [vmem:[#allocation61_spill] sm:$0xff]  ;;  %v9559_v31 = vld [vmem:[#allocation4_spill] sm:$0xff] }
 0x3f9   :  { %5142 = vmatpush1.bf16.msra.mxu0 %v9549_v28  ;;  %5206 = vmatpush1.bf16.msra.mxu1 %v9550_v58  ;;  %v9560_v28 = vld [vmem:[#allocation5_spill] sm:$0xff] }
 0x3fa   :  { %5144 = vmatprep.subr.bf16.mxu0 %v9551_v50  ;;  %5208 = vmatprep.subr.bf16.mxu1 %v9552_v10 }
 0x3fd   :  { %5146 = vmatpush1.bf16.msra.mxu0 %v9553_v38  ;;  %5210 = vmatpush1.bf16.msra.mxu1 %v9554_v11 }
 0x3fe   :  { %5148 = vmatprep.subr.bf16.mxu0 %v9555_v35  ;;  %5212 = vmatprep.subr.bf16.mxu1 %v9556_v34  ;;  %v9562_v34 = vld [vmem:[#allocation65_spill] sm:$0xff] }
 0x401   :  { %5150 = vmatpush1.bf16.msra.mxu0 %v9557_v21  ;;  %5214 = vmatpush1.bf16.msra.mxu1 %v9558_v27 }
 0x402   :  { %5216 = vmatprep.subr.bf16.mxu0 %v9559_v31  ;;  %5248 = vmatprep.subr.bf16.mxu1 %v9560_v28 }
 0x477   :  { %v1561_v58 = vpop.f32.mrb[24].mxu0  ;;  %v1632_v50 = vpop.f32.mrb[26].mxu1 }
 0x478   :  { %v1562_v10 = vadd.f32 %v1561_v58, %v9561_v57  ;;  %v1563_v1 = vpop.f32.mrb[25].mxu0  ;;  %v1634_v38 = vpop.f32.mrb[27].mxu1  ;;  %v1633_v27 = vadd.f32 %v1632_v50, %v9501_v36 }
 0x479   :  { %v1564_v11 = vadd.f32 %v1563_v1, %v8107_v3  ;;  %v1635_v21 = vadd.f32 %v1634_v38, %v9562_v34 }
 0x47a   :  { %v4264_v18 = vmul.f32 -1.442695, %v1562_v10 }
 0x47b   :  { %v4265_v35 = vmul.f32 -1.442695, %v1564_v11  ;;  %v4266_v13 = vmul.f32 -1.442695, %v1635_v21 }
 0x47c   :  { %6560 = vpow2.f32 %v4264_v18 }
 0x47d   :  { %6562 = vpow2.f32 %v4265_v35 }
 0x47e   :  { %6564 = vpow2.f32 %v4266_v13 }
 0x47f   :  { %6566 = vtanh.f32 %v1633_v27 }
 0x486   :  { %v6561_v31 = vpop.eup %6560 }
 0x487   :  { %v6563_v2 = vpop.eup %6562  ;;  %v1640_v28 = vadd.f32 1.0, %v6561_v31 }
 0x488   :  { %v1646_v43 = vadd.f32 1.0, %v6563_v2  ;;  %v6565_v58 = vpop.eup %6564 }
 0x489   :  { %6568 = vrcp.f32 %v1640_v28  ;;  %v6567_v57 = vpop.eup %6566  ;;  %v1653_v18 = vadd.f32 1.0, %v6565_v58 }
 0x48a   :  { %6570 = vrcp.f32 %v1646_v43 }
 0x48b   :  { %6572 = vrcp.f32 %v1653_v18 }
 0x493   :  { %v6569_v1 = vpop.eup %6568 }
 0x494   :  { %v6571_v10 = vpop.eup %6570  ;;  %v1657_v11 = vmul.f32 %v6569_v1, %v6567_v57 }
 0x495   :  { %v1656_v35 = vmul.f32 %v6571_v10, %v8239_v52  ;;  %v6573_v52 = vpop.eup %6572 }
 0x497   :  { %v1736_v38 = vpop.f32.mrb[6].mxu0  ;;  %v1807_v21 = vpop.f32.mrb[6].mxu1  ;;  %v8357_v34 = vadd.f32 %v1657_v11, %v1656_v35 }
 0x498   :  { %v6407_v31 = vadd.f32 %v1736_v38, %v9441_v60  ;;  %v1738_v13 = vpop.f32.mrb[7].mxu0  ;;  %v1809_v27 = vpop.f32.mrb[7].mxu1  ;;  %v6427_v1 = vadd.f32 %v1807_v21, %v7989_v24 }
 0x499   :  { %v6408_v2 = vadd.f32 %v1738_v13, %v9442_v41  ;;  %6574 = vtanh.f32 %v8357_v34  ;;  %v6428_v57 = vadd.f32 %v1809_v27, %v7993_v19 }
 0x49a   :  { %v4267_v43 = vmul.f32 -1.442695, %v6407_v31 }
 0x49b   :  { %v4268_v28 = vmul.f32 -1.442695, %v6408_v2  ;;  %v4269_v58 = vmul.f32 -1.442695, %v6428_v57 }
 0x49c   :  { %6576 = vpow2.f32 %v4267_v43 }
 0x49d   :  { %6578 = vpow2.f32 %v4268_v28 }
 0x49e   :  { %6580 = vpow2.f32 %v4269_v58 }
 0x49f   :  { %6582 = vtanh.f32 %v6427_v1  ;;  %v9565_v1 = vld [vmem:[#allocation7_spill] sm:$0xff] }
 0x4a3   :  { %v6575_v50 = vpop.eup %6574 }
 0x4a4   :  { %v8364_v10 = vmul.f32 %v6575_v50, %v6573_v52 }
 0x4a6   :  { %9563 = vst [vmem:[#allocation66_spill] sm:$0xff] %v8364_v10  ;;  %v6577_v11 = vpop.eup %6576  ;;  %1904 = vmatprep.mubr.f32.mxu0 %v8364_v10  ;;  %1975 = vmatprep.mubr.f32.mxu1 %v8364_v10  ;;  %v9580_v10 = vld [vmem:[#allocation22_spill] sm:$0xff] }
 0x4a7   :  { %v6579_v18 = vpop.eup %6578  ;;  %v1819_v35 = vadd.f32 1.0, %v6577_v11  ;;  %v9566_v11 = vld [vmem:[#allocation8_spill] sm:$0xff] }
 0x4a8   :  { %v1825_v38 = vadd.f32 1.0, %v6579_v18  ;;  %v6581_v31 = vpop.eup %6580  ;;  %v9567_v18 = vld [vmem:[#allocation9_spill] sm:$0xff] }
 0x4a9   :  { %6584 = vrcp.f32 %v1819_v35  ;;  %v6583_v13 = vpop.eup %6582  ;;  %v1832_v21 = vadd.f32 1.0, %v6581_v31  ;;  %v9568_v35 = vld [vmem:[#allocation10_spill] sm:$0xff]  ;;  %v9570_v31 = vld [vmem:[#allocation12_spill] sm:$0xff] }
 0x4aa   :  { %6586 = vrcp.f32 %v1825_v38  ;;  %v9569_v38 = vld [vmem:[#allocation11_spill] sm:$0xff] }
 0x4ab   :  { %6588 = vrcp.f32 %v1832_v21  ;;  %v9575_v21 = vld [vmem:[#allocation17_spill] sm:$0xff] }
 0x4b3   :  { %v6585_v27 = vpop.eup %6584 }
 0x4b4   :  { %v6587_v2 = vpop.eup %6586  ;;  %v1836_v43 = vmul.f32 %v6585_v27, %v6583_v13  ;;  %v9571_v13 = vld [vmem:[#allocation13_spill] sm:$0xff]  ;;  %v9572_v27 = vld [vmem:[#allocation14_spill] sm:$0xff] }
 0x4b5   :  { %v1835_v28 = vmul.f32 %v6587_v2, %v8251_v20  ;;  %v6589_v52 = vpop.eup %6588  ;;  %v9564_v20 = vld [vmem:[#allocation6_spill] sm:$0xff]  ;;  %v9573_v2 = vld [vmem:[#allocation15_spill] sm:$0xff] }
 0x4b7   :  { %v8369_v57 = vadd.f32 %v1836_v43, %v1835_v28  ;;  %v9574_v43 = vld [vmem:[#allocation16_spill] sm:$0xff]  ;;  %v9576_v28 = vld [vmem:[#allocation18_spill] sm:$0xff] }
 0x4b9   :  { %6590 = vtanh.f32 %v8369_v57 }
 0x4c3   :  { %v6591_v50 = vpop.eup %6590 }
 0x4c4   :  { %v1839_v58 = vmul.f32 %v6591_v50, %v6589_v52  ;;  %v9577_v52 = vld [vmem:[#allocation19_spill] sm:$0xff]  ;;  %v9578_v50 = vld [vmem:[#allocation20_spill] sm:$0xff] }
 0x4c6   :  { %1905 = vmatmul.mubr.f32.vlgmr.msra.gmra.mrb[26].mxu0 %v1839_v58  ;;  %1976 = vmatmul.mubr.f32.vlgmr.msra.gmra.mrb[28].mxu1 %v1839_v58 }
 0x4c7   :  { %5218 = vmatpush1.bf16.msra.mxu0 %v7041_v29  ;;  %5250 = vmatpush1.bf16.msra.mxu1 %v7259_v39 }
 0x4c8   :  { %5220 = vmatprep.subr.bf16.mxu0 %v7050_v32  ;;  %5252 = vmatprep.subr.bf16.mxu1 %v7261_v40 }
 0x4c9   :  { %2079 = vmatprep.mubr.f32.mxu0 %v9382_v49  ;;  %2150 = vmatprep.mubr.f32.mxu1 %v9382_v49 }
 0x4cb   :  { %5222 = vmatpush1.bf16.msra.mxu0 %v7078_v42  ;;  %5254 = vmatpush1.bf16.msra.mxu1 %v7278_v47 }
 0x4cc   :  { %5224 = vmatprep.subr.bf16.mxu0 %v7087_v45  ;;  %5256 = vmatprep.subr.bf16.mxu1 %v7282_v48 }
 0x4cf   :  { %5226 = vmatpush1.bf16.msra.mxu0 %v7113_v55  ;;  %5258 = vmatpush1.bf16.msra.mxu1 %v7298_v53 }
 0x4d0   :  { %5228 = vmatprep.subr.bf16.mxu0 %v7116_v56  ;;  %5260 = vmatprep.subr.bf16.mxu1 %v7301_v54 }
 0x4d3   :  { %5230 = vmatpush1.bf16.msra.mxu0 %v7135_v63  ;;  %5262 = vmatpush1.bf16.msra.mxu1 %v7317_v61 }
 0x4d4   :  { %5232 = vmatprep.subr.bf16.mxu0 %v7138_v0  ;;  %5264 = vmatprep.subr.bf16.mxu1 %v7320_v62 }
 0x4d7   :  { %5234 = vmatpush1.bf16.msra.mxu0 %v7157_v7  ;;  %5266 = vmatpush1.bf16.msra.mxu1 %v7336_v6 }
 0x4d8   :  { %5236 = vmatprep.subr.bf16.mxu0 %v7160_v8  ;;  %5268 = vmatprep.subr.bf16.mxu1 %v7339_v9 }
 0x4db   :  { %5238 = vmatpush1.bf16.msra.mxu0 %v7181_v14  ;;  %5270 = vmatpush1.bf16.msra.mxu1 %v7354_v16 }
 0x4dc   :  { %5240 = vmatprep.subr.bf16.mxu0 %v7184_v15  ;;  %5272 = vmatprep.subr.bf16.mxu1 %v7357_v17 }
 0x4df   :  { %5242 = vmatpush1.bf16.msra.mxu0 %v7205_v22  ;;  %5274 = vmatpush1.bf16.msra.mxu1 %v7372_v25 }
 0x4e0   :  { %5244 = vmatprep.subr.bf16.mxu0 %v7208_v23  ;;  %5276 = vmatprep.subr.bf16.mxu1 %v7375_v26 }
 0x4e3   :  { %5246 = vmatpush1.bf16.msra.mxu0 %v7228_v30  ;;  %5278 = vmatpush1.bf16.msra.mxu1 %v7384_v33 }
 0x4e4   :  { %5280 = vmatprep.subr.bf16.mxu0 %v7399_v37  ;;  %5344 = vmatprep.subr.bf16.mxu1 %v7410_v44 }
 0x4e6   :  { %2080 = vmatmul.mubr.f32.vlgmr.msra.gmra.mrb[8].mxu0 %v1839_v58  ;;  %2151 = vmatmul.mubr.f32.vlgmr.msra.gmra.mrb[8].mxu1 %v1839_v58  ;;  %v9579_v58 = vld [vmem:[#allocation21_spill] sm:$0xff] }
 0x4e7   :  { %5282 = vmatpush1.bf16.msra.mxu0 %v7412_v46  ;;  %5346 = vmatpush1.bf16.msra.mxu1 %v7421_v51 }
 0x4e8   :  { %5284 = vmatprep.subr.bf16.mxu0 %v7435_v59  ;;  %5348 = vmatprep.subr.bf16.mxu1 %v7446_v4 }
 0x4eb   :  { %5286 = vmatpush1.bf16.msra.mxu0 %v7448_v5  ;;  %5350 = vmatpush1.bf16.msra.mxu1 %v7457_v12 }
 0x4ec   :  { %5288 = vmatprep.subr.bf16.mxu0 %v9564_v20  ;;  %5352 = vmatprep.subr.bf16.mxu1 %v9565_v1 }
 0x4ef   :  { %5290 = vmatpush1.bf16.msra.mxu0 %v9566_v11  ;;  %5354 = vmatpush1.bf16.msra.mxu1 %v9567_v18 }
 0x4f0   :  { %5292 = vmatprep.subr.bf16.mxu0 %v9568_v35  ;;  %5356 = vmatprep.subr.bf16.mxu1 %v9569_v38  ;;  %v9622_v38 = vld [vmem:[#allocation64_spill] sm:$0xff] }
 0x4f3   :  { %5294 = vmatpush1.bf16.msra.mxu0 %v9570_v31  ;;  %5358 = vmatpush1.bf16.msra.mxu1 %v9571_v13  ;;  %v9581_v31 = vld [vmem:[#allocation23_spill] sm:$0xff]  ;;  %v9582_v13 = vld [vmem:[#allocation24_spill] sm:$0xff] }
 0x4f4   :  { %5296 = vmatprep.subr.bf16.mxu0 %v9572_v27  ;;  %5360 = vmatprep.subr.bf16.mxu1 %v9573_v2  ;;  %v9583_v27 = vld [vmem:[#allocation25_spill] sm:$0xff]  ;;  %v9584_v2 = vld [vmem:[#allocation26_spill] sm:$0xff] }
 0x4f7   :  { %5298 = vmatpush1.bf16.msra.mxu0 %v9574_v43  ;;  %5362 = vmatpush1.bf16.msra.mxu1 %v9575_v21  ;;  %v9585_v43 = vld [vmem:[#allocation27_spill] sm:$0xff]  ;;  %v9586_v21 = vld [vmem:[#allocation28_spill] sm:$0xff] }
 0x4f8   :  { %5300 = vmatprep.subr.bf16.mxu0 %v9576_v28  ;;  %5364 = vmatprep.subr.bf16.mxu1 %v9577_v52  ;;  %v9587_v28 = vld [vmem:[#allocation29_spill] sm:$0xff]  ;;  %v9588_v52 = vld [vmem:[#allocation30_spill] sm:$0xff] }
 0x4fb   :  { %5302 = vmatpush1.bf16.msra.mxu0 %v9578_v50  ;;  %5366 = vmatpush1.bf16.msra.mxu1 %v9579_v58  ;;  %v9589_v50 = vld [vmem:[#allocation31_spill] sm:$0xff]  ;;  %v9590_v58 = vld [vmem:[#allocation32_spill] sm:$0xff] }
 0x4fc   :  { %5304 = vmatprep.subr.bf16.mxu0 %v9580_v10  ;;  %5368 = vmatprep.subr.bf16.mxu1 %v9581_v31  ;;  %v9591_v10 = vld [vmem:[#allocation33_spill] sm:$0xff]  ;;  %v9592_v31 = vld [vmem:[#allocation34_spill] sm:$0xff] }
 0x4ff   :  { %5306 = vmatpush1.bf16.msra.mxu0 %v9582_v13  ;;  %5370 = vmatpush1.bf16.msra.mxu1 %v9583_v27  ;;  %v9593_v13 = vld [vmem:[#allocation35_spill] sm:$0xff]  ;;  %v9594_v27 = vld [vmem:[#allocation36_spill] sm:$0xff] }
 0x500   :  { %5308 = vmatprep.subr.bf16.mxu0 %v9584_v2  ;;  %5372 = vmatprep.subr.bf16.mxu1 %v9585_v43  ;;  %v9595_v2 = vld [vmem:[#allocation37_spill] sm:$0xff]  ;;  %v9596_v43 = vld [vmem:[#allocation38_spill] sm:$0xff] }
 0x503   :  { %5310 = vmatpush1.bf16.msra.mxu0 %v9586_v21  ;;  %5374 = vmatpush1.bf16.msra.mxu1 %v9587_v28  ;;  %v9597_v21 = vld [vmem:[#allocation39_spill] sm:$0xff]  ;;  %v9598_v28 = vld [vmem:[#allocation40_spill] sm:$0xff] }
 0x504   :  { %5312 = vmatprep.subr.bf16.mxu0 %v9588_v52  ;;  %5376 = vmatprep.subr.bf16.mxu1 %v9589_v50  ;;  %v9599_v52 = vld [vmem:[#allocation41_spill] sm:$0xff]  ;;  %v9600_v50 = vld [vmem:[#allocation42_spill] sm:$0xff] }
 0x507   :  { %5314 = vmatpush1.bf16.msra.mxu0 %v9590_v58  ;;  %5378 = vmatpush1.bf16.msra.mxu1 %v9591_v10  ;;  %v9601_v58 = vld [vmem:[#allocation43_spill] sm:$0xff]  ;;  %v9602_v10 = vld [vmem:[#allocation44_spill] sm:$0xff] }
 0x508   :  { %5316 = vmatprep.subr.bf16.mxu0 %v9592_v31  ;;  %5380 = vmatprep.subr.bf16.mxu1 %v9593_v13  ;;  %v9603_v31 = vld [vmem:[#allocation45_spill] sm:$0xff]  ;;  %v9604_v13 = vld [vmem:[#allocation46_spill] sm:$0xff] }
 0x50b   :  { %5318 = vmatpush1.bf16.msra.mxu0 %v9594_v27  ;;  %5382 = vmatpush1.bf16.msra.mxu1 %v9595_v2  ;;  %v9605_v27 = vld [vmem:[#allocation47_spill] sm:$0xff]  ;;  %v9606_v2 = vld [vmem:[#allocation48_spill] sm:$0xff] }
 0x50c   :  { %5320 = vmatprep.subr.bf16.mxu0 %v9596_v43  ;;  %5384 = vmatprep.subr.bf16.mxu1 %v9597_v21  ;;  %v9607_v43 = vld [vmem:[#allocation49_spill] sm:$0xff]  ;;  %v9608_v21 = vld [vmem:[#allocation50_spill] sm:$0xff] }
 0x50f   :  { %5322 = vmatpush1.bf16.msra.mxu0 %v9598_v28  ;;  %5386 = vmatpush1.bf16.msra.mxu1 %v9599_v52  ;;  %v9609_v28 = vld [vmem:[#allocation51_spill] sm:$0xff]  ;;  %v9610_v52 = vld [vmem:[#allocation52_spill] sm:$0xff] }
 0x510   :  { %5324 = vmatprep.subr.bf16.mxu0 %v9600_v50  ;;  %5388 = vmatprep.subr.bf16.mxu1 %v9601_v58  ;;  %v9611_v50 = vld [vmem:[#allocation53_spill] sm:$0xff]  ;;  %v9612_v58 = vld [vmem:[#allocation54_spill] sm:$0xff] }
 0x513   :  { %5326 = vmatpush1.bf16.msra.mxu0 %v9602_v10  ;;  %5390 = vmatpush1.bf16.msra.mxu1 %v9603_v31  ;;  %v9613_v10 = vld [vmem:[#allocation55_spill] sm:$0xff]  ;;  %v9614_v31 = vld [vmem:[#allocation56_spill] sm:$0xff] }
 0x514   :  { %5328 = vmatprep.subr.bf16.mxu0 %v9604_v13  ;;  %5392 = vmatprep.subr.bf16.mxu1 %v9605_v27  ;;  %v9615_v13 = vld [vmem:[#allocation57_spill] sm:$0xff]  ;;  %v9616_v27 = vld [vmem:[#allocation58_spill] sm:$0xff] }
 0x517   :  { %5330 = vmatpush1.bf16.msra.mxu0 %v9606_v2  ;;  %5394 = vmatpush1.bf16.msra.mxu1 %v9607_v43  ;;  %v9617_v2 = vld [vmem:[#allocation59_spill] sm:$0xff]  ;;  %v9618_v43 = vld [vmem:[#allocation60_spill] sm:$0xff] }
 0x518   :  { %5332 = vmatprep.subr.bf16.mxu0 %v9608_v21  ;;  %5396 = vmatprep.subr.bf16.mxu1 %v9609_v28  ;;  %v9619_v21 = vld [vmem:[#allocation61_spill] sm:$0xff]  ;;  %v9620_v28 = vld [vmem:[#allocation4_spill] sm:$0xff] }
 0x51b   :  { %5334 = vmatpush1.bf16.msra.mxu0 %v9610_v52  ;;  %5398 = vmatpush1.bf16.msra.mxu1 %v9611_v50  ;;  %v9621_v52 = vld [vmem:[#allocation5_spill] sm:$0xff] }
 0x51c   :  { %5336 = vmatprep.subr.bf16.mxu0 %v9612_v58  ;;  %5400 = vmatprep.subr.bf16.mxu1 %v9613_v10 }
 0x51f   :  { %5338 = vmatpush1.bf16.msra.mxu0 %v9614_v31  ;;  %5402 = vmatpush1.bf16.msra.mxu1 %v9615_v13 }
 0x520   :  { %5340 = vmatprep.subr.bf16.mxu0 %v9616_v27  ;;  %5404 = vmatprep.subr.bf16.mxu1 %v9617_v2  ;;  %v9623_v2 = vld [vmem:[#allocation65_spill] sm:$0xff] }
 0x523   :  { %5342 = vmatpush1.bf16.msra.mxu0 %v9618_v43  ;;  %5406 = vmatpush1.bf16.msra.mxu1 %v9619_v21 }
 0x524   :  { %5408 = vmatprep.subr.bf16.mxu0 %v9620_v28  ;;  %5440 = vmatprep.subr.bf16.mxu1 %v9621_v52 }
 0x599   :  { %v1906_v50 = vpop.f32.mrb[26].mxu0  ;;  %v1977_v58 = vpop.f32.mrb[28].mxu1 }
 0x59a   :  { %v1907_v10 = vadd.f32 %v1906_v50, %v9622_v38  ;;  %v1908_v35 = vpop.f32.mrb[27].mxu0  ;;  %v1979_v31 = vpop.f32.mrb[29].mxu1  ;;  %v1978_v21 = vadd.f32 %v1977_v58, %v9501_v36 }
 0x59b   :  { %v1909_v13 = vadd.f32 %v1908_v35, %v8107_v3  ;;  %v1980_v43 = vadd.f32 %v1979_v31, %v9623_v2 }
 0x59c   :  { %v4270_v18 = vmul.f32 -1.442695, %v1907_v10 }
 0x59d   :  { %v4271_v27 = vmul.f32 -1.442695, %v1909_v13  ;;  %v4272_v11 = vmul.f32 -1.442695, %v1980_v43 }
 0x59e   :  { %6592 = vpow2.f32 %v4270_v18 }
 0x59f   :  { %6594 = vpow2.f32 %v4271_v27 }
 0x5a0   :  { %6596 = vpow2.f32 %v4272_v11 }
 0x5a1   :  { %6598 = vtanh.f32 %v1978_v21 }
 0x5a8   :  { %v6593_v28 = vpop.eup %6592 }
 0x5a9   :  { %v6595_v1 = vpop.eup %6594  ;;  %v1985_v52 = vadd.f32 1.0, %v6593_v28 }
 0x5aa   :  { %v1991_v20 = vadd.f32 1.0, %v6595_v1  ;;  %v6597_v50 = vpop.eup %6596 }
 0x5ab   :  { %6600 = vrcp.f32 %v1985_v52  ;;  %v6599_v38 = vpop.eup %6598  ;;  %v1998_v18 = vadd.f32 1.0, %v6597_v50 }
 0x5ac   :  { %6602 = vrcp.f32 %v1991_v20 }
 0x5ad   :  { %6604 = vrcp.f32 %v1998_v18 }
 0x5b5   :  { %v6601_v35 = vpop.eup %6600 }
 0x5b6   :  { %v6603_v10 = vpop.eup %6602  ;;  %v2002_v13 = vmul.f32 %v6601_v35, %v6599_v38 }
 0x5b7   :  { %v2001_v27 = vmul.f32 %v6603_v10, %v8357_v34  ;;  %v6605_v34 = vpop.eup %6604 }
 0x5b9   :  { %v2081_v31 = vpop.f32.mrb[8].mxu0  ;;  %v2152_v43 = vpop.f32.mrb[8].mxu1  ;;  %v8475_v2 = vadd.f32 %v2002_v13, %v2001_v27 }
 0x5ba   :  { %v6409_v28 = vadd.f32 %v2081_v31, %v9441_v60  ;;  %v2083_v11 = vpop.f32.mrb[9].mxu0  ;;  %v2154_v21 = vpop.f32.mrb[9].mxu1  ;;  %v6429_v35 = vadd.f32 %v2152_v43, %v7989_v24 }
 0x5bb   :  { %v6410_v1 = vadd.f32 %v2083_v11, %v9442_v41  ;;  %6606 = vtanh.f32 %v8475_v2  ;;  %v6430_v38 = vadd.f32 %v2154_v21, %v7993_v19 }
 0x5bc   :  { %v4273_v20 = vmul.f32 -1.442695, %v6409_v28 }
 0x5bd   :  { %v4274_v52 = vmul.f32 -1.442695, %v6410_v1  ;;  %v4275_v50 = vmul.f32 -1.442695, %v6430_v38 }
 0x5be   :  { %6608 = vpow2.f32 %v4273_v20 }
 0x5bf   :  { %6610 = vpow2.f32 %v4274_v52 }
 0x5c0   :  { %6612 = vpow2.f32 %v4275_v50 }
 0x5c1   :  { %6614 = vtanh.f32 %v6429_v35  ;;  %v9626_v35 = vld [vmem:[#allocation7_spill] sm:$0xff] }
 0x5c5   :  { %v6607_v58 = vpop.eup %6606 }
 0x5c6   :  { %v8482_v10 = vmul.f32 %v6607_v58, %v6605_v34 }
 0x5c8   :  { %9624 = vst [vmem:[#allocation67_spill] sm:$0xff] %v8482_v10  ;;  %v6609_v13 = vpop.eup %6608  ;;  %2249 = vmatprep.mubr.f32.mxu0 %v8482_v10  ;;  %2320 = vmatprep.mubr.f32.mxu1 %v8482_v10  ;;  %v9641_v10 = vld [vmem:[#allocation22_spill] sm:$0xff] }
 0x5c9   :  { %v6611_v18 = vpop.eup %6610  ;;  %v2164_v27 = vadd.f32 1.0, %v6609_v13  ;;  %v9627_v13 = vld [vmem:[#allocation8_spill] sm:$0xff] }
 0x5ca   :  { %v2170_v31 = vadd.f32 1.0, %v6611_v18  ;;  %v6613_v28 = vpop.eup %6612  ;;  %v9628_v18 = vld [vmem:[#allocation9_spill] sm:$0xff] }
 0x5cb   :  { %6616 = vrcp.f32 %v2164_v27  ;;  %v6615_v11 = vpop.eup %6614  ;;  %v2177_v43 = vadd.f32 1.0, %v6613_v28  ;;  %v9629_v27 = vld [vmem:[#allocation10_spill] sm:$0xff]  ;;  %v9631_v28 = vld [vmem:[#allocation12_spill] sm:$0xff] }
 0x5cc   :  { %6618 = vrcp.f32 %v2170_v31  ;;  %v9630_v31 = vld [vmem:[#allocation11_spill] sm:$0xff] }
 0x5cd   :  { %6620 = vrcp.f32 %v2177_v43  ;;  %v9636_v43 = vld [vmem:[#allocation17_spill] sm:$0xff] }
 0x5d5   :  { %v6617_v21 = vpop.eup %6616 }
 0x5d6   :  { %v6619_v1 = vpop.eup %6618  ;;  %v2181_v20 = vmul.f32 %v6617_v21, %v6615_v11  ;;  %v9632_v11 = vld [vmem:[#allocation13_spill] sm:$0xff]  ;;  %v9633_v21 = vld [vmem:[#allocation14_spill] sm:$0xff] }
 0x5d7   :  { %v2180_v52 = vmul.f32 %v6619_v1, %v8369_v57  ;;  %v6621_v34 = vpop.eup %6620  ;;  %v9625_v57 = vld [vmem:[#allocation6_spill] sm:$0xff]  ;;  %v9634_v1 = vld [vmem:[#allocation15_spill] sm:$0xff] }
 0x5d9   :  { %v8487_v38 = vadd.f32 %v2181_v20, %v2180_v52  ;;  %v9635_v20 = vld [vmem:[#allocation16_spill] sm:$0xff]  ;;  %v9637_v52 = vld [vmem:[#allocation18_spill] sm:$0xff] }
 0x5db   :  { %6622 = vtanh.f32 %v8487_v38 }
 0x5e5   :  { %v6623_v58 = vpop.eup %6622 }
 0x5e6   :  { %v2184_v50 = vmul.f32 %v6623_v58, %v6621_v34  ;;  %v9638_v34 = vld [vmem:[#allocation19_spill] sm:$0xff]  ;;  %v9639_v58 = vld [vmem:[#allocation20_spill] sm:$0xff] }
 0x5e8   :  { %2250 = vmatmul.mubr.f32.vlgmr.msra.gmra.mrb[28].mxu0 %v2184_v50  ;;  %2321 = vmatmul.mubr.f32.vlgmr.msra.gmra.mrb[30].mxu1 %v2184_v50 }
 0x5e9   :  { %5410 = vmatpush1.bf16.msra.mxu0 %v7041_v29  ;;  %5442 = vmatpush1.bf16.msra.mxu1 %v7259_v39 }
 0x5ea   :  { %5412 = vmatprep.subr.bf16.mxu0 %v7050_v32  ;;  %5444 = vmatprep.subr.bf16.mxu1 %v7261_v40 }
 0x5eb   :  { %2424 = vmatprep.mubr.f32.mxu0 %v9382_v49  ;;  %2495 = vmatprep.mubr.f32.mxu1 %v9382_v49 }
 0x5ed   :  { %5414 = vmatpush1.bf16.msra.mxu0 %v7078_v42  ;;  %5446 = vmatpush1.bf16.msra.mxu1 %v7278_v47 }
 0x5ee   :  { %5416 = vmatprep.subr.bf16.mxu0 %v7087_v45  ;;  %5448 = vmatprep.subr.bf16.mxu1 %v7282_v48 }
 0x5f1   :  { %5418 = vmatpush1.bf16.msra.mxu0 %v7113_v55  ;;  %5450 = vmatpush1.bf16.msra.mxu1 %v7298_v53 }
 0x5f2   :  { %5420 = vmatprep.subr.bf16.mxu0 %v7116_v56  ;;  %5452 = vmatprep.subr.bf16.mxu1 %v7301_v54 }
 0x5f5   :  { %5422 = vmatpush1.bf16.msra.mxu0 %v7135_v63  ;;  %5454 = vmatpush1.bf16.msra.mxu1 %v7317_v61 }
 0x5f6   :  { %5424 = vmatprep.subr.bf16.mxu0 %v7138_v0  ;;  %5456 = vmatprep.subr.bf16.mxu1 %v7320_v62 }
 0x5f9   :  { %5426 = vmatpush1.bf16.msra.mxu0 %v7157_v7  ;;  %5458 = vmatpush1.bf16.msra.mxu1 %v7336_v6 }
 0x5fa   :  { %5428 = vmatprep.subr.bf16.mxu0 %v7160_v8  ;;  %5460 = vmatprep.subr.bf16.mxu1 %v7339_v9 }
 0x5fd   :  { %5430 = vmatpush1.bf16.msra.mxu0 %v7181_v14  ;;  %5462 = vmatpush1.bf16.msra.mxu1 %v7354_v16 }
 0x5fe   :  { %5432 = vmatprep.subr.bf16.mxu0 %v7184_v15  ;;  %5464 = vmatprep.subr.bf16.mxu1 %v7357_v17 }
 0x601   :  { %5434 = vmatpush1.bf16.msra.mxu0 %v7205_v22  ;;  %5466 = vmatpush1.bf16.msra.mxu1 %v7372_v25 }
 0x602   :  { %5436 = vmatprep.subr.bf16.mxu0 %v7208_v23  ;;  %5468 = vmatprep.subr.bf16.mxu1 %v7375_v26 }
 0x605   :  { %5438 = vmatpush1.bf16.msra.mxu0 %v7228_v30  ;;  %5470 = vmatpush1.bf16.msra.mxu1 %v7384_v33 }
 0x606   :  { %5472 = vmatprep.subr.bf16.mxu0 %v7399_v37  ;;  %5536 = vmatprep.subr.bf16.mxu1 %v7410_v44 }
 0x608   :  { %2425 = vmatmul.mubr.f32.vlgmr.msra.gmra.mrb[10].mxu0 %v2184_v50  ;;  %2496 = vmatmul.mubr.f32.vlgmr.msra.gmra.mrb[10].mxu1 %v2184_v50  ;;  %v9640_v50 = vld [vmem:[#allocation21_spill] sm:$0xff] }
 0x609   :  { %5474 = vmatpush1.bf16.msra.mxu0 %v7412_v46  ;;  %5538 = vmatpush1.bf16.msra.mxu1 %v7421_v51 }
 0x60a   :  { %5476 = vmatprep.subr.bf16.mxu0 %v7435_v59  ;;  %5540 = vmatprep.subr.bf16.mxu1 %v7446_v4 }
 0x60d   :  { %5478 = vmatpush1.bf16.msra.mxu0 %v7448_v5  ;;  %5542 = vmatpush1.bf16.msra.mxu1 %v7457_v12 }
 0x60e   :  { %5480 = vmatprep.subr.bf16.mxu0 %v9625_v57  ;;  %5544 = vmatprep.subr.bf16.mxu1 %v9626_v35 }
 0x611   :  { %5482 = vmatpush1.bf16.msra.mxu0 %v9627_v13  ;;  %5546 = vmatpush1.bf16.msra.mxu1 %v9628_v18 }
 0x612   :  { %5484 = vmatprep.subr.bf16.mxu0 %v9629_v27  ;;  %5548 = vmatprep.subr.bf16.mxu1 %v9630_v31  ;;  %v9683_v31 = vld [vmem:[#allocation64_spill] sm:$0xff] }
 0x615   :  { %5486 = vmatpush1.bf16.msra.mxu0 %v9631_v28  ;;  %5550 = vmatpush1.bf16.msra.mxu1 %v9632_v11  ;;  %v9642_v28 = vld [vmem:[#allocation23_spill] sm:$0xff]  ;;  %v9643_v11 = vld [vmem:[#allocation24_spill] sm:$0xff] }
 0x616   :  { %5488 = vmatprep.subr.bf16.mxu0 %v9633_v21  ;;  %5552 = vmatprep.subr.bf16.mxu1 %v9634_v1  ;;  %v9644_v21 = vld [vmem:[#allocation25_spill] sm:$0xff]  ;;  %v9645_v1 = vld [vmem:[#allocation26_spill] sm:$0xff] }
 0x619   :  { %5490 = vmatpush1.bf16.msra.mxu0 %v9635_v20  ;;  %5554 = vmatpush1.bf16.msra.mxu1 %v9636_v43  ;;  %v9646_v20 = vld [vmem:[#allocation27_spill] sm:$0xff]  ;;  %v9647_v43 = vld [vmem:[#allocation28_spill] sm:$0xff] }
 0x61a   :  { %5492 = vmatprep.subr.bf16.mxu0 %v9637_v52  ;;  %5556 = vmatprep.subr.bf16.mxu1 %v9638_v34  ;;  %v9648_v52 = vld [vmem:[#allocation29_spill] sm:$0xff]  ;;  %v9649_v34 = vld [vmem:[#allocation30_spill] sm:$0xff] }
 0x61d   :  { %5494 = vmatpush1.bf16.msra.mxu0 %v9639_v58  ;;  %5558 = vmatpush1.bf16.msra.mxu1 %v9640_v50  ;;  %v9650_v58 = vld [vmem:[#allocation31_spill] sm:$0xff]  ;;  %v9651_v50 = vld [vmem:[#allocation32_spill] sm:$0xff] }
 0x61e   :  { %5496 = vmatprep.subr.bf16.mxu0 %v9641_v10  ;;  %5560 = vmatprep.subr.bf16.mxu1 %v9642_v28  ;;  %v9652_v10 = vld [vmem:[#allocation33_spill] sm:$0xff]  ;;  %v9653_v28 = vld [vmem:[#allocation34_spill] sm:$0xff] }
 0x621   :  { %5498 = vmatpush1.bf16.msra.mxu0 %v9643_v11  ;;  %5562 = vmatpush1.bf16.msra.mxu1 %v9644_v21  ;;  %v9654_v11 = vld [vmem:[#allocation35_spill] sm:$0xff]  ;;  %v9655_v21 = vld [vmem:[#allocation36_spill] sm:$0xff] }
 0x622   :  { %5500 = vmatprep.subr.bf16.mxu0 %v9645_v1  ;;  %5564 = vmatprep.subr.bf16.mxu1 %v9646_v20  ;;  %v9656_v1 = vld [vmem:[#allocation37_spill] sm:$0xff]  ;;  %v9657_v20 = vld [vmem:[#allocation38_spill] sm:$0xff] }
 0x625   :  { %5502 = vmatpush1.bf16.msra.mxu0 %v9647_v43  ;;  %5566 = vmatpush1.bf16.msra.mxu1 %v9648_v52  ;;  %v9658_v43 = vld [vmem:[#allocation39_spill] sm:$0xff]  ;;  %v9659_v52 = vld [vmem:[#allocation40_spill] sm:$0xff] }
 0x626   :  { %5504 = vmatprep.subr.bf16.mxu0 %v9649_v34  ;;  %5568 = vmatprep.subr.bf16.mxu1 %v9650_v58  ;;  %v9660_v34 = vld [vmem:[#allocation41_spill] sm:$0xff]  ;;  %v9661_v58 = vld [vmem:[#allocation42_spill] sm:$0xff] }
 0x629   :  { %5506 = vmatpush1.bf16.msra.mxu0 %v9651_v50  ;;  %5570 = vmatpush1.bf16.msra.mxu1 %v9652_v10  ;;  %v9662_v50 = vld [vmem:[#allocation43_spill] sm:$0xff]  ;;  %v9663_v10 = vld [vmem:[#allocation44_spill] sm:$0xff] }
 0x62a   :  { %5508 = vmatprep.subr.bf16.mxu0 %v9653_v28  ;;  %5572 = vmatprep.subr.bf16.mxu1 %v9654_v11  ;;  %v9664_v28 = vld [vmem:[#allocation45_spill] sm:$0xff]  ;;  %v9665_v11 = vld [vmem:[#allocation46_spill] sm:$0xff] }
 0x62d   :  { %5510 = vmatpush1.bf16.msra.mxu0 %v9655_v21  ;;  %5574 = vmatpush1.bf16.msra.mxu1 %v9656_v1  ;;  %v9666_v21 = vld [vmem:[#allocation47_spill] sm:$0xff]  ;;  %v9667_v1 = vld [vmem:[#allocation48_spill] sm:$0xff] }
 0x62e   :  { %5512 = vmatprep.subr.bf16.mxu0 %v9657_v20  ;;  %5576 = vmatprep.subr.bf16.mxu1 %v9658_v43  ;;  %v9668_v20 = vld [vmem:[#allocation49_spill] sm:$0xff]  ;;  %v9669_v43 = vld [vmem:[#allocation50_spill] sm:$0xff] }
 0x631   :  { %5514 = vmatpush1.bf16.msra.mxu0 %v9659_v52  ;;  %5578 = vmatpush1.bf16.msra.mxu1 %v9660_v34  ;;  %v9670_v52 = vld [vmem:[#allocation51_spill] sm:$0xff]  ;;  %v9671_v34 = vld [vmem:[#allocation52_spill] sm:$0xff] }
 0x632   :  { %5516 = vmatprep.subr.bf16.mxu0 %v9661_v58  ;;  %5580 = vmatprep.subr.bf16.mxu1 %v9662_v50  ;;  %v9672_v58 = vld [vmem:[#allocation53_spill] sm:$0xff]  ;;  %v9673_v50 = vld [vmem:[#allocation54_spill] sm:$0xff] }
 0x635   :  { %5518 = vmatpush1.bf16.msra.mxu0 %v9663_v10  ;;  %5582 = vmatpush1.bf16.msra.mxu1 %v9664_v28  ;;  %v9674_v10 = vld [vmem:[#allocation55_spill] sm:$0xff]  ;;  %v9675_v28 = vld [vmem:[#allocation56_spill] sm:$0xff] }
 0x636   :  { %5520 = vmatprep.subr.bf16.mxu0 %v9665_v11  ;;  %5584 = vmatprep.subr.bf16.mxu1 %v9666_v21  ;;  %v9676_v11 = vld [vmem:[#allocation57_spill] sm:$0xff]  ;;  %v9677_v21 = vld [vmem:[#allocation58_spill] sm:$0xff] }
 0x639   :  { %5522 = vmatpush1.bf16.msra.mxu0 %v9667_v1  ;;  %5586 = vmatpush1.bf16.msra.mxu1 %v9668_v20  ;;  %v9678_v1 = vld [vmem:[#allocation59_spill] sm:$0xff]  ;;  %v9679_v20 = vld [vmem:[#allocation60_spill] sm:$0xff] }
 0x63a   :  { %5524 = vmatprep.subr.bf16.mxu0 %v9669_v43  ;;  %5588 = vmatprep.subr.bf16.mxu1 %v9670_v52  ;;  %v9680_v43 = vld [vmem:[#allocation61_spill] sm:$0xff]  ;;  %v9681_v52 = vld [vmem:[#allocation4_spill] sm:$0xff] }
 0x63d   :  { %5526 = vmatpush1.bf16.msra.mxu0 %v9671_v34  ;;  %5590 = vmatpush1.bf16.msra.mxu1 %v9672_v58  ;;  %v9682_v34 = vld [vmem:[#allocation5_spill] sm:$0xff] }
 0x63e   :  { %5528 = vmatprep.subr.bf16.mxu0 %v9673_v50  ;;  %5592 = vmatprep.subr.bf16.mxu1 %v9674_v10 }
 0x641   :  { %5530 = vmatpush1.bf16.msra.mxu0 %v9675_v28  ;;  %5594 = vmatpush1.bf16.msra.mxu1 %v9676_v11 }
 0x642   :  { %5532 = vmatprep.subr.bf16.mxu0 %v9677_v21  ;;  %5596 = vmatprep.subr.bf16.mxu1 %v9678_v1  ;;  %v9684_v1 = vld [vmem:[#allocation65_spill] sm:$0xff] }
 0x645   :  { %5534 = vmatpush1.bf16.msra.mxu0 %v9679_v20  ;;  %5598 = vmatpush1.bf16.msra.mxu1 %v9680_v43 }
 0x646   :  { %5600 = vmatprep.subr.bf16.mxu0 %v9681_v52  ;;  %5632 = vmatprep.subr.bf16.mxu1 %v9682_v34 }
 0x6bb   :  { %v2251_v58 = vpop.f32.mrb[28].mxu0  ;;  %v2322_v50 = vpop.f32.mrb[30].mxu1 }
 0x6bc   :  { %v2252_v10 = vadd.f32 %v2251_v58, %v9683_v31  ;;  %v2253_v27 = vpop.f32.mrb[29].mxu0  ;;  %v2324_v28 = vpop.f32.mrb[31].mxu1  ;;  %v2323_v43 = vadd.f32 %v2322_v50, %v9501_v36 }
 0x6bd   :  { %v2254_v11 = vadd.f32 %v2253_v27, %v8107_v3  ;;  %v2325_v20 = vadd.f32 %v2324_v28, %v9684_v1 }
 0x6be   :  { %v4276_v18 = vmul.f32 -1.442695, %v2252_v10 }
 0x6bf   :  { %v4277_v21 = vmul.f32 -1.442695, %v2254_v11  ;;  %v4278_v13 = vmul.f32 -1.442695, %v2325_v20 }
 0x6c0   :  { %6624 = vpow2.f32 %v4276_v18 }
 0x6c1   :  { %6626 = vpow2.f32 %v4277_v21 }
 0x6c2   :  { %6628 = vpow2.f32 %v4278_v13 }
 0x6c3   :  { %6630 = vtanh.f32 %v2323_v43 }
 0x6ca   :  { %v6625_v52 = vpop.eup %6624 }
 0x6cb   :  { %v6627_v35 = vpop.eup %6626  ;;  %v2330_v34 = vadd.f32 1.0, %v6625_v52 }
 0x6cc   :  { %v2336_v57 = vadd.f32 1.0, %v6627_v35  ;;  %v6629_v58 = vpop.eup %6628 }
 0x6cd   :  { %6632 = vrcp.f32 %v2330_v34  ;;  %v6631_v31 = vpop.eup %6630  ;;  %v2343_v18 = vadd.f32 1.0, %v6629_v58 }
 0x6ce   :  { %6634 = vrcp.f32 %v2336_v57 }
 0x6cf   :  { %6636 = vrcp.f32 %v2343_v18 }
 0x6d7   :  { %v6633_v27 = vpop.eup %6632 }
 0x6d8   :  { %v6635_v10 = vpop.eup %6634  ;;  %v2347_v11 = vmul.f32 %v6633_v27, %v6631_v31 }
 0x6d9   :  { %v2346_v21 = vmul.f32 %v6635_v10, %v8475_v2  ;;  %v6637_v2 = vpop.eup %6636 }
 0x6db   :  { %v2426_v28 = vpop.f32.mrb[10].mxu0  ;;  %v2497_v20 = vpop.f32.mrb[10].mxu1  ;;  %v8593_v1 = vadd.f32 %v2347_v11, %v2346_v21 }
 0x6dc   :  { %v6411_v52 = vadd.f32 %v2426_v28, %v9441_v60  ;;  %v2428_v13 = vpop.f32.mrb[11].mxu0  ;;  %v2499_v43 = vpop.f32.mrb[11].mxu1  ;;  %v6431_v27 = vadd.f32 %v2497_v20, %v7989_v24 }
 0x6dd   :  { %v6412_v35 = vadd.f32 %v2428_v13, %v9442_v41  ;;  %6638 = vtanh.f32 %v8593_v1  ;;  %v6432_v31 = vadd.f32 %v2499_v43, %v7993_v19 }
 0x6de   :  { %v4279_v57 = vmul.f32 -1.442695, %v6411_v52 }
 0x6df   :  { %v4280_v34 = vmul.f32 -1.442695, %v6412_v35  ;;  %v4281_v58 = vmul.f32 -1.442695, %v6432_v31 }
 0x6e0   :  { %6640 = vpow2.f32 %v4279_v57 }
 0x6e1   :  { %6642 = vpow2.f32 %v4280_v34 }
 0x6e2   :  { %6644 = vpow2.f32 %v4281_v58 }
 0x6e3   :  { %6646 = vtanh.f32 %v6431_v27  ;;  %v9687_v27 = vld [vmem:[#allocation7_spill] sm:$0xff] }
 0x6e7   :  { %v6639_v50 = vpop.eup %6638 }
 0x6e8   :  { %v8600_v10 = vmul.f32 %v6639_v50, %v6637_v2 }
 0x6ea   :  { %9685 = vst [vmem:[#allocation68_spill] sm:$0xff] %v8600_v10  ;;  %v6641_v11 = vpop.eup %6640  ;;  %2594 = vmatprep.mubr.f32.mxu0 %v8600_v10  ;;  %2665 = vmatprep.mubr.f32.mxu1 %v8600_v10  ;;  %v9702_v10 = vld [vmem:[#allocation22_spill] sm:$0xff] }
 0x6eb   :  { %v6643_v18 = vpop.eup %6642  ;;  %v2509_v21 = vadd.f32 1.0, %v6641_v11  ;;  %v9688_v11 = vld [vmem:[#allocation8_spill] sm:$0xff] }
 0x6ec   :  { %v2515_v28 = vadd.f32 1.0, %v6643_v18  ;;  %v6645_v52 = vpop.eup %6644  ;;  %v9689_v18 = vld [vmem:[#allocation9_spill] sm:$0xff] }
 0x6ed   :  { %6648 = vrcp.f32 %v2509_v21  ;;  %v6647_v13 = vpop.eup %6646  ;;  %v2522_v20 = vadd.f32 1.0, %v6645_v52  ;;  %v9690_v21 = vld [vmem:[#allocation10_spill] sm:$0xff]  ;;  %v9692_v52 = vld [vmem:[#allocation12_spill] sm:$0xff] }
 0x6ee   :  { %6650 = vrcp.f32 %v2515_v28  ;;  %v9691_v28 = vld [vmem:[#allocation11_spill] sm:$0xff] }
 0x6ef   :  { %6652 = vrcp.f32 %v2522_v20  ;;  %v9697_v20 = vld [vmem:[#allocation17_spill] sm:$0xff] }
 0x6f7   :  { %v6649_v43 = vpop.eup %6648 }
 0x6f8   :  { %v6651_v35 = vpop.eup %6650  ;;  %v2526_v57 = vmul.f32 %v6649_v43, %v6647_v13  ;;  %v9693_v13 = vld [vmem:[#allocation13_spill] sm:$0xff]  ;;  %v9694_v43 = vld [vmem:[#allocation14_spill] sm:$0xff] }
 0x6f9   :  { %v2525_v34 = vmul.f32 %v6651_v35, %v8487_v38  ;;  %v6653_v2 = vpop.eup %6652  ;;  %v9686_v38 = vld [vmem:[#allocation6_spill] sm:$0xff]  ;;  %v9695_v35 = vld [vmem:[#allocation15_spill] sm:$0xff] }
 0x6fb   :  { %v8605_v31 = vadd.f32 %v2526_v57, %v2525_v34  ;;  %v9696_v57 = vld [vmem:[#allocation16_spill] sm:$0xff]  ;;  %v9698_v34 = vld [vmem:[#allocation18_spill] sm:$0xff] }
 0x6fd   :  { %6654 = vtanh.f32 %v8605_v31 }
 0x707   :  { %v6655_v50 = vpop.eup %6654 }
 0x708   :  { %v2529_v58 = vmul.f32 %v6655_v50, %v6653_v2  ;;  %v9699_v2 = vld [vmem:[#allocation19_spill] sm:$0xff]  ;;  %v9700_v50 = vld [vmem:[#allocation20_spill] sm:$0xff] }
 0x70a   :  { %2595 = vmatmul.mubr.f32.vlgmr.msra.gmra.mrb[30].mxu0 %v2529_v58  ;;  %2666 = vmatmul.mubr.f32.vlgmr.msra.gmra.mrb[32].mxu1 %v2529_v58 }
 0x70b   :  { %5602 = vmatpush1.bf16.msra.mxu0 %v7041_v29  ;;  %5634 = vmatpush1.bf16.msra.mxu1 %v7259_v39 }
 0x70c   :  { %5604 = vmatprep.subr.bf16.mxu0 %v7050_v32  ;;  %5636 = vmatprep.subr.bf16.mxu1 %v7261_v40 }
 0x70d   :  { %2769 = vmatprep.mubr.f32.mxu0 %v9382_v49  ;;  %2840 = vmatprep.mubr.f32.mxu1 %v9382_v49 }
 0x70f   :  { %5606 = vmatpush1.bf16.msra.mxu0 %v7078_v42  ;;  %5638 = vmatpush1.bf16.msra.mxu1 %v7278_v47 }
 0x710   :  { %5608 = vmatprep.subr.bf16.mxu0 %v7087_v45  ;;  %5640 = vmatprep.subr.bf16.mxu1 %v7282_v48 }
 0x713   :  { %5610 = vmatpush1.bf16.msra.mxu0 %v7113_v55  ;;  %5642 = vmatpush1.bf16.msra.mxu1 %v7298_v53 }
 0x714   :  { %5612 = vmatprep.subr.bf16.mxu0 %v7116_v56  ;;  %5644 = vmatprep.subr.bf16.mxu1 %v7301_v54 }
 0x717   :  { %5614 = vmatpush1.bf16.msra.mxu0 %v7135_v63  ;;  %5646 = vmatpush1.bf16.msra.mxu1 %v7317_v61 }
 0x718   :  { %5616 = vmatprep.subr.bf16.mxu0 %v7138_v0  ;;  %5648 = vmatprep.subr.bf16.mxu1 %v7320_v62 }
 0x71b   :  { %5618 = vmatpush1.bf16.msra.mxu0 %v7157_v7  ;;  %5650 = vmatpush1.bf16.msra.mxu1 %v7336_v6 }
 0x71c   :  { %5620 = vmatprep.subr.bf16.mxu0 %v7160_v8  ;;  %5652 = vmatprep.subr.bf16.mxu1 %v7339_v9 }
 0x71f   :  { %5622 = vmatpush1.bf16.msra.mxu0 %v7181_v14  ;;  %5654 = vmatpush1.bf16.msra.mxu1 %v7354_v16 }
 0x720   :  { %5624 = vmatprep.subr.bf16.mxu0 %v7184_v15  ;;  %5656 = vmatprep.subr.bf16.mxu1 %v7357_v17 }
 0x723   :  { %5626 = vmatpush1.bf16.msra.mxu0 %v7205_v22  ;;  %5658 = vmatpush1.bf16.msra.mxu1 %v7372_v25 }
 0x724   :  { %5628 = vmatprep.subr.bf16.mxu0 %v7208_v23  ;;  %5660 = vmatprep.subr.bf16.mxu1 %v7375_v26 }
 0x727   :  { %5630 = vmatpush1.bf16.msra.mxu0 %v7228_v30  ;;  %5662 = vmatpush1.bf16.msra.mxu1 %v7384_v33 }
 0x728   :  { %5664 = vmatprep.subr.bf16.mxu0 %v7399_v37  ;;  %5728 = vmatprep.subr.bf16.mxu1 %v7410_v44 }
 0x72a   :  { %2770 = vmatmul.mubr.f32.vlgmr.msra.gmra.mrb[12].mxu0 %v2529_v58  ;;  %2841 = vmatmul.mubr.f32.vlgmr.msra.gmra.mrb[12].mxu1 %v2529_v58  ;;  %v9701_v58 = vld [vmem:[#allocation21_spill] sm:$0xff] }
 0x72b   :  { %5666 = vmatpush1.bf16.msra.mxu0 %v7412_v46  ;;  %5730 = vmatpush1.bf16.msra.mxu1 %v7421_v51 }
 0x72c   :  { %5668 = vmatprep.subr.bf16.mxu0 %v7435_v59  ;;  %5732 = vmatprep.subr.bf16.mxu1 %v7446_v4 }
 0x72f   :  { %5670 = vmatpush1.bf16.msra.mxu0 %v7448_v5  ;;  %5734 = vmatpush1.bf16.msra.mxu1 %v7457_v12 }
 0x730   :  { %5672 = vmatprep.subr.bf16.mxu0 %v9686_v38  ;;  %5736 = vmatprep.subr.bf16.mxu1 %v9687_v27 }
 0x733   :  { %5674 = vmatpush1.bf16.msra.mxu0 %v9688_v11  ;;  %5738 = vmatpush1.bf16.msra.mxu1 %v9689_v18 }
 0x734   :  { %5676 = vmatprep.subr.bf16.mxu0 %v9690_v21  ;;  %5740 = vmatprep.subr.bf16.mxu1 %v9691_v28  ;;  %v9744_v28 = vld [vmem:[#allocation64_spill] sm:$0xff] }
 0x737   :  { %5678 = vmatpush1.bf16.msra.mxu0 %v9692_v52  ;;  %5742 = vmatpush1.bf16.msra.mxu1 %v9693_v13  ;;  %v9703_v52 = vld [vmem:[#allocation23_spill] sm:$0xff]  ;;  %v9704_v13 = vld [vmem:[#allocation24_spill] sm:$0xff] }
 0x738   :  { %5680 = vmatprep.subr.bf16.mxu0 %v9694_v43  ;;  %5744 = vmatprep.subr.bf16.mxu1 %v9695_v35  ;;  %v9705_v43 = vld [vmem:[#allocation25_spill] sm:$0xff]  ;;  %v9706_v35 = vld [vmem:[#allocation26_spill] sm:$0xff] }
 0x73b   :  { %5682 = vmatpush1.bf16.msra.mxu0 %v9696_v57  ;;  %5746 = vmatpush1.bf16.msra.mxu1 %v9697_v20  ;;  %v9707_v57 = vld [vmem:[#allocation27_spill] sm:$0xff]  ;;  %v9708_v20 = vld [vmem:[#allocation28_spill] sm:$0xff] }
 0x73c   :  { %5684 = vmatprep.subr.bf16.mxu0 %v9698_v34  ;;  %5748 = vmatprep.subr.bf16.mxu1 %v9699_v2  ;;  %v9709_v34 = vld [vmem:[#allocation29_spill] sm:$0xff]  ;;  %v9710_v2 = vld [vmem:[#allocation30_spill] sm:$0xff] }
 0x73f   :  { %5686 = vmatpush1.bf16.msra.mxu0 %v9700_v50  ;;  %5750 = vmatpush1.bf16.msra.mxu1 %v9701_v58  ;;  %v9711_v50 = vld [vmem:[#allocation31_spill] sm:$0xff]  ;;  %v9712_v58 = vld [vmem:[#allocation32_spill] sm:$0xff] }
 0x740   :  { %5688 = vmatprep.subr.bf16.mxu0 %v9702_v10  ;;  %5752 = vmatprep.subr.bf16.mxu1 %v9703_v52  ;;  %v9713_v10 = vld [vmem:[#allocation33_spill] sm:$0xff]  ;;  %v9714_v52 = vld [vmem:[#allocation34_spill] sm:$0xff] }
 0x743   :  { %5690 = vmatpush1.bf16.msra.mxu0 %v9704_v13  ;;  %5754 = vmatpush1.bf16.msra.mxu1 %v9705_v43  ;;  %v9715_v13 = vld [vmem:[#allocation35_spill] sm:$0xff]  ;;  %v9716_v43 = vld [vmem:[#allocation36_spill] sm:$0xff] }
 0x744   :  { %5692 = vmatprep.subr.bf16.mxu0 %v9706_v35  ;;  %5756 = vmatprep.subr.bf16.mxu1 %v9707_v57  ;;  %v9717_v35 = vld [vmem:[#allocation37_spill] sm:$0xff]  ;;  %v9718_v57 = vld [vmem:[#allocation38_spill] sm:$0xff] }
 0x747   :  { %5694 = vmatpush1.bf16.msra.mxu0 %v9708_v20  ;;  %5758 = vmatpush1.bf16.msra.mxu1 %v9709_v34  ;;  %v9719_v20 = vld [vmem:[#allocation39_spill] sm:$0xff]  ;;  %v9720_v34 = vld [vmem:[#allocation40_spill] sm:$0xff] }
 0x748   :  { %5696 = vmatprep.subr.bf16.mxu0 %v9710_v2  ;;  %5760 = vmatprep.subr.bf16.mxu1 %v9711_v50  ;;  %v9721_v2 = vld [vmem:[#allocation41_spill] sm:$0xff]  ;;  %v9722_v50 = vld [vmem:[#allocation42_spill] sm:$0xff] }
 0x74b   :  { %5698 = vmatpush1.bf16.msra.mxu0 %v9712_v58  ;;  %5762 = vmatpush1.bf16.msra.mxu1 %v9713_v10  ;;  %v9723_v58 = vld [vmem:[#allocation43_spill] sm:$0xff]  ;;  %v9724_v10 = vld [vmem:[#allocation44_spill] sm:$0xff] }
 0x74c   :  { %5700 = vmatprep.subr.bf16.mxu0 %v9714_v52  ;;  %5764 = vmatprep.subr.bf16.mxu1 %v9715_v13  ;;  %v9725_v52 = vld [vmem:[#allocation45_spill] sm:$0xff]  ;;  %v9726_v13 = vld [vmem:[#allocation46_spill] sm:$0xff] }
 0x74f   :  { %5702 = vmatpush1.bf16.msra.mxu0 %v9716_v43  ;;  %5766 = vmatpush1.bf16.msra.mxu1 %v9717_v35  ;;  %v9727_v43 = vld [vmem:[#allocation47_spill] sm:$0xff]  ;;  %v9728_v35 = vld [vmem:[#allocation48_spill] sm:$0xff] }
 0x750   :  { %5704 = vmatprep.subr.bf16.mxu0 %v9718_v57  ;;  %5768 = vmatprep.subr.bf16.mxu1 %v9719_v20  ;;  %v9729_v57 = vld [vmem:[#allocation49_spill] sm:$0xff]  ;;  %v9730_v20 = vld [vmem:[#allocation50_spill] sm:$0xff] }
 0x753   :  { %5706 = vmatpush1.bf16.msra.mxu0 %v9720_v34  ;;  %5770 = vmatpush1.bf16.msra.mxu1 %v9721_v2  ;;  %v9731_v34 = vld [vmem:[#allocation51_spill] sm:$0xff]  ;;  %v9732_v2 = vld [vmem:[#allocation52_spill] sm:$0xff] }
 0x754   :  { %5708 = vmatprep.subr.bf16.mxu0 %v9722_v50  ;;  %5772 = vmatprep.subr.bf16.mxu1 %v9723_v58  ;;  %v9733_v50 = vld [vmem:[#allocation53_spill] sm:$0xff]  ;;  %v9734_v58 = vld [vmem:[#allocation54_spill] sm:$0xff] }
 0x757   :  { %5710 = vmatpush1.bf16.msra.mxu0 %v9724_v10  ;;  %5774 = vmatpush1.bf16.msra.mxu1 %v9725_v52  ;;  %v9735_v10 = vld [vmem:[#allocation55_spill] sm:$0xff]  ;;  %v9736_v52 = vld [vmem:[#allocation56_spill] sm:$0xff] }
 0x758   :  { %5712 = vmatprep.subr.bf16.mxu0 %v9726_v13  ;;  %5776 = vmatprep.subr.bf16.mxu1 %v9727_v43  ;;  %v9737_v13 = vld [vmem:[#allocation57_spill] sm:$0xff]  ;;  %v9738_v43 = vld [vmem:[#allocation58_spill] sm:$0xff] }
 0x75b   :  { %5714 = vmatpush1.bf16.msra.mxu0 %v9728_v35  ;;  %5778 = vmatpush1.bf16.msra.mxu1 %v9729_v57  ;;  %v9739_v35 = vld [vmem:[#allocation59_spill] sm:$0xff]  ;;  %v9740_v57 = vld [vmem:[#allocation60_spill] sm:$0xff] }
 0x75c   :  { %5716 = vmatprep.subr.bf16.mxu0 %v9730_v20  ;;  %5780 = vmatprep.subr.bf16.mxu1 %v9731_v34  ;;  %v9741_v20 = vld [vmem:[#allocation61_spill] sm:$0xff]  ;;  %v9742_v34 = vld [vmem:[#allocation4_spill] sm:$0xff] }
 0x75f   :  { %5718 = vmatpush1.bf16.msra.mxu0 %v9732_v2  ;;  %5782 = vmatpush1.bf16.msra.mxu1 %v9733_v50  ;;  %v9743_v2 = vld [vmem:[#allocation5_spill] sm:$0xff] }
 0x760   :  { %5720 = vmatprep.subr.bf16.mxu0 %v9734_v58  ;;  %5784 = vmatprep.subr.bf16.mxu1 %v9735_v10 }
 0x763   :  { %5722 = vmatpush1.bf16.msra.mxu0 %v9736_v52  ;;  %5786 = vmatpush1.bf16.msra.mxu1 %v9737_v13 }
 0x764   :  { %5724 = vmatprep.subr.bf16.mxu0 %v9738_v43  ;;  %5788 = vmatprep.subr.bf16.mxu1 %v9739_v35  ;;  %v9745_v35 = vld [vmem:[#allocation65_spill] sm:$0xff] }
 0x767   :  { %5726 = vmatpush1.bf16.msra.mxu0 %v9740_v57  ;;  %5790 = vmatpush1.bf16.msra.mxu1 %v9741_v20 }
 0x768   :  { %5792 = vmatprep.subr.bf16.mxu0 %v9742_v34  ;;  %5824 = vmatprep.subr.bf16.mxu1 %v9743_v2 }
 0x7dd   :  { %v2596_v50 = vpop.f32.mrb[30].mxu0  ;;  %v2667_v58 = vpop.f32.mrb[32].mxu1 }
 0x7de   :  { %v2597_v10 = vadd.f32 %v2596_v50, %v9744_v28  ;;  %v2598_v21 = vpop.f32.mrb[31].mxu0  ;;  %v2669_v52 = vpop.f32.mrb[33].mxu1  ;;  %v2668_v20 = vadd.f32 %v2667_v58, %v9501_v36 }
 0x7df   :  { %v2599_v13 = vadd.f32 %v2598_v21, %v8107_v3  ;;  %v2670_v57 = vadd.f32 %v2669_v52, %v9745_v35 }
 0x7e0   :  { %v4282_v18 = vmul.f32 -1.442695, %v2597_v10 }
 0x7e1   :  { %v4283_v43 = vmul.f32 -1.442695, %v2599_v13  ;;  %v4284_v11 = vmul.f32 -1.442695, %v2670_v57 }
 0x7e2   :  { %6656 = vpow2.f32 %v4282_v18 }
 0x7e3   :  { %6658 = vpow2.f32 %v4283_v43 }
 0x7e4   :  { %6660 = vpow2.f32 %v4284_v11 }
 0x7e5   :  { %6662 = vtanh.f32 %v2668_v20 }
 0x7ec   :  { %v6657_v34 = vpop.eup %6656 }
 0x7ed   :  { %v6659_v27 = vpop.eup %6658  ;;  %v2675_v2 = vadd.f32 1.0, %v6657_v34 }
 0x7ee   :  { %v2681_v38 = vadd.f32 1.0, %v6659_v27  ;;  %v6661_v50 = vpop.eup %6660 }
 0x7ef   :  { %6664 = vrcp.f32 %v2675_v2  ;;  %v6663_v28 = vpop.eup %6662  ;;  %v2688_v18 = vadd.f32 1.0, %v6661_v50 }
 0x7f0   :  { %6666 = vrcp.f32 %v2681_v38 }
 0x7f1   :  { %6668 = vrcp.f32 %v2688_v18 }
 0x7f9   :  { %v6665_v21 = vpop.eup %6664 }
 0x7fa   :  { %v6667_v10 = vpop.eup %6666  ;;  %v2692_v13 = vmul.f32 %v6665_v21, %v6663_v28 }
 0x7fb   :  { %v2691_v43 = vmul.f32 %v6667_v10, %v8593_v1  ;;  %v6669_v1 = vpop.eup %6668 }
 0x7fd   :  { %v2771_v52 = vpop.f32.mrb[12].mxu0  ;;  %v2842_v57 = vpop.f32.mrb[12].mxu1  ;;  %v8711_v35 = vadd.f32 %v2692_v13, %v2691_v43 }
 0x7fe   :  { %v6413_v34 = vadd.f32 %v2771_v52, %v9441_v60  ;;  %v2773_v11 = vpop.f32.mrb[13].mxu0  ;;  %v2844_v20 = vpop.f32.mrb[13].mxu1  ;;  %v6433_v21 = vadd.f32 %v2842_v57, %v7989_v24 }
 0x7ff   :  { %v6414_v27 = vadd.f32 %v2773_v11, %v9442_v41  ;;  %6670 = vtanh.f32 %v8711_v35  ;;  %v6434_v28 = vadd.f32 %v2844_v20, %v7993_v19 }
 0x800   :  { %v4285_v38 = vmul.f32 -1.442695, %v6413_v34 }
 0x801   :  { %v4286_v2 = vmul.f32 -1.442695, %v6414_v27  ;;  %v4287_v50 = vmul.f32 -1.442695, %v6434_v28 }
 0x802   :  { %6672 = vpow2.f32 %v4285_v38 }
 0x803   :  { %6674 = vpow2.f32 %v4286_v2 }
 0x804   :  { %6676 = vpow2.f32 %v4287_v50 }
 0x805   :  { %6678 = vtanh.f32 %v6433_v21  ;;  %v9748_v21 = vld [vmem:[#allocation7_spill] sm:$0xff] }
 0x809   :  { %v6671_v58 = vpop.eup %6670 }
 0x80a   :  { %v8718_v10 = vmul.f32 %v6671_v58, %v6669_v1 }
 0x80c   :  { %9746 = vst [vmem:[#allocation69_spill] sm:$0xff] %v8718_v10  ;;  %v6673_v13 = vpop.eup %6672  ;;  %2939 = vmatprep.mubr.f32.mxu0 %v8718_v10  ;;  %3010 = vmatprep.mubr.f32.mxu1 %v8718_v10  ;;  %v9763_v10 = vld [vmem:[#allocation22_spill] sm:$0xff] }
 0x80d   :  { %v6675_v18 = vpop.eup %6674  ;;  %v2854_v43 = vadd.f32 1.0, %v6673_v13  ;;  %v9749_v13 = vld [vmem:[#allocation8_spill] sm:$0xff] }
 0x80e   :  { %v2860_v52 = vadd.f32 1.0, %v6675_v18  ;;  %v6677_v34 = vpop.eup %6676  ;;  %v9750_v18 = vld [vmem:[#allocation9_spill] sm:$0xff] }
 0x80f   :  { %6680 = vrcp.f32 %v2854_v43  ;;  %v6679_v11 = vpop.eup %6678  ;;  %v2867_v57 = vadd.f32 1.0, %v6677_v34  ;;  %v9751_v43 = vld [vmem:[#allocation10_spill] sm:$0xff]  ;;  %v9753_v34 = vld [vmem:[#allocation12_spill] sm:$0xff] }
 0x810   :  { %6682 = vrcp.f32 %v2860_v52  ;;  %v9752_v52 = vld [vmem:[#allocation11_spill] sm:$0xff] }
 0x811   :  { %6684 = vrcp.f32 %v2867_v57  ;;  %v9758_v57 = vld [vmem:[#allocation17_spill] sm:$0xff] }
 0x819   :  { %v6681_v20 = vpop.eup %6680 }
 0x81a   :  { %v6683_v27 = vpop.eup %6682  ;;  %v2871_v38 = vmul.f32 %v6681_v20, %v6679_v11  ;;  %v9754_v11 = vld [vmem:[#allocation13_spill] sm:$0xff]  ;;  %v9755_v20 = vld [vmem:[#allocation14_spill] sm:$0xff] }
 0x81b   :  { %v2870_v2 = vmul.f32 %v6683_v27, %v8605_v31  ;;  %v6685_v1 = vpop.eup %6684  ;;  %v9747_v31 = vld [vmem:[#allocation6_spill] sm:$0xff]  ;;  %v9756_v27 = vld [vmem:[#allocation15_spill] sm:$0xff] }
 0x81d   :  { %v8723_v28 = vadd.f32 %v2871_v38, %v2870_v2  ;;  %v9757_v38 = vld [vmem:[#allocation16_spill] sm:$0xff]  ;;  %v9759_v2 = vld [vmem:[#allocation18_spill] sm:$0xff] }
 0x81f   :  { %6686 = vtanh.f32 %v8723_v28 }
 0x829   :  { %v6687_v58 = vpop.eup %6686 }
 0x82a   :  { %v2874_v50 = vmul.f32 %v6687_v58, %v6685_v1  ;;  %v9760_v1 = vld [vmem:[#allocation19_spill] sm:$0xff]  ;;  %v9761_v58 = vld [vmem:[#allocation20_spill] sm:$0xff] }
 0x82c   :  { %2940 = vmatmul.mubr.f32.vlgmr.msra.gmra.mrb[32].mxu0 %v2874_v50  ;;  %3011 = vmatmul.mubr.f32.vlgmr.msra.gmra.mrb[34].mxu1 %v2874_v50 }
 0x82d   :  { %5794 = vmatpush1.bf16.msra.mxu0 %v7041_v29  ;;  %5826 = vmatpush1.bf16.msra.mxu1 %v7259_v39 }
 0x82e   :  { %5796 = vmatprep.subr.bf16.mxu0 %v7050_v32  ;;  %5828 = vmatprep.subr.bf16.mxu1 %v7261_v40 }
 0x82f   :  { %3114 = vmatprep.mubr.f32.mxu0 %v9382_v49  ;;  %3185 = vmatprep.mubr.f32.mxu1 %v9382_v49 }
 0x831   :  { %5798 = vmatpush1.bf16.msra.mxu0 %v7078_v42  ;;  %5830 = vmatpush1.bf16.msra.mxu1 %v7278_v47 }
 0x832   :  { %5800 = vmatprep.subr.bf16.mxu0 %v7087_v45  ;;  %5832 = vmatprep.subr.bf16.mxu1 %v7282_v48 }
 0x835   :  { %5802 = vmatpush1.bf16.msra.mxu0 %v7113_v55  ;;  %5834 = vmatpush1.bf16.msra.mxu1 %v7298_v53 }
 0x836   :  { %5804 = vmatprep.subr.bf16.mxu0 %v7116_v56  ;;  %5836 = vmatprep.subr.bf16.mxu1 %v7301_v54 }
 0x839   :  { %5806 = vmatpush1.bf16.msra.mxu0 %v7135_v63  ;;  %5838 = vmatpush1.bf16.msra.mxu1 %v7317_v61 }
 0x83a   :  { %5808 = vmatprep.subr.bf16.mxu0 %v7138_v0  ;;  %5840 = vmatprep.subr.bf16.mxu1 %v7320_v62 }
 0x83d   :  { %5810 = vmatpush1.bf16.msra.mxu0 %v7157_v7  ;;  %5842 = vmatpush1.bf16.msra.mxu1 %v7336_v6 }
 0x83e   :  { %5812 = vmatprep.subr.bf16.mxu0 %v7160_v8  ;;  %5844 = vmatprep.subr.bf16.mxu1 %v7339_v9 }
 0x841   :  { %5814 = vmatpush1.bf16.msra.mxu0 %v7181_v14  ;;  %5846 = vmatpush1.bf16.msra.mxu1 %v7354_v16 }
 0x842   :  { %5816 = vmatprep.subr.bf16.mxu0 %v7184_v15  ;;  %5848 = vmatprep.subr.bf16.mxu1 %v7357_v17 }
 0x845   :  { %5818 = vmatpush1.bf16.msra.mxu0 %v7205_v22  ;;  %5850 = vmatpush1.bf16.msra.mxu1 %v7372_v25 }
 0x846   :  { %5820 = vmatprep.subr.bf16.mxu0 %v7208_v23  ;;  %5852 = vmatprep.subr.bf16.mxu1 %v7375_v26 }
 0x849   :  { %5822 = vmatpush1.bf16.msra.mxu0 %v7228_v30  ;;  %5854 = vmatpush1.bf16.msra.mxu1 %v7384_v33 }
 0x84a   :  { %5856 = vmatprep.subr.bf16.mxu0 %v7399_v37  ;;  %5920 = vmatprep.subr.bf16.mxu1 %v7410_v44 }
 0x84c   :  { %3115 = vmatmul.mubr.f32.vlgmr.msra.gmra.mrb[14].mxu0 %v2874_v50  ;;  %3186 = vmatmul.mubr.f32.vlgmr.msra.gmra.mrb[14].mxu1 %v2874_v50  ;;  %v9762_v50 = vld [vmem:[#allocation21_spill] sm:$0xff] }
 0x84d   :  { %5858 = vmatpush1.bf16.msra.mxu0 %v7412_v46  ;;  %5922 = vmatpush1.bf16.msra.mxu1 %v7421_v51 }
 0x84e   :  { %5860 = vmatprep.subr.bf16.mxu0 %v7435_v59  ;;  %5924 = vmatprep.subr.bf16.mxu1 %v7446_v4 }
 0x851   :  { %5862 = vmatpush1.bf16.msra.mxu0 %v7448_v5  ;;  %5926 = vmatpush1.bf16.msra.mxu1 %v7457_v12 }
 0x852   :  { %5864 = vmatprep.subr.bf16.mxu0 %v9747_v31  ;;  %5928 = vmatprep.subr.bf16.mxu1 %v9748_v21 }
 0x855   :  { %5866 = vmatpush1.bf16.msra.mxu0 %v9749_v13  ;;  %5930 = vmatpush1.bf16.msra.mxu1 %v9750_v18 }
 0x856   :  { %5868 = vmatprep.subr.bf16.mxu0 %v9751_v43  ;;  %5932 = vmatprep.subr.bf16.mxu1 %v9752_v52  ;;  %v9805_v52 = vld [vmem:[#allocation64_spill] sm:$0xff] }
 0x859   :  { %5870 = vmatpush1.bf16.msra.mxu0 %v9753_v34  ;;  %5934 = vmatpush1.bf16.msra.mxu1 %v9754_v11  ;;  %v9764_v34 = vld [vmem:[#allocation23_spill] sm:$0xff]  ;;  %v9765_v11 = vld [vmem:[#allocation24_spill] sm:$0xff] }
 0x85a   :  { %5872 = vmatprep.subr.bf16.mxu0 %v9755_v20  ;;  %5936 = vmatprep.subr.bf16.mxu1 %v9756_v27  ;;  %v9766_v20 = vld [vmem:[#allocation25_spill] sm:$0xff]  ;;  %v9767_v27 = vld [vmem:[#allocation26_spill] sm:$0xff] }
 0x85d   :  { %5874 = vmatpush1.bf16.msra.mxu0 %v9757_v38  ;;  %5938 = vmatpush1.bf16.msra.mxu1 %v9758_v57  ;;  %v9768_v38 = vld [vmem:[#allocation27_spill] sm:$0xff]  ;;  %v9769_v57 = vld [vmem:[#allocation28_spill] sm:$0xff] }
 0x85e   :  { %5876 = vmatprep.subr.bf16.mxu0 %v9759_v2  ;;  %5940 = vmatprep.subr.bf16.mxu1 %v9760_v1  ;;  %v9770_v2 = vld [vmem:[#allocation29_spill] sm:$0xff]  ;;  %v9771_v1 = vld [vmem:[#allocation30_spill] sm:$0xff] }
 0x861   :  { %5878 = vmatpush1.bf16.msra.mxu0 %v9761_v58  ;;  %5942 = vmatpush1.bf16.msra.mxu1 %v9762_v50  ;;  %v9772_v58 = vld [vmem:[#allocation31_spill] sm:$0xff]  ;;  %v9773_v50 = vld [vmem:[#allocation32_spill] sm:$0xff] }
 0x862   :  { %5880 = vmatprep.subr.bf16.mxu0 %v9763_v10  ;;  %5944 = vmatprep.subr.bf16.mxu1 %v9764_v34  ;;  %v9774_v10 = vld [vmem:[#allocation33_spill] sm:$0xff]  ;;  %v9775_v34 = vld [vmem:[#allocation34_spill] sm:$0xff] }
 0x865   :  { %5882 = vmatpush1.bf16.msra.mxu0 %v9765_v11  ;;  %5946 = vmatpush1.bf16.msra.mxu1 %v9766_v20  ;;  %v9776_v11 = vld [vmem:[#allocation35_spill] sm:$0xff]  ;;  %v9777_v20 = vld [vmem:[#allocation36_spill] sm:$0xff] }
 0x866   :  { %5884 = vmatprep.subr.bf16.mxu0 %v9767_v27  ;;  %5948 = vmatprep.subr.bf16.mxu1 %v9768_v38  ;;  %v9778_v27 = vld [vmem:[#allocation37_spill] sm:$0xff]  ;;  %v9779_v38 = vld [vmem:[#allocation38_spill] sm:$0xff] }
 0x869   :  { %5886 = vmatpush1.bf16.msra.mxu0 %v9769_v57  ;;  %5950 = vmatpush1.bf16.msra.mxu1 %v9770_v2  ;;  %v9780_v57 = vld [vmem:[#allocation39_spill] sm:$0xff]  ;;  %v9781_v2 = vld [vmem:[#allocation40_spill] sm:$0xff] }
 0x86a   :  { %5888 = vmatprep.subr.bf16.mxu0 %v9771_v1  ;;  %5952 = vmatprep.subr.bf16.mxu1 %v9772_v58  ;;  %v9782_v1 = vld [vmem:[#allocation41_spill] sm:$0xff]  ;;  %v9783_v58 = vld [vmem:[#allocation42_spill] sm:$0xff] }
 0x86d   :  { %5890 = vmatpush1.bf16.msra.mxu0 %v9773_v50  ;;  %5954 = vmatpush1.bf16.msra.mxu1 %v9774_v10  ;;  %v9784_v50 = vld [vmem:[#allocation43_spill] sm:$0xff]  ;;  %v9785_v10 = vld [vmem:[#allocation44_spill] sm:$0xff] }
 0x86e   :  { %5892 = vmatprep.subr.bf16.mxu0 %v9775_v34  ;;  %5956 = vmatprep.subr.bf16.mxu1 %v9776_v11  ;;  %v9786_v34 = vld [vmem:[#allocation45_spill] sm:$0xff]  ;;  %v9787_v11 = vld [vmem:[#allocation46_spill] sm:$0xff] }
 0x871   :  { %5894 = vmatpush1.bf16.msra.mxu0 %v9777_v20  ;;  %5958 = vmatpush1.bf16.msra.mxu1 %v9778_v27  ;;  %v9788_v20 = vld [vmem:[#allocation47_spill] sm:$0xff]  ;;  %v9789_v27 = vld [vmem:[#allocation48_spill] sm:$0xff] }
 0x872   :  { %5896 = vmatprep.subr.bf16.mxu0 %v9779_v38  ;;  %5960 = vmatprep.subr.bf16.mxu1 %v9780_v57  ;;  %v9790_v38 = vld [vmem:[#allocation49_spill] sm:$0xff]  ;;  %v9791_v57 = vld [vmem:[#allocation50_spill] sm:$0xff] }
 0x875   :  { %5898 = vmatpush1.bf16.msra.mxu0 %v9781_v2  ;;  %5962 = vmatpush1.bf16.msra.mxu1 %v9782_v1  ;;  %v9792_v2 = vld [vmem:[#allocation51_spill] sm:$0xff]  ;;  %v9793_v1 = vld [vmem:[#allocation52_spill] sm:$0xff] }
 0x876   :  { %5900 = vmatprep.subr.bf16.mxu0 %v9783_v58  ;;  %5964 = vmatprep.subr.bf16.mxu1 %v9784_v50  ;;  %v9794_v58 = vld [vmem:[#allocation53_spill] sm:$0xff]  ;;  %v9795_v50 = vld [vmem:[#allocation54_spill] sm:$0xff] }
 0x879   :  { %5902 = vmatpush1.bf16.msra.mxu0 %v9785_v10  ;;  %5966 = vmatpush1.bf16.msra.mxu1 %v9786_v34  ;;  %v9796_v10 = vld [vmem:[#allocation55_spill] sm:$0xff]  ;;  %v9797_v34 = vld [vmem:[#allocation56_spill] sm:$0xff] }
 0x87a   :  { %5904 = vmatprep.subr.bf16.mxu0 %v9787_v11  ;;  %5968 = vmatprep.subr.bf16.mxu1 %v9788_v20  ;;  %v9798_v11 = vld [vmem:[#allocation57_spill] sm:$0xff]  ;;  %v9799_v20 = vld [vmem:[#allocation58_spill] sm:$0xff] }
 0x87d   :  { %5906 = vmatpush1.bf16.msra.mxu0 %v9789_v27  ;;  %5970 = vmatpush1.bf16.msra.mxu1 %v9790_v38  ;;  %v9800_v27 = vld [vmem:[#allocation59_spill] sm:$0xff]  ;;  %v9801_v38 = vld [vmem:[#allocation60_spill] sm:$0xff] }
 0x87e   :  { %5908 = vmatprep.subr.bf16.mxu0 %v9791_v57  ;;  %5972 = vmatprep.subr.bf16.mxu1 %v9792_v2  ;;  %v9802_v57 = vld [vmem:[#allocation61_spill] sm:$0xff]  ;;  %v9803_v2 = vld [vmem:[#allocation4_spill] sm:$0xff] }
 0x881   :  { %5910 = vmatpush1.bf16.msra.mxu0 %v9793_v1  ;;  %5974 = vmatpush1.bf16.msra.mxu1 %v9794_v58  ;;  %v9804_v1 = vld [vmem:[#allocation5_spill] sm:$0xff] }
 0x882   :  { %5912 = vmatprep.subr.bf16.mxu0 %v9795_v50  ;;  %5976 = vmatprep.subr.bf16.mxu1 %v9796_v10 }
 0x885   :  { %5914 = vmatpush1.bf16.msra.mxu0 %v9797_v34  ;;  %5978 = vmatpush1.bf16.msra.mxu1 %v9798_v11 }
 0x886   :  { %5916 = vmatprep.subr.bf16.mxu0 %v9799_v20  ;;  %5980 = vmatprep.subr.bf16.mxu1 %v9800_v27  ;;  %v9806_v27 = vld [vmem:[#allocation65_spill] sm:$0xff] }
 0x889   :  { %5918 = vmatpush1.bf16.msra.mxu0 %v9801_v38  ;;  %5982 = vmatpush1.bf16.msra.mxu1 %v9802_v57 }
 0x88a   :  { %5984 = vmatprep.subr.bf16.mxu0 %v9803_v2  ;;  %6016 = vmatprep.subr.bf16.mxu1 %v9804_v1 }
 0x8ff   :  { %v2941_v58 = vpop.f32.mrb[32].mxu0  ;;  %v3012_v50 = vpop.f32.mrb[34].mxu1 }
 0x900   :  { %v2942_v10 = vadd.f32 %v2941_v58, %v9805_v52  ;;  %v2943_v43 = vpop.f32.mrb[33].mxu0  ;;  %v3014_v34 = vpop.f32.mrb[35].mxu1  ;;  %v3013_v57 = vadd.f32 %v3012_v50, %v9501_v36 }
 0x901   :  { %v2944_v11 = vadd.f32 %v2943_v43, %v8107_v3  ;;  %v3015_v38 = vadd.f32 %v3014_v34, %v9806_v27 }
 0x902   :  { %v4288_v18 = vmul.f32 -1.442695, %v2942_v10 }
 0x903   :  { %v4289_v20 = vmul.f32 -1.442695, %v2944_v11  ;;  %v4290_v13 = vmul.f32 -1.442695, %v3015_v38 }
 0x904   :  { %6688 = vpow2.f32 %v4288_v18 }
 0x905   :  { %6690 = vpow2.f32 %v4289_v20 }
 0x906   :  { %6692 = vpow2.f32 %v4290_v13 }
 0x907   :  { %6694 = vtanh.f32 %v3013_v57 }
 0x90e   :  { %v6689_v2 = vpop.eup %6688 }
 0x90f   :  { %v6691_v21 = vpop.eup %6690  ;;  %v3020_v1 = vadd.f32 1.0, %v6689_v2 }
 0x910   :  { %v3026_v31 = vadd.f32 1.0, %v6691_v21  ;;  %v6693_v58 = vpop.eup %6692 }
 0x911   :  { %6696 = vrcp.f32 %v3020_v1  ;;  %v6695_v52 = vpop.eup %6694  ;;  %v3033_v18 = vadd.f32 1.0, %v6693_v58 }
 0x912   :  { %6698 = vrcp.f32 %v3026_v31 }
 0x913   :  { %6700 = vrcp.f32 %v3033_v18 }
 0x91b   :  { %v6697_v43 = vpop.eup %6696 }
 0x91c   :  { %v6699_v10 = vpop.eup %6698  ;;  %v3037_v11 = vmul.f32 %v6697_v43, %v6695_v52 }
 0x91d   :  { %v3036_v20 = vmul.f32 %v6699_v10, %v8711_v35  ;;  %v6701_v35 = vpop.eup %6700 }
 0x91f   :  { %v3116_v34 = vpop.f32.mrb[14].mxu0  ;;  %v3187_v38 = vpop.f32.mrb[14].mxu1  ;;  %v8829_v27 = vadd.f32 %v3037_v11, %v3036_v20 }
 0x920   :  { %v6415_v2 = vadd.f32 %v3116_v34, %v9441_v60  ;;  %v3118_v13 = vpop.f32.mrb[15].mxu0  ;;  %v3189_v57 = vpop.f32.mrb[15].mxu1  ;;  %v6435_v43 = vadd.f32 %v3187_v38, %v7989_v24 }
 0x921   :  { %v6416_v21 = vadd.f32 %v3118_v13, %v9442_v41  ;;  %6702 = vtanh.f32 %v8829_v27  ;;  %v6436_v52 = vadd.f32 %v3189_v57, %v7993_v19 }
 0x922   :  { %v4291_v31 = vmul.f32 -1.442695, %v6415_v2 }
 0x923   :  { %v4292_v1 = vmul.f32 -1.442695, %v6416_v21  ;;  %v4293_v58 = vmul.f32 -1.442695, %v6436_v52 }
 0x924   :  { %6704 = vpow2.f32 %v4291_v31 }
 0x925   :  { %6706 = vpow2.f32 %v4292_v1 }
 0x926   :  { %6708 = vpow2.f32 %v4293_v58 }
 0x927   :  { %6710 = vtanh.f32 %v6435_v43  ;;  %v9809_v43 = vld [vmem:[#allocation7_spill] sm:$0xff] }
 0x92b   :  { %v6703_v50 = vpop.eup %6702 }
 0x92c   :  { %v8836_v10 = vmul.f32 %v6703_v50, %v6701_v35 }
 0x92e   :  { %9807 = vst [vmem:[#allocation70_spill] sm:$0xff] %v8836_v10  ;;  %v6705_v11 = vpop.eup %6704  ;;  %3284 = vmatprep.mubr.f32.mxu0 %v8836_v10  ;;  %3355 = vmatprep.mubr.f32.mxu1 %v8836_v10  ;;  %v9824_v10 = vld [vmem:[#allocation22_spill] sm:$0xff] }
 0x92f   :  { %v6707_v18 = vpop.eup %6706  ;;  %v3199_v20 = vadd.f32 1.0, %v6705_v11  ;;  %v9810_v11 = vld [vmem:[#allocation8_spill] sm:$0xff] }
 0x930   :  { %v3205_v34 = vadd.f32 1.0, %v6707_v18  ;;  %v6709_v2 = vpop.eup %6708  ;;  %v9811_v18 = vld [vmem:[#allocation9_spill] sm:$0xff] }
 0x931   :  { %6712 = vrcp.f32 %v3199_v20  ;;  %v6711_v13 = vpop.eup %6710  ;;  %v3212_v38 = vadd.f32 1.0, %v6709_v2  ;;  %v9812_v20 = vld [vmem:[#allocation10_spill] sm:$0xff]  ;;  %v9814_v2 = vld [vmem:[#allocation12_spill] sm:$0xff] }
 0x932   :  { %6714 = vrcp.f32 %v3205_v34  ;;  %v9813_v34 = vld [vmem:[#allocation11_spill] sm:$0xff] }
 0x933   :  { %6716 = vrcp.f32 %v3212_v38  ;;  %v9819_v38 = vld [vmem:[#allocation17_spill] sm:$0xff] }
 0x93b   :  { %v6713_v57 = vpop.eup %6712 }
 0x93c   :  { %v6715_v21 = vpop.eup %6714  ;;  %v3216_v31 = vmul.f32 %v6713_v57, %v6711_v13  ;;  %v9815_v13 = vld [vmem:[#allocation13_spill] sm:$0xff]  ;;  %v9816_v57 = vld [vmem:[#allocation14_spill] sm:$0xff] }
 0x93d   :  { %v3215_v1 = vmul.f32 %v6715_v21, %v8723_v28  ;;  %v6717_v35 = vpop.eup %6716  ;;  %v9808_v28 = vld [vmem:[#allocation6_spill] sm:$0xff]  ;;  %v9817_v21 = vld [vmem:[#allocation15_spill] sm:$0xff] }
 0x93f   :  { %v8841_v52 = vadd.f32 %v3216_v31, %v3215_v1  ;;  %v9818_v31 = vld [vmem:[#allocation16_spill] sm:$0xff]  ;;  %v9820_v1 = vld [vmem:[#allocation18_spill] sm:$0xff] }
 0x941   :  { %6718 = vtanh.f32 %v8841_v52 }
 0x94b   :  { %v6719_v50 = vpop.eup %6718 }
 0x94c   :  { %v3219_v58 = vmul.f32 %v6719_v50, %v6717_v35  ;;  %v9821_v35 = vld [vmem:[#allocation19_spill] sm:$0xff]  ;;  %v9822_v50 = vld [vmem:[#allocation20_spill] sm:$0xff] }
 0x94e   :  { %3285 = vmatmul.mubr.f32.vlgmr.msra.gmra.mrb[34].mxu0 %v3219_v58  ;;  %3356 = vmatmul.mubr.f32.vlgmr.msra.gmra.mrb[36].mxu1 %v3219_v58 }
 0x94f   :  { %5986 = vmatpush1.bf16.msra.mxu0 %v7041_v29  ;;  %6018 = vmatpush1.bf16.msra.mxu1 %v7259_v39 }
 0x950   :  { %5988 = vmatprep.subr.bf16.mxu0 %v7050_v32  ;;  %6020 = vmatprep.subr.bf16.mxu1 %v7261_v40 }
 0x951   :  { %3459 = vmatprep.mubr.f32.mxu0 %v9382_v49  ;;  %3530 = vmatprep.mubr.f32.mxu1 %v9382_v49 }
 0x953   :  { %5990 = vmatpush1.bf16.msra.mxu0 %v7078_v42  ;;  %6022 = vmatpush1.bf16.msra.mxu1 %v7278_v47 }
 0x954   :  { %5992 = vmatprep.subr.bf16.mxu0 %v7087_v45  ;;  %6024 = vmatprep.subr.bf16.mxu1 %v7282_v48 }
 0x957   :  { %5994 = vmatpush1.bf16.msra.mxu0 %v7113_v55  ;;  %6026 = vmatpush1.bf16.msra.mxu1 %v7298_v53 }
 0x958   :  { %5996 = vmatprep.subr.bf16.mxu0 %v7116_v56  ;;  %6028 = vmatprep.subr.bf16.mxu1 %v7301_v54 }
 0x95b   :  { %5998 = vmatpush1.bf16.msra.mxu0 %v7135_v63  ;;  %6030 = vmatpush1.bf16.msra.mxu1 %v7317_v61 }
 0x95c   :  { %6000 = vmatprep.subr.bf16.mxu0 %v7138_v0  ;;  %6032 = vmatprep.subr.bf16.mxu1 %v7320_v62 }
 0x95f   :  { %6002 = vmatpush1.bf16.msra.mxu0 %v7157_v7  ;;  %6034 = vmatpush1.bf16.msra.mxu1 %v7336_v6 }
 0x960   :  { %6004 = vmatprep.subr.bf16.mxu0 %v7160_v8  ;;  %6036 = vmatprep.subr.bf16.mxu1 %v7339_v9 }
 0x963   :  { %6006 = vmatpush1.bf16.msra.mxu0 %v7181_v14  ;;  %6038 = vmatpush1.bf16.msra.mxu1 %v7354_v16 }
 0x964   :  { %6008 = vmatprep.subr.bf16.mxu0 %v7184_v15  ;;  %6040 = vmatprep.subr.bf16.mxu1 %v7357_v17 }
 0x967   :  { %6010 = vmatpush1.bf16.msra.mxu0 %v7205_v22  ;;  %6042 = vmatpush1.bf16.msra.mxu1 %v7372_v25 }
 0x968   :  { %6012 = vmatprep.subr.bf16.mxu0 %v7208_v23  ;;  %6044 = vmatprep.subr.bf16.mxu1 %v7375_v26 }
 0x96b   :  { %6014 = vmatpush1.bf16.msra.mxu0 %v7228_v30  ;;  %6046 = vmatpush1.bf16.msra.mxu1 %v7384_v33 }
 0x96c   :  { %6048 = vmatprep.subr.bf16.mxu0 %v7399_v37  ;;  %6112 = vmatprep.subr.bf16.mxu1 %v7410_v44 }
 0x96e   :  { %3460 = vmatmul.mubr.f32.vlgmr.msra.gmra.mrb[16].mxu0 %v3219_v58  ;;  %3531 = vmatmul.mubr.f32.vlgmr.msra.gmra.mrb[16].mxu1 %v3219_v58  ;;  %v9823_v58 = vld [vmem:[#allocation21_spill] sm:$0xff] }
 0x96f   :  { %6050 = vmatpush1.bf16.msra.mxu0 %v7412_v46  ;;  %6114 = vmatpush1.bf16.msra.mxu1 %v7421_v51 }
 0x970   :  { %6052 = vmatprep.subr.bf16.mxu0 %v7435_v59  ;;  %6116 = vmatprep.subr.bf16.mxu1 %v7446_v4 }
 0x973   :  { %6054 = vmatpush1.bf16.msra.mxu0 %v7448_v5  ;;  %6118 = vmatpush1.bf16.msra.mxu1 %v7457_v12 }
 0x974   :  { %6056 = vmatprep.subr.bf16.mxu0 %v9808_v28  ;;  %6120 = vmatprep.subr.bf16.mxu1 %v9809_v43 }
 0x977   :  { %6058 = vmatpush1.bf16.msra.mxu0 %v9810_v11  ;;  %6122 = vmatpush1.bf16.msra.mxu1 %v9811_v18 }
 0x978   :  { %6060 = vmatprep.subr.bf16.mxu0 %v9812_v20  ;;  %6124 = vmatprep.subr.bf16.mxu1 %v9813_v34  ;;  %v9866_v34 = vld [vmem:[#allocation64_spill] sm:$0xff] }
 0x97b   :  { %6062 = vmatpush1.bf16.msra.mxu0 %v9814_v2  ;;  %6126 = vmatpush1.bf16.msra.mxu1 %v9815_v13  ;;  %v9825_v2 = vld [vmem:[#allocation23_spill] sm:$0xff]  ;;  %v9826_v13 = vld [vmem:[#allocation24_spill] sm:$0xff] }
 0x97c   :  { %6064 = vmatprep.subr.bf16.mxu0 %v9816_v57  ;;  %6128 = vmatprep.subr.bf16.mxu1 %v9817_v21  ;;  %v9827_v57 = vld [vmem:[#allocation25_spill] sm:$0xff]  ;;  %v9828_v21 = vld [vmem:[#allocation26_spill] sm:$0xff] }
 0x97f   :  { %6066 = vmatpush1.bf16.msra.mxu0 %v9818_v31  ;;  %6130 = vmatpush1.bf16.msra.mxu1 %v9819_v38  ;;  %v9829_v31 = vld [vmem:[#allocation27_spill] sm:$0xff]  ;;  %v9830_v38 = vld [vmem:[#allocation28_spill] sm:$0xff] }
 0x980   :  { %6068 = vmatprep.subr.bf16.mxu0 %v9820_v1  ;;  %6132 = vmatprep.subr.bf16.mxu1 %v9821_v35  ;;  %v9831_v1 = vld [vmem:[#allocation29_spill] sm:$0xff]  ;;  %v9832_v35 = vld [vmem:[#allocation30_spill] sm:$0xff] }
 0x983   :  { %6070 = vmatpush1.bf16.msra.mxu0 %v9822_v50  ;;  %6134 = vmatpush1.bf16.msra.mxu1 %v9823_v58  ;;  %v9833_v50 = vld [vmem:[#allocation31_spill] sm:$0xff]  ;;  %v9834_v58 = vld [vmem:[#allocation32_spill] sm:$0xff] }
 0x984   :  { %6072 = vmatprep.subr.bf16.mxu0 %v9824_v10  ;;  %6136 = vmatprep.subr.bf16.mxu1 %v9825_v2  ;;  %v9835_v10 = vld [vmem:[#allocation33_spill] sm:$0xff]  ;;  %v9836_v2 = vld [vmem:[#allocation34_spill] sm:$0xff] }
 0x987   :  { %6074 = vmatpush1.bf16.msra.mxu0 %v9826_v13  ;;  %6138 = vmatpush1.bf16.msra.mxu1 %v9827_v57  ;;  %v9837_v13 = vld [vmem:[#allocation35_spill] sm:$0xff]  ;;  %v9838_v57 = vld [vmem:[#allocation36_spill] sm:$0xff] }
 0x988   :  { %6076 = vmatprep.subr.bf16.mxu0 %v9828_v21  ;;  %6140 = vmatprep.subr.bf16.mxu1 %v9829_v31  ;;  %v9839_v21 = vld [vmem:[#allocation37_spill] sm:$0xff]  ;;  %v9840_v31 = vld [vmem:[#allocation38_spill] sm:$0xff] }
 0x98b   :  { %6078 = vmatpush1.bf16.msra.mxu0 %v9830_v38  ;;  %6142 = vmatpush1.bf16.msra.mxu1 %v9831_v1  ;;  %v9841_v38 = vld [vmem:[#allocation39_spill] sm:$0xff]  ;;  %v9842_v1 = vld [vmem:[#allocation40_spill] sm:$0xff] }
 0x98c   :  { %6080 = vmatprep.subr.bf16.mxu0 %v9832_v35  ;;  %6144 = vmatprep.subr.bf16.mxu1 %v9833_v50  ;;  %v9843_v35 = vld [vmem:[#allocation41_spill] sm:$0xff]  ;;  %v9844_v50 = vld [vmem:[#allocation42_spill] sm:$0xff] }
 0x98f   :  { %6082 = vmatpush1.bf16.msra.mxu0 %v9834_v58  ;;  %6146 = vmatpush1.bf16.msra.mxu1 %v9835_v10  ;;  %v9845_v58 = vld [vmem:[#allocation43_spill] sm:$0xff]  ;;  %v9846_v10 = vld [vmem:[#allocation44_spill] sm:$0xff] }
 0x990   :  { %6084 = vmatprep.subr.bf16.mxu0 %v9836_v2  ;;  %6148 = vmatprep.subr.bf16.mxu1 %v9837_v13  ;;  %v9847_v2 = vld [vmem:[#allocation45_spill] sm:$0xff]  ;;  %v9848_v13 = vld [vmem:[#allocation46_spill] sm:$0xff] }
 0x993   :  { %6086 = vmatpush1.bf16.msra.mxu0 %v9838_v57  ;;  %6150 = vmatpush1.bf16.msra.mxu1 %v9839_v21  ;;  %v9849_v57 = vld [vmem:[#allocation47_spill] sm:$0xff]  ;;  %v9850_v21 = vld [vmem:[#allocation48_spill] sm:$0xff] }
 0x994   :  { %6088 = vmatprep.subr.bf16.mxu0 %v9840_v31  ;;  %6152 = vmatprep.subr.bf16.mxu1 %v9841_v38  ;;  %v9851_v31 = vld [vmem:[#allocation49_spill] sm:$0xff]  ;;  %v9852_v38 = vld [vmem:[#allocation50_spill] sm:$0xff] }
 0x997   :  { %6090 = vmatpush1.bf16.msra.mxu0 %v9842_v1  ;;  %6154 = vmatpush1.bf16.msra.mxu1 %v9843_v35  ;;  %v9853_v1 = vld [vmem:[#allocation51_spill] sm:$0xff]  ;;  %v9854_v35 = vld [vmem:[#allocation52_spill] sm:$0xff] }
 0x998   :  { %6092 = vmatprep.subr.bf16.mxu0 %v9844_v50  ;;  %6156 = vmatprep.subr.bf16.mxu1 %v9845_v58  ;;  %v9855_v50 = vld [vmem:[#allocation53_spill] sm:$0xff]  ;;  %v9856_v58 = vld [vmem:[#allocation54_spill] sm:$0xff] }
 0x99b   :  { %6094 = vmatpush1.bf16.msra.mxu0 %v9846_v10  ;;  %6158 = vmatpush1.bf16.msra.mxu1 %v9847_v2  ;;  %v9857_v10 = vld [vmem:[#allocation55_spill] sm:$0xff]  ;;  %v9858_v2 = vld [vmem:[#allocation56_spill] sm:$0xff] }
 0x99c   :  { %6096 = vmatprep.subr.bf16.mxu0 %v9848_v13  ;;  %6160 = vmatprep.subr.bf16.mxu1 %v9849_v57  ;;  %v9859_v13 = vld [vmem:[#allocation57_spill] sm:$0xff]  ;;  %v9860_v57 = vld [vmem:[#allocation58_spill] sm:$0xff] }
 0x99f   :  { %6098 = vmatpush1.bf16.msra.mxu0 %v9850_v21  ;;  %6162 = vmatpush1.bf16.msra.mxu1 %v9851_v31  ;;  %v9861_v21 = vld [vmem:[#allocation59_spill] sm:$0xff]  ;;  %v9862_v31 = vld [vmem:[#allocation60_spill] sm:$0xff] }
 0x9a0   :  { %6100 = vmatprep.subr.bf16.mxu0 %v9852_v38  ;;  %6164 = vmatprep.subr.bf16.mxu1 %v9853_v1  ;;  %v9863_v38 = vld [vmem:[#allocation61_spill] sm:$0xff]  ;;  %v9864_v1 = vld [vmem:[#allocation4_spill] sm:$0xff] }
 0x9a3   :  { %6102 = vmatpush1.bf16.msra.mxu0 %v9854_v35  ;;  %6166 = vmatpush1.bf16.msra.mxu1 %v9855_v50  ;;  %v9865_v35 = vld [vmem:[#allocation5_spill] sm:$0xff] }
 0x9a4   :  { %6104 = vmatprep.subr.bf16.mxu0 %v9856_v58  ;;  %6168 = vmatprep.subr.bf16.mxu1 %v9857_v10 }
 0x9a7   :  { %6106 = vmatpush1.bf16.msra.mxu0 %v9858_v2  ;;  %6170 = vmatpush1.bf16.msra.mxu1 %v9859_v13 }
 0x9a8   :  { %6108 = vmatprep.subr.bf16.mxu0 %v9860_v57  ;;  %6172 = vmatprep.subr.bf16.mxu1 %v9861_v21  ;;  %v9867_v21 = vld [vmem:[#allocation65_spill] sm:$0xff] }
 0x9ab   :  { %6110 = vmatpush1.bf16.msra.mxu0 %v9862_v31  ;;  %6174 = vmatpush1.bf16.msra.mxu1 %v9863_v38 }
 0x9ac   :  { %6176 = vmatprep.subr.bf16.mxu0 %v9864_v1  ;;  %6208 = vmatprep.subr.bf16.mxu1 %v9865_v35 }
 0xa21   :  { %v3286_v50 = vpop.f32.mrb[34].mxu0  ;;  %v3357_v58 = vpop.f32.mrb[36].mxu1 }
 0xa22   :  { %v3287_v10 = vadd.f32 %v3286_v50, %v9866_v34  ;;  %v3288_v20 = vpop.f32.mrb[35].mxu0  ;;  %v3359_v2 = vpop.f32.mrb[37].mxu1  ;;  %v3358_v38 = vadd.f32 %v3357_v58, %v9501_v36 }
 0xa23   :  { %v3289_v13 = vadd.f32 %v3288_v20, %v8107_v3  ;;  %v3360_v31 = vadd.f32 %v3359_v2, %v9867_v21 }
 0xa24   :  { %v4294_v18 = vmul.f32 -1.442695, %v3287_v10 }
 0xa25   :  { %v4295_v57 = vmul.f32 -1.442695, %v3289_v13  ;;  %v4296_v11 = vmul.f32 -1.442695, %v3360_v31 }
 0xa26   :  { %6720 = vpow2.f32 %v4294_v18 }
 0xa27   :  { %6722 = vpow2.f32 %v4295_v57 }
 0xa28   :  { %6724 = vpow2.f32 %v4296_v11 }
 0xa29   :  { %6726 = vtanh.f32 %v3358_v38 }
 0xa30   :  { %v6721_v1 = vpop.eup %6720 }
 0xa31   :  { %v6723_v43 = vpop.eup %6722  ;;  %v3365_v35 = vadd.f32 1.0, %v6721_v1 }
 0xa32   :  { %v3371_v28 = vadd.f32 1.0, %v6723_v43  ;;  %v6725_v50 = vpop.eup %6724 }
 0xa33   :  { %6728 = vrcp.f32 %v3365_v35  ;;  %v6727_v34 = vpop.eup %6726  ;;  %v3378_v18 = vadd.f32 1.0, %v6725_v50 }
 0xa34   :  { %6730 = vrcp.f32 %v3371_v28 }
 0xa35   :  { %6732 = vrcp.f32 %v3378_v18 }
 0xa3d   :  { %v6729_v20 = vpop.eup %6728 }
 0xa3e   :  { %v6731_v10 = vpop.eup %6730  ;;  %v3382_v13 = vmul.f32 %v6729_v20, %v6727_v34 }
 0xa3f   :  { %v3381_v57 = vmul.f32 %v6731_v10, %v8829_v27  ;;  %v6733_v27 = vpop.eup %6732 }
 0xa41   :  { %v3461_v2 = vpop.f32.mrb[16].mxu0  ;;  %v3532_v31 = vpop.f32.mrb[16].mxu1  ;;  %v8947_v21 = vadd.f32 %v3382_v13, %v3381_v57 }
 0xa42   :  { %v6417_v58 = vadd.f32 %v3461_v2, %v9441_v60  ;;  %v3463_v11 = vpop.f32.mrb[17].mxu0  ;;  %v3534_v38 = vpop.f32.mrb[17].mxu1  ;;  %v6437_v20 = vadd.f32 %v3532_v31, %v7989_v24 }
 0xa43   :  { %v6418_v43 = vadd.f32 %v3463_v11, %v9442_v41  ;;  %6734 = vtanh.f32 %v8947_v21  ;;  %v6438_v34 = vadd.f32 %v3534_v38, %v7993_v19 }
 0xa44   :  { %v4297_v28 = vmul.f32 -1.442695, %v6417_v58 }
 0xa45   :  { %v4298_v1 = vmul.f32 -1.442695, %v6418_v43  ;;  %v4299_v50 = vmul.f32 -1.442695, %v6438_v34 }
 0xa46   :  { %6736 = vpow2.f32 %v4297_v28 }
 0xa47   :  { %6738 = vpow2.f32 %v4298_v1 }
 0xa48   :  { %6740 = vpow2.f32 %v4299_v50 }
 0xa49   :  { %6742 = vtanh.f32 %v6437_v20  ;;  %v9908_v20 = vld [vmem:[#allocation46_spill] sm:$0xff] }
 0xa4d   :  { %v6735_v35 = vpop.eup %6734 }
 0xa4e   :  { %v8954_v10 = vmul.f32 %v6735_v35, %v6733_v27 }
 0xa50   :  { %v6737_v13 = vpop.eup %6736  ;;  %3629 = vmatprep.mubr.f32.mxu0 %v8954_v10  ;;  %3700 = vmatprep.mubr.f32.mxu1 %v8954_v10 }
 0xa51   :  { %v6739_v18 = vpop.eup %6738  ;;  %v3544_v57 = vadd.f32 1.0, %v6737_v13  ;;  %v9909_v13 = vld [vmem:[#allocation47_spill] sm:$0xff] }
 0xa52   :  { %v3550_v2 = vadd.f32 1.0, %v6739_v18  ;;  %v6741_v58 = vpop.eup %6740  ;;  %v9910_v18 = vld [vmem:[#allocation48_spill] sm:$0xff] }
 0xa53   :  { %6744 = vrcp.f32 %v3544_v57  ;;  %v6743_v11 = vpop.eup %6742  ;;  %v3557_v31 = vadd.f32 1.0, %v6741_v58  ;;  %v9911_v57 = vld [vmem:[#allocation49_spill] sm:$0xff]  ;;  %v9913_v58 = vld [vmem:[#allocation51_spill] sm:$0xff] }
 0xa54   :  { %6746 = vrcp.f32 %v3550_v2  ;;  %v9912_v2 = vld [vmem:[#allocation50_spill] sm:$0xff] }
 0xa55   :  { %6748 = vrcp.f32 %v3557_v31  ;;  %v9918_v31 = vld [vmem:[#allocation56_spill] sm:$0xff] }
 0xa5d   :  { %v6745_v38 = vpop.eup %6744 }
 0xa5e   :  { %v6747_v43 = vpop.eup %6746  ;;  %v3561_v28 = vmul.f32 %v6745_v38, %v6743_v11  ;;  %v9914_v11 = vld [vmem:[#allocation52_spill] sm:$0xff]  ;;  %v9915_v38 = vld [vmem:[#allocation53_spill] sm:$0xff] }
 0xa5f   :  { %v3560_v1 = vmul.f32 %v6747_v43, %v8841_v52  ;;  %v6749_v27 = vpop.eup %6748  ;;  %v9907_v52 = vld [vmem:[#allocation45_spill] sm:$0xff]  ;;  %v9916_v43 = vld [vmem:[#allocation54_spill] sm:$0xff] }
 0xa61   :  { %v8959_v34 = vadd.f32 %v3561_v28, %v3560_v1  ;;  %v9917_v28 = vld [vmem:[#allocation55_spill] sm:$0xff]  ;;  %v9919_v1 = vld [vmem:[#allocation57_spill] sm:$0xff] }
 0xa63   :  { %6750 = vtanh.f32 %v8959_v34 }
 0xa6d   :  { %v6751_v35 = vpop.eup %6750 }
 0xa6e   :  { %v3564_v50 = vmul.f32 %v6751_v35, %v6749_v27  ;;  %v9920_v27 = vld [vmem:[#allocation58_spill] sm:$0xff]  ;;  %v9921_v35 = vld [vmem:[#allocation59_spill] sm:$0xff] }
 0xa70   :  { %3630 = vmatmul.mubr.f32.vlgmr.msra.gmra.mrb[36].mxu0 %v3564_v50  ;;  %3701 = vmatmul.mubr.f32.vlgmr.msra.gmra.mrb[38].mxu1 %v3564_v50 }
 0xa71   :  { %6178 = vmatpush1.bf16.msra.mxu0 %v7041_v29  ;;  %6210 = vmatpush1.bf16.msra.mxu1 %v7259_v39  ;;  %v9868_v29 = vld [vmem:[#allocation6_spill] sm:$0xff]  ;;  %v9883_v39 = vld [vmem:[#allocation21_spill] sm:$0xff] }
 0xa72   :  { %6180 = vmatprep.subr.bf16.mxu0 %v7050_v32  ;;  %6212 = vmatprep.subr.bf16.mxu1 %v7261_v40  ;;  %v9869_v32 = vld [vmem:[#allocation7_spill] sm:$0xff]  ;;  %v9884_v40 = vld [vmem:[#allocation22_spill] sm:$0xff] }
 0xa73   :  { %3804 = vmatprep.mubr.f32.mxu0 %v9382_v49  ;;  %3875 = vmatprep.mubr.f32.mxu1 %v9382_v49  ;;  %v9906_v49 = vld [vmem:[#allocation44_spill] sm:$0xff] }
 0xa75   :  { %6182 = vmatpush1.bf16.msra.mxu0 %v7078_v42  ;;  %6214 = vmatpush1.bf16.msra.mxu1 %v7278_v47  ;;  %v9870_v42 = vld [vmem:[#allocation8_spill] sm:$0xff]  ;;  %v9885_v47 = vld [vmem:[#allocation23_spill] sm:$0xff] }
 0xa76   :  { %6184 = vmatprep.subr.bf16.mxu0 %v7087_v45  ;;  %6216 = vmatprep.subr.bf16.mxu1 %v7282_v48  ;;  %v9871_v45 = vld [vmem:[#allocation9_spill] sm:$0xff]  ;;  %v9886_v48 = vld [vmem:[#allocation24_spill] sm:$0xff] }
 0xa79   :  { %6186 = vmatpush1.bf16.msra.mxu0 %v7113_v55  ;;  %6218 = vmatpush1.bf16.msra.mxu1 %v7298_v53  ;;  %v9872_v55 = vld [vmem:[#allocation10_spill] sm:$0xff]  ;;  %v9887_v53 = vld [vmem:[#allocation25_spill] sm:$0xff] }
 0xa7a   :  { %6188 = vmatprep.subr.bf16.mxu0 %v7116_v56  ;;  %6220 = vmatprep.subr.bf16.mxu1 %v7301_v54  ;;  %v9873_v56 = vld [vmem:[#allocation11_spill] sm:$0xff]  ;;  %v9888_v54 = vld [vmem:[#allocation26_spill] sm:$0xff] }
 0xa7d   :  { %6190 = vmatpush1.bf16.msra.mxu0 %v7135_v63  ;;  %6222 = vmatpush1.bf16.msra.mxu1 %v7317_v61  ;;  %v9874_v63 = vld [vmem:[#allocation12_spill] sm:$0xff]  ;;  %v9889_v61 = vld [vmem:[#allocation27_spill] sm:$0xff] }
 0xa7e   :  { %6192 = vmatprep.subr.bf16.mxu0 %v7138_v0  ;;  %6224 = vmatprep.subr.bf16.mxu1 %v7320_v62  ;;  %v9875_v0 = vld [vmem:[#allocation13_spill] sm:$0xff]  ;;  %v9890_v62 = vld [vmem:[#allocation28_spill] sm:$0xff] }
 0xa81   :  { %6194 = vmatpush1.bf16.msra.mxu0 %v7157_v7  ;;  %6226 = vmatpush1.bf16.msra.mxu1 %v7336_v6  ;;  %v9876_v7 = vld [vmem:[#allocation14_spill] sm:$0xff]  ;;  %v9891_v6 = vld [vmem:[#allocation29_spill] sm:$0xff] }
 0xa82   :  { %6196 = vmatprep.subr.bf16.mxu0 %v7160_v8  ;;  %6228 = vmatprep.subr.bf16.mxu1 %v7339_v9  ;;  %v9877_v8 = vld [vmem:[#allocation15_spill] sm:$0xff]  ;;  %v9892_v9 = vld [vmem:[#allocation30_spill] sm:$0xff] }
 0xa85   :  { %6198 = vmatpush1.bf16.msra.mxu0 %v7181_v14  ;;  %6230 = vmatpush1.bf16.msra.mxu1 %v7354_v16  ;;  %v9878_v14 = vld [vmem:[#allocation16_spill] sm:$0xff]  ;;  %v9893_v16 = vld [vmem:[#allocation31_spill] sm:$0xff] }
 0xa86   :  { %6200 = vmatprep.subr.bf16.mxu0 %v7184_v15  ;;  %6232 = vmatprep.subr.bf16.mxu1 %v7357_v17  ;;  %v9879_v15 = vld [vmem:[#allocation17_spill] sm:$0xff]  ;;  %v9894_v17 = vld [vmem:[#allocation32_spill] sm:$0xff] }
 0xa89   :  { %6202 = vmatpush1.bf16.msra.mxu0 %v7205_v22  ;;  %6234 = vmatpush1.bf16.msra.mxu1 %v7372_v25  ;;  %v9880_v22 = vld [vmem:[#allocation18_spill] sm:$0xff]  ;;  %v9895_v25 = vld [vmem:[#allocation33_spill] sm:$0xff] }
 0xa8a   :  { %6204 = vmatprep.subr.bf16.mxu0 %v7208_v23  ;;  %6236 = vmatprep.subr.bf16.mxu1 %v7375_v26  ;;  %v9881_v23 = vld [vmem:[#allocation19_spill] sm:$0xff]  ;;  %v9896_v26 = vld [vmem:[#allocation34_spill] sm:$0xff] }
 0xa8d   :  { %6206 = vmatpush1.bf16.msra.mxu0 %v7228_v30  ;;  %6238 = vmatpush1.bf16.msra.mxu1 %v7384_v33  ;;  %v9882_v30 = vld [vmem:[#allocation20_spill] sm:$0xff]  ;;  %v9897_v33 = vld [vmem:[#allocation35_spill] sm:$0xff] }
 0xa8e   :  { %6240 = vmatprep.subr.bf16.mxu0 %v7399_v37  ;;  %6304 = vmatprep.subr.bf16.mxu1 %v7410_v44  ;;  %v9898_v37 = vld [vmem:[#allocation36_spill] sm:$0xff]  ;;  %v9899_v44 = vld [vmem:[#allocation37_spill] sm:$0xff] }
 0xa90   :  { %3805 = vmatmul.mubr.f32.vlgmr.msra.gmra.mrb[18].mxu0 %v3564_v50  ;;  %3876 = vmatmul.mubr.f32.vlgmr.msra.gmra.mrb[18].mxu1 %v3564_v50  ;;  %v9922_v50 = vld [vmem:[#allocation60_spill] sm:$0xff] }
 0xa91   :  { %6242 = vmatpush1.bf16.msra.mxu0 %v7412_v46  ;;  %6306 = vmatpush1.bf16.msra.mxu1 %v7421_v51  ;;  %v9900_v46 = vld [vmem:[#allocation38_spill] sm:$0xff]  ;;  %v9901_v51 = vld [vmem:[#allocation39_spill] sm:$0xff] }
 0xa92   :  { %6244 = vmatprep.subr.bf16.mxu0 %v7435_v59  ;;  %6308 = vmatprep.subr.bf16.mxu1 %v7446_v4  ;;  %v9902_v59 = vld [vmem:[#allocation40_spill] sm:$0xff]  ;;  %v9903_v4 = vld [vmem:[#allocation41_spill] sm:$0xff] }
 0xa95   :  { %6246 = vmatpush1.bf16.msra.mxu0 %v7448_v5  ;;  %6310 = vmatpush1.bf16.msra.mxu1 %v7457_v12  ;;  %v9904_v5 = vld [vmem:[#allocation42_spill] sm:$0xff]  ;;  %v9905_v12 = vld [vmem:[#allocation43_spill] sm:$0xff] }
 0xa96   :  { %6248 = vmatprep.subr.bf16.mxu0 %v9868_v29  ;;  %6312 = vmatprep.subr.bf16.mxu1 %v9869_v32  ;;  %v9923_v29 = vld [vmem:[#allocation61_spill] sm:$0xff]  ;;  %v4088_v32 = vld [vmem:[%s9180_s6] sm:$0xff] }
 0xa99   :  { %6250 = vmatpush1.bf16.msra.mxu0 %v9870_v42  ;;  %6314 = vmatpush1.bf16.msra.mxu1 %v9871_v45  ;;  %v4089_v42 = vld [vmem:[%s9180_s6 + $0x8] sm:$0xff] }
 0xa9a   :  { %6252 = vmatprep.subr.bf16.mxu0 %v9872_v55  ;;  %6316 = vmatprep.subr.bf16.mxu1 %v9873_v56  ;;  %v9064_v45 = vpack.c.bf16 %v4089_v42, %v4088_v32  ;;  %v4092_v32 = vld [vmem:[%s9180_s6 + $0x20] sm:$0xff]  ;;  %v9926_v42 = vld [vmem:[#allocation62_spill] sm:$0xff] }
 0xa9d   :  { %6254 = vmatpush1.bf16.msra.mxu0 %v9874_v63  ;;  %6318 = vmatpush1.bf16.msra.mxu1 %v9875_v0  ;;  %v9924_v63 = vld [vmem:[#allocation64_spill] sm:$0xff] }
 0xa9e   :  { %6256 = vmatprep.subr.bf16.mxu0 %v9876_v7  ;;  %6320 = vmatprep.subr.bf16.mxu1 %v9877_v8 }
 0xaa1   :  { %6258 = vmatpush1.bf16.msra.mxu0 %v9878_v14  ;;  %6322 = vmatpush1.bf16.msra.mxu1 %v9879_v15 }
 0xaa2   :  { %6260 = vmatprep.subr.bf16.mxu0 %v9880_v22  ;;  %6324 = vmatprep.subr.bf16.mxu1 %v9881_v23  ;;  %v9925_v23 = vld [vmem:[#allocation65_spill] sm:$0xff] }
 0xaa5   :  { %6262 = vmatpush1.bf16.msra.mxu0 %v9882_v30  ;;  %6326 = vmatpush1.bf16.msra.mxu1 %v9883_v39 }
 0xaa6   :  { %6264 = vmatprep.subr.bf16.mxu0 %v9884_v40  ;;  %6328 = vmatprep.subr.bf16.mxu1 %v9885_v47 }
 0xaa9   :  { %6266 = vmatpush1.bf16.msra.mxu0 %v9886_v48  ;;  %6330 = vmatpush1.bf16.msra.mxu1 %v9887_v53 }
 0xaaa   :  { %6268 = vmatprep.subr.bf16.mxu0 %v9888_v54  ;;  %6332 = vmatprep.subr.bf16.mxu1 %v9889_v61 }
 0xaad   :  { %6270 = vmatpush1.bf16.msra.mxu0 %v9890_v62  ;;  %6334 = vmatpush1.bf16.msra.mxu1 %v9891_v6 }
 0xaae   :  { %6272 = vmatprep.subr.bf16.mxu0 %v9892_v9  ;;  %6336 = vmatprep.subr.bf16.mxu1 %v9893_v16 }
 0xab1   :  { %6274 = vmatpush1.bf16.msra.mxu0 %v9894_v17  ;;  %6338 = vmatpush1.bf16.msra.mxu1 %v9895_v25 }
 0xab2   :  { %6276 = vmatprep.subr.bf16.mxu0 %v9896_v26  ;;  %6340 = vmatprep.subr.bf16.mxu1 %v9897_v33 }
 0xab5   :  { %6278 = vmatpush1.bf16.msra.mxu0 %v9898_v37  ;;  %6342 = vmatpush1.bf16.msra.mxu1 %v9899_v44 }
 0xab6   :  { %6280 = vmatprep.subr.bf16.mxu0 %v9900_v46  ;;  %6344 = vmatprep.subr.bf16.mxu1 %v9901_v51 }
 0xab9   :  { %6282 = vmatpush1.bf16.msra.mxu0 %v9902_v59  ;;  %6346 = vmatpush1.bf16.msra.mxu1 %v9903_v4 }
 0xaba   :  { %6284 = vmatprep.subr.bf16.mxu0 %v9904_v5  ;;  %6348 = vmatprep.subr.bf16.mxu1 %v9905_v12 }
 0xabd   :  { %6286 = vmatpush1.bf16.msra.mxu0 %v9906_v49  ;;  %6350 = vmatpush1.bf16.msra.mxu1 %v9907_v52 }
 0xabe   :  { %6288 = vmatprep.subr.bf16.mxu0 %v9908_v20  ;;  %6352 = vmatprep.subr.bf16.mxu1 %v9909_v13 }
 0xac1   :  { %6290 = vmatpush1.bf16.msra.mxu0 %v9910_v18  ;;  %6354 = vmatpush1.bf16.msra.mxu1 %v9911_v57 }
 0xac2   :  { %6292 = vmatprep.subr.bf16.mxu0 %v9912_v2  ;;  %6356 = vmatprep.subr.bf16.mxu1 %v9913_v58 }
 0xac5   :  { %6294 = vmatpush1.bf16.msra.mxu0 %v9914_v11  ;;  %6358 = vmatpush1.bf16.msra.mxu1 %v9915_v38 }
 0xac6   :  { %6296 = vmatprep.subr.bf16.mxu0 %v9916_v43  ;;  %6360 = vmatprep.subr.bf16.mxu1 %v9917_v28 }
 0xac9   :  { %6298 = vmatpush1.bf16.msra.mxu0 %v9918_v31  ;;  %6362 = vmatpush1.bf16.msra.mxu1 %v9919_v1  ;;  %v4090_v31 = vld [vmem:[%s9180_s6 + $0x10] sm:$0xff]  ;;  %v4091_v1 = vld [vmem:[%s9180_s6 + $0x18] sm:$0xff] }
 0xaca   :  { %6300 = vmatprep.subr.bf16.mxu0 %v9920_v27  ;;  %6364 = vmatprep.subr.bf16.mxu1 %v9921_v35 }
 0xacd   :  { %6302 = vmatpush1.bf16.msra.mxu0 %v9922_v50  ;;  %6366 = vmatpush1.bf16.msra.mxu1 %v9923_v29  ;;  %v6371_v29 = vpack.c.bf16 %v4091_v1, %v4090_v31 }
 0xace   :  { %6368 = vmatprep.subr.bf16.mxu0 %v9064_v45 }
 0xb43   :  { %v3631_v55 = vpop.f32.mrb[36].mxu0  ;;  %v3702_v56 = vpop.f32.mrb[38].mxu1 }
 0xb44   :  { %v3632_v0 = vadd.f32 %v3631_v55, %v9924_v63  ;;  %v3633_v7 = vpop.f32.mrb[37].mxu0  ;;  %v3704_v8 = vpop.f32.mrb[39].mxu1  ;;  %v3703_v40 = vadd.f32 %v3702_v56, %v9501_v36  ;;  %v4094_v56 = vld [vmem:[%s9180_s6 + $0x30] sm:$0xff] }
 0xb45   :  { %v3634_v14 = vadd.f32 %v3633_v7, %v8107_v3  ;;  %v3705_v30 = vadd.f32 %v3704_v8, %v9925_v23  ;;  %v4096_v8 = vld [vmem:[%s9180_s6 + $0x40] sm:$0xff] }
 0xb46   :  { %v4300_v15 = vmul.f32 -1.442695, %v3632_v0  ;;  %v4095_v0 = vld [vmem:[%s9180_s6 + $0x38] sm:$0xff] }
 0xb47   :  { %v4301_v22 = vmul.f32 -1.442695, %v3634_v14  ;;  %v4302_v39 = vmul.f32 -1.442695, %v3705_v30  ;;  %v6379_v7 = vpack.c.bf16 %v4095_v0, %v4094_v56 }
 0xb48   :  { %6752 = vpow2.f32 %v4300_v15  ;;  %v4098_v15 = vld [vmem:[%s9180_s6 + $0x50] sm:$0xff] }
 0xb49   :  { %6754 = vpow2.f32 %v4301_v22  ;;  %v4099_v22 = vld [vmem:[%s9180_s6 + $0x58] sm:$0xff] }
 0xb4a   :  { %6756 = vpow2.f32 %v4302_v39  ;;  %v6387_v30 = vpack.c.bf16 %v4099_v22, %v4098_v15  ;;  %v4100_v39 = vld [vmem:[%s9180_s6 + $0x60] sm:$0xff] }
 0xb4b   :  { %6758 = vtanh.f32 %v3703_v40  ;;  %v4101_v40 = vld [vmem:[%s9180_s6 + $0x68] sm:$0xff] }
 0xb52   :  { %v6753_v47 = vpop.eup %6752 }
 0xb53   :  { %v6755_v48 = vpop.eup %6754  ;;  %v3710_v53 = vadd.f32 1.0, %v6753_v47  ;;  %v6391_v47 = vpack.c.bf16 %v4101_v40, %v4100_v39 }
 0xb54   :  { %v3716_v54 = vadd.f32 1.0, %v6755_v48  ;;  %v6757_v61 = vpop.eup %6756  ;;  %v4102_v48 = vld [vmem:[%s9180_s6 + $0x70] sm:$0xff] }
 0xb55   :  { %6760 = vrcp.f32 %v3710_v53  ;;  %v6759_v62 = vpop.eup %6758  ;;  %v3723_v17 = vadd.f32 1.0, %v6757_v61  ;;  %v4103_v53 = vld [vmem:[%s9180_s6 + $0x78] sm:$0xff] }
 0xb56   :  { %6762 = vrcp.f32 %v3716_v54  ;;  %v6395_v54 = vpack.c.bf16 %v4103_v53, %v4102_v48  ;;  %v9927_v61 = vld [vmem:[#allocation63_spill] sm:$0xff] }
 0xb57   :  { %6764 = vrcp.f32 %v3723_v17  ;;  %v9932_v17 = vld [vmem:[#allocation70_spill] sm:$0xff] }
 0xb5f   :  { %v6761_v6 = vpop.eup %6760 }
 0xb60   :  { %v6763_v9 = vpop.eup %6762  ;;  %v3727_v16 = vmul.f32 %v6761_v6, %v6759_v62  ;;  %v9928_v62 = vld [vmem:[#allocation66_spill] sm:$0xff]  ;;  %v9929_v6 = vld [vmem:[#allocation67_spill] sm:$0xff] }
 0xb61   :  { %v3726_v25 = vmul.f32 %v6763_v9, %v8947_v21  ;;  %v6765_v21 = vpop.eup %6764  ;;  %v9930_v9 = vld [vmem:[#allocation68_spill] sm:$0xff] }
 0xb63   :  { %v3806_v26 = vpop.f32.mrb[18].mxu0  ;;  %v3877_v33 = vpop.f32.mrb[18].mxu1  ;;  %v9072_v37 = vadd.f32 %v3727_v16, %v3726_v25  ;;  %v9931_v16 = vld [vmem:[#allocation69_spill] sm:$0xff] }
 0xb64   :  { %v6419_v44 = vadd.f32 %v3806_v26, %v9441_v60  ;;  %v3808_v46 = vpop.f32.mrb[19].mxu0  ;;  %v3879_v51 = vpop.f32.mrb[19].mxu1  ;;  %v6439_v20 = vadd.f32 %v3877_v33, %v7989_v24 }
 0xb65   :  { %v6420_v59 = vadd.f32 %v3808_v46, %v9442_v41  ;;  %6766 = vtanh.f32 %v9072_v37  ;;  %v6440_v12 = vadd.f32 %v3879_v51, %v7993_v19 }
 0xb66   :  { %v4303_v4 = vmul.f32 -1.442695, %v6419_v44 }
 0xb67   :  { %v4304_v5 = vmul.f32 -1.442695, %v6420_v59  ;;  %v4305_v52 = vmul.f32 -1.442695, %v6440_v12 }
 0xb68   :  { %6768 = vpow2.f32 %v4303_v4 }
 0xb69   :  { %6770 = vpow2.f32 %v4304_v5 }
 0xb6a   :  { %6772 = vpow2.f32 %v4305_v52 }
 0xb6b   :  { %6774 = vtanh.f32 %v6439_v20 }
 0xb6f   :  { %v6767_v49 = vpop.eup %6766 }
 0xb70   :  { %v9079_v13 = vmul.f32 %v6767_v49, %v6765_v21 }
 0xb72   :  { %v6769_v60 = vpop.eup %6768  ;;  %3974 = vmatprep.mubr.f32.mxu0 %v9079_v13  ;;  %4045 = vmatprep.mubr.f32.mxu1 %v9079_v13 }
 0xb73   :  { %v6771_v41 = vpop.eup %6770  ;;  %v3889_v18 = vadd.f32 1.0, %v6769_v60 }
 0xb74   :  { %v3895_v57 = vadd.f32 1.0, %v6771_v41  ;;  %v6773_v19 = vpop.eup %6772 }
 0xb75   :  { %6776 = vrcp.f32 %v3889_v18  ;;  %v6775_v2 = vpop.eup %6774  ;;  %v3902_v24 = vadd.f32 1.0, %v6773_v19 }
 0xb76   :  { %6778 = vrcp.f32 %v3895_v57 }
 0xb77   :  { %6780 = vrcp.f32 %v3902_v24 }
 0xb7f   :  { %v6777_v58 = vpop.eup %6776 }
 0xb80   :  { %v6779_v11 = vpop.eup %6778  ;;  %v3906_v38 = vmul.f32 %v6777_v58, %v6775_v2 }
 0xb81   :  { %v3905_v43 = vmul.f32 %v6779_v11, %v8959_v34  ;;  %v6781_v27 = vpop.eup %6780  ;;  %v4093_v34 = vld [vmem:[%s9180_s6 + $0x28] sm:$0xff] }
 0xb82   :  { %v6375_v55 = vpack.c.bf16 %v4093_v34, %v4092_v32 }
 0xb83   :  { %v3907_v28 = vadd.f32 %v3906_v38, %v3905_v43 }
 0xb85   :  { %6782 = vtanh.f32 %v3907_v28 }
 0xb8f   :  { %v6783_v35 = vpop.eup %6782 }
 0xb90   :  { %v3909_v50 = vmul.f32 %v6783_v35, %v6781_v27 }
 0xb92   :  { %3975 = vmatmul.mubr.f32.vlgmr.msra.gmra.mrb[38].mxu0 %v3909_v50  ;;  %4046 = vmatmul.mubr.f32.vlgmr.msra.gmra.mrb[40].mxu1 %v3909_v50 }
 0xb93   :  { %6370 = vmatpush3.bf16.msra.mxu0 %v9064_v45  ;;  %4368 = vmatprep.mubr.f32.mxu0 %v9926_v42  ;;  %v4097_v45 = vld [vmem:[%s9180_s6 + $0x48] sm:$0xff] }
 0xb94   :  { %6372 = vmatprep.subr.bf16.mxu0 %v6371_v29  ;;  %v6383_v14 = vpack.c.bf16 %v4097_v45, %v4096_v8 }
 0xb97   :  { %6374 = vmatpush3.bf16.msra.mxu0 %v6371_v29 }
 0xb98   :  { %6376 = vmatprep.subr.bf16.mxu0 %v6375_v55 }
 0xb9b   :  { %6378 = vmatpush3.bf16.msra.mxu0 %v6375_v55 }
 0xb9c   :  { %6380 = vmatprep.subr.bf16.mxu0 %v6379_v7 }
 0xb9f   :  { %6382 = vmatpush3.bf16.msra.mxu0 %v6379_v7 }
 0xba0   :  { %6384 = vmatprep.subr.bf16.mxu0 %v6383_v14 }
 0xba3   :  { %6386 = vmatpush3.bf16.msra.mxu0 %v6383_v14 }
 0xba4   :  { %6388 = vmatprep.subr.bf16.mxu0 %v6387_v30 }
 0xba7   :  { %6390 = vmatpush3.bf16.msra.mxu0 %v6387_v30 }
 0xba8   :  { %6392 = vmatprep.subr.bf16.mxu0 %v6391_v47 }
 0xbab   :  { %6394 = vmatpush3.bf16.msra.mxu0 %v6391_v47 }
 0xbac   :  { %6396 = vmatprep.subr.bf16.mxu0 %v6395_v54 }
 0xbaf   :  { %6398 = vmatpush3.bf16.msra.mxu0 %v6395_v54 }
 0xbb2   :  { %4369 = vmatmul.mubr.f32.vlgmr.msra.gmra.mrb[40].mxu0 %v9927_v61 }
 0xbb3   :  { %4371 = vmatprep.mubr.f32.mxu0 %v9928_v62 }
 0xbb6   :  { %4372 = vmatmul.mubr.f32.gmra.mrb[42].mxu0 %v9929_v6 }
 0xbb7   :  { %4374 = vmatprep.mubr.f32.mxu0 %v9930_v9 }
 0xbba   :  { %4375 = vmatmul.mubr.f32.gmra.mrb[44].mxu0 %v9931_v16 }
 0xbbb   :  { %4377 = vmatprep.mubr.f32.mxu0 %v9932_v17 }
 0xbbe   :  { %4378 = vmatmul.mubr.f32.gmra.mrb[46].mxu0 %v8954_v10 }
 0xbbf   :  { %4380 = vmatprep.mubr.f32.mxu0 %v9079_v13 }
 0xc65   :  { %v3976_v25 = vpop.f32.mrb[38].mxu0  ;;  %v4047_v26 = vpop.f32.mrb[40].mxu1 }
 0xc66   :  { %v3977_v33 = vadd.f32 %v3976_v25, %v9924_v63  ;;  %v3978_v44 = vpop.f32.mrb[39].mxu0  ;;  %v4049_v46 = vpop.f32.mrb[41].mxu1  ;;  %v4048_v21 = vadd.f32 %v4047_v26, %v9501_v36  ;;  %v4309_v36 = vld [vmem:[%s9181_s7] ss:$0 sm:$0xff] }
 0xc67   :  { %v3979_v51 = vadd.f32 %v3978_v44, %v8107_v3  ;;  %v4050_v5 = vadd.f32 %v4049_v46, %v9925_v23 }
 0xc68   :  { %v4306_v59 = vmul.f32 -1.442695, %v3977_v33 }
 0xc69   :  { %v4307_v4 = vmul.f32 -1.442695, %v3979_v51  ;;  %v4308_v12 = vmul.f32 -1.442695, %v4050_v5 }
 0xc6a   :  { %6784 = vpow2.f32 %v4306_v59 }
 0xc6b   :  { %6786 = vpow2.f32 %v4307_v4 }
 0xc6c   :  { %6788 = vpow2.f32 %v4308_v12 }
 0xc6d   :  { %6790 = vtanh.f32 %v4048_v21 }
 0xc74   :  { %v6785_v10 = vpop.eup %6784 }
 0xc75   :  { %v6787_v49 = vpop.eup %6786  ;;  %v4055_v52 = vadd.f32 1.0, %v6785_v10 }
 0xc76   :  { %v4061_v20 = vadd.f32 1.0, %v6787_v49  ;;  %v6789_v63 = vpop.eup %6788 }
 0xc77   :  { %6792 = vrcp.f32 %v4055_v52  ;;  %v6791_v13 = vpop.eup %6790  ;;  %v4068_v18 = vadd.f32 1.0, %v6789_v63 }
 0xc78   :  { %6794 = vrcp.f32 %v4061_v20 }
 0xc79   :  { %6796 = vrcp.f32 %v4068_v18 }
 0xc81   :  { %v6793_v3 = vpop.eup %6792 }
 0xc82   :  { %v6795_v60 = vpop.eup %6794  ;;  %v4072_v41 = vmul.f32 %v6793_v3, %v6791_v13 }
 0xc83   :  { %v4071_v57 = vmul.f32 %v6795_v60, %v9072_v37  ;;  %v6797_v35 = vpop.eup %6796 }
 0xc85   :  { %v4370_v23 = vpop.f32.mrb[40].mxu0  ;;  %v4073_v19 = vadd.f32 %v4072_v41, %v4071_v57 }
 0xc86   :  { %v4183_v2 = vadd.f32 %v4370_v23, %v4309_v36  ;;  %v4177_v58 = vpop.f32.mrb[41].mxu0 }
 0xc87   :  { %v4178_v11 = vadd.f32 %v4309_v36, %v4177_v58  ;;  %6798 = vtanh.f32 %v4073_v19 }
 0xc88   :  { %4227 = vst [vmem:[%s9182_s8 + $0x8] sm:$0xff] %v4183_v2 }
 0xc89   :  { %4226 = vst [vmem:[%s9182_s8] sm:$0xff] %v4178_v11  ;;  %v4373_v37 = vpop.f32.mrb[42].mxu0 }
 0xc8a   :  { %v4193_v38 = vadd.f32 %v4373_v37, %v4309_v36  ;;  %v4187_v24 = vpop.f32.mrb[43].mxu0 }
 0xc8b   :  { %v4188_v43 = vadd.f32 %v4309_v36, %v4187_v24 }
 0xc8c   :  { %4229 = vst [vmem:[%s9182_s8 + $0x18] sm:$0xff] %v4193_v38 }
 0xc8d   :  { %4228 = vst [vmem:[%s9182_s8 + $0x10] sm:$0xff] %v4188_v43  ;;  %v4376_v28 = vpop.f32.mrb[44].mxu0 }
 0xc8e   :  { %v4203_v31 = vadd.f32 %v4376_v28, %v4309_v36  ;;  %v4197_v1 = vpop.f32.mrb[45].mxu0 }
 0xc8f   :  { %v4198_v27 = vadd.f32 %v4309_v36, %v4197_v1 }
 0xc90   :  { %4231 = vst [vmem:[%s9182_s8 + $0x28] sm:$0xff] %v4203_v31 }
 0xc91   :  { %v6799_v50 = vpop.eup %6798  ;;  %4230 = vst [vmem:[%s9182_s8 + $0x20] sm:$0xff] %v4198_v27  ;;  %v4379_v29 = vpop.f32.mrb[46].mxu0 }
 0xc92   :  { %v4213_v32 = vadd.f32 %v4379_v29, %v4309_v36  ;;  %v4207_v34 = vpop.f32.mrb[47].mxu0  ;;  %v4075_v42 = vmul.f32 %v6799_v50, %v6797_v35 }
 0xc93   :  { %v4208_v55 = vadd.f32 %v4309_v36, %v4207_v34 }
 0xc94   :  { %4233 = vst [vmem:[%s9182_s8 + $0x38] sm:$0xff] %v4213_v32  ;;  %4381 = vmatmul.mubr.f32.gmra.mrb[48].mxu0 %v4075_v42 }
 0xc95   :  { %4232 = vst [vmem:[%s9182_s8 + $0x30] sm:$0xff] %v4208_v55 }
 0xd67   :  { %v4382_v56 = vpop.f32.mrb[48].mxu0 }
 0xd68   :  { %v4223_v0 = vadd.f32 %v4382_v56, %v4309_v36  ;;  %v4217_v7 = vpop.f32.mrb[49].mxu0 }
 0xd69   :  { %v4218_v8 = vadd.f32 %v4309_v36, %v4217_v7 }
 0xd6a   :  { %4235 = vst [vmem:[%s9182_s8 + $0x48] sm:$0xff] %v4223_v0 }
 0xd6b   :  { %4234 = vst [vmem:[%s9182_s8 + $0x40] sm:$0xff] %v4218_v8 }

</bundles_post_ra>
